<compile_context>
chip_gen: v7x
topology: tpu7x:2x2x1
jax: 0.10.0
libtpu: 0.0.40
codegen_flags: <defaults>
</compile_context>

<pallas_src>
import functools

import jax
import jax.numpy as jnp
from jax import lax
from jax.experimental import pallas as pl
from jax.experimental.pallas import tpu as pltpu

LN_EPS = 1e-5  # PyTorch nn.LayerNorm default


def _layernorm(v, w, b):
    mu = jnp.mean(v, axis=-1, keepdims=True)
    var = jnp.mean((v - mu) ** 2, axis=-1, keepdims=True)
    return (v - mu) * lax.rsqrt(var + LN_EPS) * w + b


def _gelu(v):
    # TODO(synk): PyTorch nn.GELU defaults to the exact erf form; the tanh
    # approximation is used since erf is not guaranteed to lower in Mosaic.
    # The ~1e-3 difference is further scaled by gamma_2 = 1e-4 in this block.
    return jax.nn.gelu(v, approximate=True)


def layer_scale_block_kernel(
    # inputs
    x_ref,                     # (N, C)   f32   full token sequence of this batch item
    ln1_w_ref, ln1_b_ref,      # (1, C)   f32
    w_q_ref,                   # (C, C)   bf16  (1/sqrt(head_dim) pre-folded)
    w_k_ref,                   # (C, C)   bf16
    w_v_ref,                   # (C, C)   bf16  full width
    wl_exp_ref,                # (H, C)   f32   proj_l weight expanded along lanes
    ww_ref, bw_ref,            # (H, H) / (H,)  f32  SMEM  proj_w weight / bias (out, in)
    w_proj_ref, b_proj_ref,    # (C, C)   bf16 / (1, C) f32
    ln2_w_ref, ln2_b_ref,      # (1, C)   f32
    w1_ref, b1_ref,            # (C, Hd) bf16 / (1, Hd) f32
    w2_ref, b2_ref,            # (Hd, C) bf16 / (1, C) f32
    g1_ref, g2_ref,            # (1, C)   f32
    # outputs
    y_ref, z_ref,              # (tq, C)  f32
    # scratch (persists across the qi grid axis)
    xn_scr,                    # (N, C)      bf16  LayerNorm1(x)
    k_scr,                     # (N, C)      bf16  keys
    v_scr,                     # (N, C)      bf16  values (all heads, lane-concat)
    probs_scr,                 # (H, tq, N)  bf16|f32  softmax probabilities
    o_scr,                     # (tq, C)     bf16  per-head attn@v, lane-concat
    *, num_heads, tq, mix_dtype,
):
    C = x_ref.shape[1]
    D = C // num_heads
    qi = pl.program_id(1)

    # ---- once per batch item: full-sequence LN, K and V projections (cached) ----
    @pl.when(qi == 0)
    def _():
        xn = _layernorm(x_ref[...], ln1_w_ref[...], ln1_b_ref[...]).astype(jnp.bfloat16)
        xn_scr[...] = xn
        k_scr[...] = jnp.dot(xn, w_k_ref[...],
                             preferred_element_type=jnp.float32).astype(jnp.bfloat16)
        v_scr[...] = jnp.dot(xn, w_v_ref[...],
                             preferred_element_type=jnp.float32).astype(jnp.bfloat16)

    # ---------------- attention branch (this query tile only) ----------------
    q_start = pl.multiple_of(qi * tq, tq)
    x_q = x_ref[pl.ds(q_start, tq), :]                                   # (tq, C) f32
    xn_q = xn_scr[pl.ds(q_start, tq), :]                                 # (tq, C) bf16
    q = jnp.dot(xn_q, w_q_ref[...], preferred_element_type=jnp.float32)  # (tq, C)

    wl_exp = wl_exp_ref[...]                                             # (H, C)
    k_all = k_scr[...]                                                   # (N, C) bf16

    # Talking-heads mix #1 (proj_l) folded into the QK^T contraction on the MXU:
    #   mixed_g[q,k] = sum_h Wl[g,h] * (q_h . k_h) = ((q * wl_exp[g]) . k)
    # The proj_l bias is constant along the key axis -> exact softmax no-op.
    # TODO(synk): convert the head loops to lax.fori_loop over a dynamic head index
    # if num_heads ever grows large enough for the unrolled code size to matter.
    for g in range(num_heads):
        qg = (q * wl_exp[g:g + 1, :]).astype(jnp.bfloat16)               # (tq, C)
        logits = lax.dot_general(qg, k_all, (((1,), (1,)), ((), ())),
                                 preferred_element_type=jnp.float32)     # (tq, N)
        m = jnp.max(logits, axis=-1, keepdims=True)
        e = jnp.exp(logits - m)
        inv = pl.reciprocal(jnp.sum(e, axis=-1, keepdims=True), approx=True)  # EUP
        probs_scr[g] = (e * inv).astype(mix_dtype)

    # Talking-heads mix #2 (proj_w, post-softmax), attn @ v per head (full key
    # contraction depth), lane-concatenated into o_scr, then ONE full-width
    # output projection on the MXU.
    for g in range(num_heads):
        a = probs_scr[0] * ww_ref[g, 0].astype(mix_dtype)
        for h in range(1, num_heads):
            a = a + probs_scr[h] * ww_ref[g, h].astype(mix_dtype)
        a = (a + bw_ref[g].astype(mix_dtype)).astype(jnp.bfloat16)       # (tq, N)
        # TODO(synk): when D < 128, process 128//D heads per slice so the V reads
        # and o_scr writes stay 128-lane aligned.
        o_g = jnp.dot(a, v_scr[:, g * D:(g + 1) * D],
                      preferred_element_type=jnp.float32)                # (tq, D)
        o_scr[:, g * D:(g + 1) * D] = o_g.astype(jnp.bfloat16)

    attn_out = jnp.dot(o_scr[...], w_proj_ref[...],
                       preferred_element_type=jnp.float32) + b_proj_ref[...]
    y = x_q + g1_ref[...] * attn_out

    # ---------------- MLP branch ----------------
    yn = _layernorm(y, ln2_w_ref[...], ln2_b_ref[...]).astype(jnp.bfloat16)
    h1 = _gelu(jnp.dot(yn, w1_ref[...], preferred_element_type=jnp.float32)
               + b1_ref[...])
    mlp_out = jnp.dot(h1.astype(jnp.bfloat16), w2_ref[...],
                      preferred_element_type=jnp.float32) + b2_ref[...]
    z = y + g2_ref[...] * mlp_out

    # NOTE: the PyTorch module returns (y, z), so both (B, N, C) outputs are kept;
    # drop y_ref if a caller only ever consumes z (halves HBM writeback).
    y_ref[...] = y
    z_ref[...] = z


def _vmem_budget_bytes():
    """Generation-aware VMEM budget with headroom (v5e/v6e: 128 MiB, v7x: 64 MiB)."""
    try:
        cap = int(pltpu.get_tpu_info().vmem_capacity_bytes)
    except Exception:
        cap = 64 << 20  # conservative: assume v7x-sized VMEM
    return min(int(cap * 0.85), cap - (8 << 20))


def _probs_dtype():
    """bf16 probs storage/mixing only on chips with a bf16 VALU (v6e, v7x)."""
    try:
        kind = jax.devices()[0].device_kind.lower()
    except Exception:
        return jnp.bfloat16
    if any(v in kind for v in ("v2", "v3", "v4", "v5")):
        return jnp.float32
    return jnp.bfloat16


def _estimate_vmem_bytes(N, C, hidden, H, tq, prob_bytes, weight_buffers):
    bf16, f32 = 2, 4
    weights = (4 * C * C + 2 * C * hidden) * bf16 * weight_buffers
    weights += (H * C + 8 * C + 2 * hidden) * f32              # wl_exp + small vectors
    x_block = 2 * N * C * f32                                   # full-x block, 2 buffers
    out_blocks = 2 * 2 * tq * C * f32                           # y and z, 2 buffers each
    scratch = 3 * N * C * bf16 + H * tq * N * prob_bytes + tq * C * bf16
    transient = (2 * tq * N + 6 * tq * C + 2 * tq * hidden) * f32
    return int(1.25 * (weights + x_block + out_blocks + scratch + transient)) + (2 << 20)


def _pick_query_tile(N, C, hidden, H, prob_bytes, weight_buffers, budget):
    candidates = [t for t in (512, 256, 128) if N % t == 0]
    for t in candidates:
        if _estimate_vmem_bytes(N, C, hidden, H, t, prob_bytes, weight_buffers) <= budget:
            return t
    if candidates:
        # Even the smallest dividing tile is over budget; key-block streaming with
        # online softmax (see TODO at top) is the real fix for very large N.
        return candidates[-1]
    # TODO(synk): pad/mask remainder tiles (e.g. N = 197) instead of processing the
    # whole sequence in a single grid step.
    return N


def init_params(key, dim, num_heads, mlp_ratio=4.0, init_values=1e-4):
    """Deterministic synthetic parameters.

    Linear weights are stored (in_features, out_features) -> out = in @ W + b,
    except proj_l / proj_w ("wl" / "ww"), which use the PyTorch nn.Linear
    (out_head, in_head) layout: out_g = sum_h in_h * W[g, h] + b[g].
    """
    hidden = int(dim * mlp_ratio)
    ks = jax.random.split(key, 10)

    def lin(k, fan_in, fan_out):
        return (jax.random.normal(k, (fan_in, fan_out), jnp.float32)
                / jnp.sqrt(jnp.float32(fan_in)))

    return dict(
        ln1_w=jnp.ones((1, dim), jnp.float32),
        ln1_b=jnp.zeros((1, dim), jnp.float32),
        w_qkv=lin(ks[0], dim, 3 * dim),                       # qkv_bias=False
        w_proj=lin(ks[1], dim, dim),
        b_proj=0.01 * jax.random.normal(ks[6], (1, dim), jnp.float32),
        wl=lin(ks[2], num_heads, num_heads),                  # proj_l, (out, in)
        bl=jnp.zeros((num_heads,), jnp.float32),              # softmax no-op (see kernel)
        ww=lin(ks[3], num_heads, num_heads),                  # proj_w, (out, in)
        bw=0.01 * jax.random.normal(ks[7], (num_heads,), jnp.float32),
        ln2_w=jnp.ones((1, dim), jnp.float32),
        ln2_b=jnp.zeros((1, dim), jnp.float32),
        w1=lin(ks[4], dim, hidden),
        b1=0.01 * jax.random.normal(ks[8], (1, hidden), jnp.float32),
        w2=lin(ks[5], hidden, dim),
        b2=0.01 * jax.random.normal(ks[9], (1, dim), jnp.float32),
        g1=jnp.full((1, dim), init_values, jnp.float32),
        g2=jnp.full((1, dim), init_values, jnp.float32),
    )


def layer_scale_block(x, params, num_heads):
    B, N, C = x.shape
    H = num_heads
    assert C % H == 0, "dim must be divisible by num_heads"
    D = C // H
    scale = float(D) ** -0.5
    hidden = params["w1"].shape[1]

    # ---- host-side weight preprocessing (layout + dtype), outside the kernel ----
    w_qkv = params["w_qkv"]                                   # (C, 3C) = [q | k | v]
    w_q = (w_qkv[:, :C] * scale).astype(jnp.bfloat16)         # fold 1/sqrt(D) into q
    w_k = w_qkv[:, C:2 * C].astype(jnp.bfloat16)
    w_v = w_qkv[:, 2 * C:].astype(jnp.bfloat16)               # (C, C) full width
    w_proj = params["w_proj"].astype(jnp.bfloat16)            # (C, C) full width
    # proj_l weight expanded along channels: wl_exp[g, h*D + d] = wl[g, h]
    wl_exp = jnp.repeat(params["wl"], D, axis=1).astype(jnp.float32)     # (H, C)
    # NOTE: proj_l bias (params["bl"]) is constant along the softmax (key) axis,
    # hence has exactly no effect on the output; it is intentionally not passed.
    w1 = params["w1"].astype(jnp.bfloat16)
    w2 = params["w2"].astype(jnp.bfloat16)

    prob_dtype = _probs_dtype()
    prob_bytes = jnp.dtype(prob_dtype).itemsize
    budget = _vmem_budget_bytes()

    def run(single_buffer_weights):
        weight_buffers = 1 if single_buffer_weights else 2
        tq = _pick_query_tile(N, C, hidden, H, prob_bytes, weight_buffers, budget)
        n_qt = N // tq
        vmem_limit = max(
            16 << 20,
            min(_estimate_vmem_bytes(N, C, hidden, H, tq, prob_bytes, weight_buffers),
                budget))

        def wspec(shape):
            if single_buffer_weights:
                # Constant index_map -> double buffering would be pure VMEM waste.
                return pl.BlockSpec(shape, lambda b, qi: (0, 0),
                                    pipeline_mode=pl.Buffered(1))
            return pl.BlockSpec(shape, lambda b, qi: (0, 0))

        smem = pl.BlockSpec(memory_space=pltpu.MemorySpace.SMEM)
        x_spec = pl.BlockSpec((None, N, C), lambda b, qi: (b, 0, 0))
        out_spec = pl.BlockSpec((None, tq, C), lambda b, qi: (b, qi, 0))

        kernel = functools.partial(layer_scale_block_kernel,
                                   num_heads=H, tq=tq, mix_dtype=prob_dtype)

        return pl.pallas_call(
            kernel,
            out_shape=(
                jax.ShapeDtypeStruct((B, N, C), jnp.float32),
                jax.ShapeDtypeStruct((B, N, C), jnp.float32),
            ),
            grid=(B, n_qt),
            in_specs=[
                x_spec,
                wspec((1, C)), wspec((1, C)),                 # ln1 w, b
                wspec((C, C)), wspec((C, C)), wspec((C, C)),  # w_q (scaled), w_k, w_v
                wspec((H, C)),                                # proj_l weight, expanded
                smem, smem,                                   # proj_w weight / bias
                wspec((C, C)), wspec((1, C)),                 # w_proj, b_proj
                wspec((1, C)), wspec((1, C)),                 # ln2 w, b
                wspec((C, hidden)), wspec((1, hidden)),       # fc1 w, b
                wspec((hidden, C)), wspec((1, C)),            # fc2 w, b
                wspec((1, C)), wspec((1, C)),                 # gamma_1, gamma_2
            ],
            out_specs=(out_spec, out_spec),
            scratch_shapes=[
                pltpu.VMEM((N, C), jnp.bfloat16),             # xn = LN1(x)
                pltpu.VMEM((N, C), jnp.bfloat16),             # K
                pltpu.VMEM((N, C), jnp.bfloat16),             # V (lane-concat heads)
                pltpu.VMEM((H, tq, N), prob_dtype),           # softmax probs
                pltpu.VMEM((tq, C), jnp.bfloat16),            # o (lane-concat heads)
            ],
            compiler_params=pltpu.CompilerParams(
                # qi axis must be sequential ("arbitrary"): the xn/K/V scratch is
                # filled once per batch item under pl.when(qi == 0).
                dimension_semantics=("parallel", "arbitrary"),
                vmem_limit_bytes=vmem_limit,
            ),
        )(
            x,
            params["ln1_w"], params["ln1_b"],
            w_q, w_k, w_v,
            wl_exp,
            params["ww"], params["bw"],
            w_proj, params["b_proj"],
            params["ln2_w"], params["ln2_b"],
            w1, params["b1"], w2, params["b2"],
            params["g1"], params["g2"],
        )

    try:
        out = run(single_buffer_weights=True)
        jax.block_until_ready(out)
    except Exception:
        # Fallback if this JAX version rejects pipeline_mode=pl.Buffered(1).
        out = run(single_buffer_weights=False)
    return out


def layer_scale_block_ref(x, params, num_heads):
    """Pure-JAX f32 reference mirroring the PyTorch module (for verification)."""
    B, N, C = x.shape
    H = num_heads
    D = C // H
    scale = float(D) ** -0.5

    def ln(v, w, b):
        mu = v.mean(-1, keepdims=True)
        var = ((v - mu) ** 2).mean(-1, keepdims=True)
        return (v - mu) / jnp.sqrt(var + LN_EPS) * w + b

    xn = ln(x, params["ln1_w"], params["ln1_b"])
    qkv = (xn @ params["w_qkv"]).reshape(B, N, 3, H, D).transpose(2, 0, 3, 1, 4)
    q, k, v = qkv[0] * scale, qkv[1], qkv[2]
    attn = jnp.einsum("bhqd,bhkd->bhqk", q, k)
    attn = jnp.einsum("gh,bhqk->bgqk", params["wl"], attn) + params["bl"][None, :, None, None]
    attn = jax.nn.softmax(attn, axis=-1)
    attn = jnp.einsum("gh,bhqk->bgqk", params["ww"], attn) + params["bw"][None, :, None, None]
    o = jnp.einsum("bhqk,bhkd->bhqd", attn, v).transpose(0, 2, 1, 3).reshape(B, N, C)
    attn_out = o @ params["w_proj"] + params["b_proj"]
    y = x + params["g1"] * attn_out

    yn = ln(y, params["ln2_w"], params["ln2_b"])
    h1 = jax.nn.gelu(yn @ params["w1"] + params["b1"], approximate=True)
    z = y + params["g2"] * (h1 @ params["w2"] + params["b2"])
    return y, z


if __name__ == "__main__":
    B, N, C, H = 2, 8, 32, 4   # batch, tokens, channels, heads  (head_dim = 8)
    key = jax.random.PRNGKey(0)
    kx, kp = jax.random.split(key)
    x = jax.random.normal(kx, (B, N, C), jnp.float32)
    params = init_params(kp, dim=C, num_heads=H)

    y, z = layer_scale_block(x, params, num_heads=H)
    jax.block_until_ready((y, z))

    assert y.shape == (B, N, C) and z.shape == (B, N, C)
    assert jnp.all(jnp.isfinite(y)) and jnp.all(jnp.isfinite(z))

    # gamma_{1,2} = 1e-4 keep the residual branches tiny, so even with bf16
    # matmuls / probs and the approximate-EUP reciprocal the fused kernel
    # matches the pure-f32 reference tightly.
    y_ref, z_ref = layer_scale_block_ref(x, params, num_heads=H)
    assert jnp.allclose(y, y_ref, atol=1e-2, rtol=1e-2), float(jnp.max(jnp.abs(y - y_ref)))
    assert jnp.allclose(z, z_ref, atol=1e-2, rtol=1e-2), float(jnp.max(jnp.abs(z - z_ref)))

    print("KERNEL_OK")
</pallas_src>

<mosaic_0001>
module attributes {stable_mosaic.version = 11 : i64} {
  func.func @layer_scale_block_kernel(%arg0: i32, %arg1: i32, %arg2: memref<1x8x32xf32, #tpu.memory_space<vmem>>, %arg3: memref<1x32xf32, #tpu.memory_space<vmem>>, %arg4: memref<1x32xf32, #tpu.memory_space<vmem>>, %arg5: memref<32x32xbf16, #tpu.memory_space<vmem>>, %arg6: memref<32x32xbf16, #tpu.memory_space<vmem>>, %arg7: memref<32x32xbf16, #tpu.memory_space<vmem>>, %arg8: memref<4x32xf32, #tpu.memory_space<vmem>>, %arg9: memref<4x4xf32, #tpu.memory_space<smem>>, %arg10: memref<4xf32, #tpu.memory_space<smem>>, %arg11: memref<32x32xbf16, #tpu.memory_space<vmem>>, %arg12: memref<1x32xf32, #tpu.memory_space<vmem>>, %arg13: memref<1x32xf32, #tpu.memory_space<vmem>>, %arg14: memref<1x32xf32, #tpu.memory_space<vmem>>, %arg15: memref<32x128xbf16, #tpu.memory_space<vmem>>, %arg16: memref<1x128xf32, #tpu.memory_space<vmem>>, %arg17: memref<128x32xbf16, #tpu.memory_space<vmem>>, %arg18: memref<1x32xf32, #tpu.memory_space<vmem>>, %arg19: memref<1x32xf32, #tpu.memory_space<vmem>>, %arg20: memref<1x32xf32, #tpu.memory_space<vmem>>, %arg21: memref<1x8x32xf32, #tpu.memory_space<vmem>>, %arg22: memref<1x8x32xf32, #tpu.memory_space<vmem>>, %arg23: memref<8x32xbf16, #tpu.memory_space<vmem>>, %arg24: memref<8x32xbf16, #tpu.memory_space<vmem>>, %arg25: memref<8x32xbf16, #tpu.memory_space<vmem>>, %arg26: memref<4x8x8xbf16, #tpu.memory_space<vmem>>, %arg27: memref<8x32xbf16, #tpu.memory_space<vmem>>) attributes {dimension_semantics = [#tpu.dimension_semantics<parallel>, #tpu.dimension_semantics<arbitrary>], iteration_bounds = array<i64: 2, 1>, scalar_prefetch = 0 : i64, scratch_operands = 5 : i64, tpu.core_type = #tpu.core_type<tc>, window_params = [{transform_indices = @transform_0, window_bounds = array<i64: 1, 8, 32>}, {pipeline_mode = #tpu.pipeline_mode<synchronous>, transform_indices = @transform_1, window_bounds = array<i64: 1, 32>}, {pipeline_mode = #tpu.pipeline_mode<synchronous>, transform_indices = @transform_2, window_bounds = array<i64: 1, 32>}, {pipeline_mode = #tpu.pipeline_mode<synchronous>, transform_indices = @transform_3, window_bounds = array<i64: 32, 32>}, {pipeline_mode = #tpu.pipeline_mode<synchronous>, transform_indices = @transform_4, window_bounds = array<i64: 32, 32>}, {pipeline_mode = #tpu.pipeline_mode<synchronous>, transform_indices = @transform_5, window_bounds = array<i64: 32, 32>}, {pipeline_mode = #tpu.pipeline_mode<synchronous>, transform_indices = @transform_6, window_bounds = array<i64: 4, 32>}, {transform_indices = @transform_7, window_bounds = array<i64: 4, 4>}, {transform_indices = @transform_8, window_bounds = array<i64: 4>}, {pipeline_mode = #tpu.pipeline_mode<synchronous>, transform_indices = @transform_9, window_bounds = array<i64: 32, 32>}, {pipeline_mode = #tpu.pipeline_mode<synchronous>, transform_indices = @transform_10, window_bounds = array<i64: 1, 32>}, {pipeline_mode = #tpu.pipeline_mode<synchronous>, transform_indices = @transform_11, window_bounds = array<i64: 1, 32>}, {pipeline_mode = #tpu.pipeline_mode<synchronous>, transform_indices = @transform_12, window_bounds = array<i64: 1, 32>}, {pipeline_mode = #tpu.pipeline_mode<synchronous>, transform_indices = @transform_13, window_bounds = array<i64: 32, 128>}, {pipeline_mode = #tpu.pipeline_mode<synchronous>, transform_indices = @transform_14, window_bounds = array<i64: 1, 128>}, {pipeline_mode = #tpu.pipeline_mode<synchronous>, transform_indices = @transform_15, window_bounds = array<i64: 128, 32>}, {pipeline_mode = #tpu.pipeline_mode<synchronous>, transform_indices = @transform_16, window_bounds = array<i64: 1, 32>}, {pipeline_mode = #tpu.pipeline_mode<synchronous>, transform_indices = @transform_17, window_bounds = array<i64: 1, 32>}, {pipeline_mode = #tpu.pipeline_mode<synchronous>, transform_indices = @transform_18, window_bounds = array<i64: 1, 32>}, {transform_indices = @transform_19, window_bounds = array<i64: 1, 8, 32>}, {transform_indices = @transform_20, window_bounds = array<i64: 1, 8, 32>}]} {
    %c0_i32 = arith.constant 0 : i32
    %0 = arith.cmpi eq, %arg1, %c0_i32 : i32
    %1 = arith.extui %0 : i1 to i32
    %c0_i32_0 = arith.constant 0 : i32
    %2 = arith.cmpi ne, %1, %c0_i32_0 : i32
    scf.if %2 {
      %c0_171 = arith.constant 0 : index
      %c0_172 = arith.constant 0 : index
      %c0_173 = arith.constant 0 : index
      %299 = vector.load %arg2[%c0_171, %c0_172, %c0_173] : memref<1x8x32xf32, #tpu.memory_space<vmem>>, vector<1x8x32xf32>
      %300 = vector.shape_cast %299 : vector<1x8x32xf32> to vector<8x32xf32>
      %c0_174 = arith.constant 0 : index
      %c0_175 = arith.constant 0 : index
      %301 = vector.load %arg3[%c0_174, %c0_175] : memref<1x32xf32, #tpu.memory_space<vmem>>, vector<1x32xf32>
      %c0_176 = arith.constant 0 : index
      %c0_177 = arith.constant 0 : index
      %302 = vector.load %arg4[%c0_176, %c0_177] : memref<1x32xf32, #tpu.memory_space<vmem>>, vector<1x32xf32>
      %cst_178 = arith.constant dense<0.000000e+00> : vector<8xf32>
      %303 = vector.multi_reduction <add>, %300, %cst_178 [1] : vector<8x32xf32> to vector<8xf32>
      %304 = vector.shape_cast %303 : vector<8xf32> to vector<8x1xf32>
      %cst_179 = arith.constant 3.200000e+01 : f32
      %305 = vector.broadcast %cst_179 : f32 to vector<8x1xf32>
      %306 = arith.divf %304, %305 : vector<8x1xf32>
      %307 = vector.broadcast %306 : vector<8x1xf32> to vector<8x32xf32>
      %308 = arith.subf %300, %307 : vector<8x32xf32>
      %309 = arith.mulf %308, %308 : vector<8x32xf32>
      %cst_180 = arith.constant dense<0.000000e+00> : vector<8xf32>
      %310 = vector.multi_reduction <add>, %309, %cst_180 [1] : vector<8x32xf32> to vector<8xf32>
      %311 = vector.shape_cast %310 : vector<8xf32> to vector<8x1xf32>
      %cst_181 = arith.constant 3.200000e+01 : f32
      %312 = vector.broadcast %cst_181 : f32 to vector<8x1xf32>
      %313 = arith.divf %311, %312 : vector<8x1xf32>
      %314 = vector.broadcast %306 : vector<8x1xf32> to vector<8x32xf32>
      %315 = arith.subf %300, %314 : vector<8x32xf32>
      %cst_182 = arith.constant 9.99999974E-6 : f32
      %316 = vector.broadcast %cst_182 : f32 to vector<8x1xf32>
      %317 = arith.addf %313, %316 : vector<8x1xf32>
      %318 = math.rsqrt %317 : vector<8x1xf32>
      %319 = vector.broadcast %318 : vector<8x1xf32> to vector<8x32xf32>
      %320 = arith.mulf %315, %319 : vector<8x32xf32>
      %321 = vector.broadcast %301 : vector<1x32xf32> to vector<8x32xf32>
      %322 = arith.mulf %320, %321 : vector<8x32xf32>
      %323 = vector.broadcast %302 : vector<1x32xf32> to vector<8x32xf32>
      %324 = arith.addf %322, %323 : vector<8x32xf32>
      %325 = arith.truncf %324 : vector<8x32xf32> to vector<8x32xbf16>
      %c0_183 = arith.constant 0 : index
      %c0_184 = arith.constant 0 : index
      %326 = vector.load %arg23[%c0_183, %c0_184] : memref<8x32xbf16, #tpu.memory_space<vmem>>, vector<8x32xbf16>
      tpu.vector_store %arg23[%c0_183, %c0_184], %325 {strides = array<i32>} : memref<8x32xbf16, #tpu.memory_space<vmem>>, vector<8x32xbf16>,
      %c0_185 = arith.constant 0 : index
      %c0_186 = arith.constant 0 : index
      %327 = vector.load %arg6[%c0_185, %c0_186] : memref<32x32xbf16, #tpu.memory_space<vmem>>, vector<32x32xbf16>
      %cst_187 = arith.constant dense<0.000000e+00> : vector<8x32xf32>
      %328 = tpu.matmul %325, %327, %cst_187 {dimension_numbers = #tpu.dot_dimension_numbers<[1], [0], [0], [1], [0, 0, 1, 1], [], []>} : vector<8x32xbf16>, vector<32x32xbf16>, vector<8x32xf32> -> vector<8x32xf32>
      %329 = arith.truncf %328 : vector<8x32xf32> to vector<8x32xbf16>
      %c0_188 = arith.constant 0 : index
      %c0_189 = arith.constant 0 : index
      %330 = vector.load %arg24[%c0_188, %c0_189] : memref<8x32xbf16, #tpu.memory_space<vmem>>, vector<8x32xbf16>
      tpu.vector_store %arg24[%c0_188, %c0_189], %329 {strides = array<i32>} : memref<8x32xbf16, #tpu.memory_space<vmem>>, vector<8x32xbf16>,
      %c0_190 = arith.constant 0 : index
      %c0_191 = arith.constant 0 : index
      %331 = vector.load %arg7[%c0_190, %c0_191] : memref<32x32xbf16, #tpu.memory_space<vmem>>, vector<32x32xbf16>
      %cst_192 = arith.constant dense<0.000000e+00> : vector<8x32xf32>
      %332 = tpu.matmul %325, %331, %cst_192 {dimension_numbers = #tpu.dot_dimension_numbers<[1], [0], [0], [1], [0, 0, 1, 1], [], []>} : vector<8x32xbf16>, vector<32x32xbf16>, vector<8x32xf32> -> vector<8x32xf32>
      %333 = arith.truncf %332 : vector<8x32xf32> to vector<8x32xbf16>
      %c0_193 = arith.constant 0 : index
      %c0_194 = arith.constant 0 : index
      %334 = vector.load %arg25[%c0_193, %c0_194] : memref<8x32xbf16, #tpu.memory_space<vmem>>, vector<8x32xbf16>
      tpu.vector_store %arg25[%c0_193, %c0_194], %333 {strides = array<i32>} : memref<8x32xbf16, #tpu.memory_space<vmem>>, vector<8x32xbf16>,
    } else {
    }
    %c8_i32 = arith.constant 8 : i32
    %3 = arith.muli %arg1, %c8_i32 : i32
    %4 = tpu.assume_multiple %3, 8 : i32
    %c0 = arith.constant 0 : index
    %5 = arith.index_cast %4 : i32 to index
    %c0_1 = arith.constant 0 : index
    %6 = vector.load %arg2[%c0, %5, %c0_1] : memref<1x8x32xf32, #tpu.memory_space<vmem>>, vector<1x8x32xf32>
    %7 = vector.shape_cast %6 : vector<1x8x32xf32> to vector<8x32xf32>
    %8 = arith.index_cast %4 : i32 to index
    %c0_2 = arith.constant 0 : index
    %9 = vector.load %arg23[%8, %c0_2] : memref<8x32xbf16, #tpu.memory_space<vmem>>, vector<8x32xbf16>
    %c0_3 = arith.constant 0 : index
    %c0_4 = arith.constant 0 : index
    %10 = vector.load %arg5[%c0_3, %c0_4] : memref<32x32xbf16, #tpu.memory_space<vmem>>, vector<32x32xbf16>
    %cst = arith.constant dense<0.000000e+00> : vector<8x32xf32>
    %11 = tpu.matmul %9, %10, %cst {dimension_numbers = #tpu.dot_dimension_numbers<[1], [0], [0], [1], [0, 0, 1, 1], [], []>} : vector<8x32xbf16>, vector<32x32xbf16>, vector<8x32xf32> -> vector<8x32xf32>
    %c0_5 = arith.constant 0 : index
    %c0_6 = arith.constant 0 : index
    %12 = vector.load %arg8[%c0_5, %c0_6] : memref<4x32xf32, #tpu.memory_space<vmem>>, vector<4x32xf32>
    %c0_7 = arith.constant 0 : index
    %c0_8 = arith.constant 0 : index
    %13 = vector.load %arg24[%c0_7, %c0_8] : memref<8x32xbf16, #tpu.memory_space<vmem>>, vector<8x32xbf16>
    %14 = vector.extract_strided_slice %12 {offsets = [0, 0], sizes = [1, 32], strides = [1, 1]} : vector<4x32xf32> to vector<1x32xf32>
    %15 = vector.broadcast %14 : vector<1x32xf32> to vector<8x32xf32>
    %16 = arith.mulf %11, %15 : vector<8x32xf32>
    %17 = arith.truncf %16 : vector<8x32xf32> to vector<8x32xbf16>
    %cst_9 = arith.constant dense<0.000000e+00> : vector<8x8xf32>
    %18 = tpu.matmul %17, %13, %cst_9 {dimension_numbers = #tpu.dot_dimension_numbers<[1], [1], [0], [0], [0, 0, 1, 0], [], []>} : vector<8x32xbf16>, vector<8x32xbf16>, vector<8x8xf32> -> vector<8x8xf32>
    %cst_10 = arith.constant dense<0xFF800000> : vector<8xf32>
    %19 = vector.multi_reduction <maximumf>, %18, %cst_10 [1] : vector<8x8xf32> to vector<8xf32>
    %20 = vector.shape_cast %19 : vector<8xf32> to vector<8x1xf32>
    %21 = vector.broadcast %20 : vector<8x1xf32> to vector<8x8xf32>
    %22 = arith.subf %18, %21 : vector<8x8xf32>
    %23 = math.exp %22 : vector<8x8xf32>
    %cst_11 = arith.constant dense<0.000000e+00> : vector<8xf32>
    %24 = vector.multi_reduction <add>, %23, %cst_11 [1] : vector<8x8xf32> to vector<8xf32>
    %25 = vector.shape_cast %24 : vector<8xf32> to vector<8x1xf32>
    %26 = tpu.reciprocal %25 {approx = true} : vector<8x1xf32> -> vector<8x1xf32>
    %27 = vector.broadcast %26 : vector<8x1xf32> to vector<8x8xf32>
    %28 = arith.mulf %23, %27 : vector<8x8xf32>
    %29 = arith.truncf %28 : vector<8x8xf32> to vector<8x8xbf16>
    %c0_12 = arith.constant 0 : index
    %c0_13 = arith.constant 0 : index
    %c0_14 = arith.constant 0 : index
    %30 = vector.load %arg26[%c0_12, %c0_13, %c0_14] : memref<4x8x8xbf16, #tpu.memory_space<vmem>>, vector<1x8x8xbf16>
    %31 = vector.shape_cast %30 : vector<1x8x8xbf16> to vector<8x8xbf16>
    %32 = vector.shape_cast %29 : vector<8x8xbf16> to vector<1x8x8xbf16>
    tpu.vector_store %arg26[%c0_12, %c0_13, %c0_14], %32 {strides = array<i32>} : memref<4x8x8xbf16, #tpu.memory_space<vmem>>, vector<1x8x8xbf16>,
    %33 = vector.extract_strided_slice %12 {offsets = [1, 0], sizes = [1, 32], strides = [1, 1]} : vector<4x32xf32> to vector<1x32xf32>
    %34 = vector.broadcast %33 : vector<1x32xf32> to vector<8x32xf32>
    %35 = arith.mulf %11, %34 : vector<8x32xf32>
    %36 = arith.truncf %35 : vector<8x32xf32> to vector<8x32xbf16>
    %cst_15 = arith.constant dense<0.000000e+00> : vector<8x8xf32>
    %37 = tpu.matmul %36, %13, %cst_15 {dimension_numbers = #tpu.dot_dimension_numbers<[1], [1], [0], [0], [0, 0, 1, 0], [], []>} : vector<8x32xbf16>, vector<8x32xbf16>, vector<8x8xf32> -> vector<8x8xf32>
    %cst_16 = arith.constant dense<0xFF800000> : vector<8xf32>
    %38 = vector.multi_reduction <maximumf>, %37, %cst_16 [1] : vector<8x8xf32> to vector<8xf32>
    %39 = vector.shape_cast %38 : vector<8xf32> to vector<8x1xf32>
    %40 = vector.broadcast %39 : vector<8x1xf32> to vector<8x8xf32>
    %41 = arith.subf %37, %40 : vector<8x8xf32>
    %42 = math.exp %41 : vector<8x8xf32>
    %cst_17 = arith.constant dense<0.000000e+00> : vector<8xf32>
    %43 = vector.multi_reduction <add>, %42, %cst_17 [1] : vector<8x8xf32> to vector<8xf32>
    %44 = vector.shape_cast %43 : vector<8xf32> to vector<8x1xf32>
    %45 = tpu.reciprocal %44 {approx = true} : vector<8x1xf32> -> vector<8x1xf32>
    %46 = vector.broadcast %45 : vector<8x1xf32> to vector<8x8xf32>
    %47 = arith.mulf %42, %46 : vector<8x8xf32>
    %48 = arith.truncf %47 : vector<8x8xf32> to vector<8x8xbf16>
    %c1 = arith.constant 1 : index
    %c0_18 = arith.constant 0 : index
    %c0_19 = arith.constant 0 : index
    %49 = vector.load %arg26[%c1, %c0_18, %c0_19] : memref<4x8x8xbf16, #tpu.memory_space<vmem>>, vector<1x8x8xbf16>
    %50 = vector.shape_cast %49 : vector<1x8x8xbf16> to vector<8x8xbf16>
    %51 = vector.shape_cast %48 : vector<8x8xbf16> to vector<1x8x8xbf16>
    tpu.vector_store %arg26[%c1, %c0_18, %c0_19], %51 {strides = array<i32>} : memref<4x8x8xbf16, #tpu.memory_space<vmem>>, vector<1x8x8xbf16>,
    %52 = vector.extract_strided_slice %12 {offsets = [2, 0], sizes = [1, 32], strides = [1, 1]} : vector<4x32xf32> to vector<1x32xf32>
    %53 = vector.broadcast %52 : vector<1x32xf32> to vector<8x32xf32>
    %54 = arith.mulf %11, %53 : vector<8x32xf32>
    %55 = arith.truncf %54 : vector<8x32xf32> to vector<8x32xbf16>
    %cst_20 = arith.constant dense<0.000000e+00> : vector<8x8xf32>
    %56 = tpu.matmul %55, %13, %cst_20 {dimension_numbers = #tpu.dot_dimension_numbers<[1], [1], [0], [0], [0, 0, 1, 0], [], []>} : vector<8x32xbf16>, vector<8x32xbf16>, vector<8x8xf32> -> vector<8x8xf32>
    %cst_21 = arith.constant dense<0xFF800000> : vector<8xf32>
    %57 = vector.multi_reduction <maximumf>, %56, %cst_21 [1] : vector<8x8xf32> to vector<8xf32>
    %58 = vector.shape_cast %57 : vector<8xf32> to vector<8x1xf32>
    %59 = vector.broadcast %58 : vector<8x1xf32> to vector<8x8xf32>
    %60 = arith.subf %56, %59 : vector<8x8xf32>
    %61 = math.exp %60 : vector<8x8xf32>
    %cst_22 = arith.constant dense<0.000000e+00> : vector<8xf32>
    %62 = vector.multi_reduction <add>, %61, %cst_22 [1] : vector<8x8xf32> to vector<8xf32>
    %63 = vector.shape_cast %62 : vector<8xf32> to vector<8x1xf32>
    %64 = tpu.reciprocal %63 {approx = true} : vector<8x1xf32> -> vector<8x1xf32>
    %65 = vector.broadcast %64 : vector<8x1xf32> to vector<8x8xf32>
    %66 = arith.mulf %61, %65 : vector<8x8xf32>
    %67 = arith.truncf %66 : vector<8x8xf32> to vector<8x8xbf16>
    %c2 = arith.constant 2 : index
    %c0_23 = arith.constant 0 : index
    %c0_24 = arith.constant 0 : index
    %68 = vector.load %arg26[%c2, %c0_23, %c0_24] : memref<4x8x8xbf16, #tpu.memory_space<vmem>>, vector<1x8x8xbf16>
    %69 = vector.shape_cast %68 : vector<1x8x8xbf16> to vector<8x8xbf16>
    %70 = vector.shape_cast %67 : vector<8x8xbf16> to vector<1x8x8xbf16>
    tpu.vector_store %arg26[%c2, %c0_23, %c0_24], %70 {strides = array<i32>} : memref<4x8x8xbf16, #tpu.memory_space<vmem>>, vector<1x8x8xbf16>,
    %71 = vector.extract_strided_slice %12 {offsets = [3, 0], sizes = [1, 32], strides = [1, 1]} : vector<4x32xf32> to vector<1x32xf32>
    %72 = vector.broadcast %71 : vector<1x32xf32> to vector<8x32xf32>
    %73 = arith.mulf %11, %72 : vector<8x32xf32>
    %74 = arith.truncf %73 : vector<8x32xf32> to vector<8x32xbf16>
    %cst_25 = arith.constant dense<0.000000e+00> : vector<8x8xf32>
    %75 = tpu.matmul %74, %13, %cst_25 {dimension_numbers = #tpu.dot_dimension_numbers<[1], [1], [0], [0], [0, 0, 1, 0], [], []>} : vector<8x32xbf16>, vector<8x32xbf16>, vector<8x8xf32> -> vector<8x8xf32>
    %cst_26 = arith.constant dense<0xFF800000> : vector<8xf32>
    %76 = vector.multi_reduction <maximumf>, %75, %cst_26 [1] : vector<8x8xf32> to vector<8xf32>
    %77 = vector.shape_cast %76 : vector<8xf32> to vector<8x1xf32>
    %78 = vector.broadcast %77 : vector<8x1xf32> to vector<8x8xf32>
    %79 = arith.subf %75, %78 : vector<8x8xf32>
    %80 = math.exp %79 : vector<8x8xf32>
    %cst_27 = arith.constant dense<0.000000e+00> : vector<8xf32>
    %81 = vector.multi_reduction <add>, %80, %cst_27 [1] : vector<8x8xf32> to vector<8xf32>
    %82 = vector.shape_cast %81 : vector<8xf32> to vector<8x1xf32>
    %83 = tpu.reciprocal %82 {approx = true} : vector<8x1xf32> -> vector<8x1xf32>
    %84 = vector.broadcast %83 : vector<8x1xf32> to vector<8x8xf32>
    %85 = arith.mulf %80, %84 : vector<8x8xf32>
    %86 = arith.truncf %85 : vector<8x8xf32> to vector<8x8xbf16>
    %c3 = arith.constant 3 : index
    %c0_28 = arith.constant 0 : index
    %c0_29 = arith.constant 0 : index
    %87 = vector.load %arg26[%c3, %c0_28, %c0_29] : memref<4x8x8xbf16, #tpu.memory_space<vmem>>, vector<1x8x8xbf16>
    %88 = vector.shape_cast %87 : vector<1x8x8xbf16> to vector<8x8xbf16>
    %89 = vector.shape_cast %86 : vector<8x8xbf16> to vector<1x8x8xbf16>
    tpu.vector_store %arg26[%c3, %c0_28, %c0_29], %89 {strides = array<i32>} : memref<4x8x8xbf16, #tpu.memory_space<vmem>>, vector<1x8x8xbf16>,
    %c0_30 = arith.constant 0 : index
    %c0_31 = arith.constant 0 : index
    %c0_32 = arith.constant 0 : index
    %90 = vector.load %arg26[%c0_30, %c0_31, %c0_32] : memref<4x8x8xbf16, #tpu.memory_space<vmem>>, vector<1x8x8xbf16>
    %91 = vector.shape_cast %90 : vector<1x8x8xbf16> to vector<8x8xbf16>
    %c0_33 = arith.constant 0 : index
    %c0_34 = arith.constant 0 : index
    %92 = memref.load %arg9[%c0_33, %c0_34] : memref<4x4xf32, #tpu.memory_space<smem>>
    %93 = arith.truncf %92 : f32 to bf16
    %94 = vector.broadcast %93 : bf16 to vector<8x8xbf16>
    %95 = arith.mulf %91, %94 : vector<8x8xbf16>
    %c1_35 = arith.constant 1 : index
    %c0_36 = arith.constant 0 : index
    %c0_37 = arith.constant 0 : index
    %96 = vector.load %arg26[%c1_35, %c0_36, %c0_37] : memref<4x8x8xbf16, #tpu.memory_space<vmem>>, vector<1x8x8xbf16>
    %97 = vector.shape_cast %96 : vector<1x8x8xbf16> to vector<8x8xbf16>
    %c0_38 = arith.constant 0 : index
    %c1_39 = arith.constant 1 : index
    %98 = memref.load %arg9[%c0_38, %c1_39] : memref<4x4xf32, #tpu.memory_space<smem>>
    %99 = arith.truncf %98 : f32 to bf16
    %100 = vector.broadcast %99 : bf16 to vector<8x8xbf16>
    %101 = arith.mulf %97, %100 : vector<8x8xbf16>
    %102 = arith.addf %95, %101 : vector<8x8xbf16>
    %c2_40 = arith.constant 2 : index
    %c0_41 = arith.constant 0 : index
    %c0_42 = arith.constant 0 : index
    %103 = vector.load %arg26[%c2_40, %c0_41, %c0_42] : memref<4x8x8xbf16, #tpu.memory_space<vmem>>, vector<1x8x8xbf16>
    %104 = vector.shape_cast %103 : vector<1x8x8xbf16> to vector<8x8xbf16>
    %c0_43 = arith.constant 0 : index
    %c2_44 = arith.constant 2 : index
    %105 = memref.load %arg9[%c0_43, %c2_44] : memref<4x4xf32, #tpu.memory_space<smem>>
    %106 = arith.truncf %105 : f32 to bf16
    %107 = vector.broadcast %106 : bf16 to vector<8x8xbf16>
    %108 = arith.mulf %104, %107 : vector<8x8xbf16>
    %109 = arith.addf %102, %108 : vector<8x8xbf16>
    %c3_45 = arith.constant 3 : index
    %c0_46 = arith.constant 0 : index
    %c0_47 = arith.constant 0 : index
    %110 = vector.load %arg26[%c3_45, %c0_46, %c0_47] : memref<4x8x8xbf16, #tpu.memory_space<vmem>>, vector<1x8x8xbf16>
    %111 = vector.shape_cast %110 : vector<1x8x8xbf16> to vector<8x8xbf16>
    %c0_48 = arith.constant 0 : index
    %c3_49 = arith.constant 3 : index
    %112 = memref.load %arg9[%c0_48, %c3_49] : memref<4x4xf32, #tpu.memory_space<smem>>
    %113 = arith.truncf %112 : f32 to bf16
    %114 = vector.broadcast %113 : bf16 to vector<8x8xbf16>
    %115 = arith.mulf %111, %114 : vector<8x8xbf16>
    %116 = arith.addf %109, %115 : vector<8x8xbf16>
    %c0_50 = arith.constant 0 : index
    %117 = memref.load %arg10[%c0_50] : memref<4xf32, #tpu.memory_space<smem>>
    %118 = arith.truncf %117 : f32 to bf16
    %119 = vector.broadcast %118 : bf16 to vector<8x8xbf16>
    %120 = arith.addf %116, %119 : vector<8x8xbf16>
    %c0_51 = arith.constant 0 : index
    %c0_52 = arith.constant 0 : index
    %121 = vector.load %arg25[%c0_51, %c0_52] : memref<8x32xbf16, #tpu.memory_space<vmem>>, vector<8x8xbf16>
    %cst_53 = arith.constant dense<0.000000e+00> : vector<8x8xf32>
    %122 = tpu.matmul %120, %121, %cst_53 {dimension_numbers = #tpu.dot_dimension_numbers<[1], [0], [0], [1], [0, 0, 1, 1], [], []>} : vector<8x8xbf16>, vector<8x8xbf16>, vector<8x8xf32> -> vector<8x8xf32>
    %123 = arith.truncf %122 : vector<8x8xf32> to vector<8x8xbf16>
    %c0_54 = arith.constant 0 : index
    %c0_55 = arith.constant 0 : index
    %124 = vector.load %arg27[%c0_54, %c0_55] : memref<8x32xbf16, #tpu.memory_space<vmem>>, vector<8x8xbf16>
    tpu.vector_store %arg27[%c0_54, %c0_55], %123 {strides = array<i32>} : memref<8x32xbf16, #tpu.memory_space<vmem>>, vector<8x8xbf16>,
    %c0_56 = arith.constant 0 : index
    %c0_57 = arith.constant 0 : index
    %c0_58 = arith.constant 0 : index
    %125 = vector.load %arg26[%c0_56, %c0_57, %c0_58] : memref<4x8x8xbf16, #tpu.memory_space<vmem>>, vector<1x8x8xbf16>
    %126 = vector.shape_cast %125 : vector<1x8x8xbf16> to vector<8x8xbf16>
    %c1_59 = arith.constant 1 : index
    %c0_60 = arith.constant 0 : index
    %127 = memref.load %arg9[%c1_59, %c0_60] : memref<4x4xf32, #tpu.memory_space<smem>>
    %128 = arith.truncf %127 : f32 to bf16
    %129 = vector.broadcast %128 : bf16 to vector<8x8xbf16>
    %130 = arith.mulf %126, %129 : vector<8x8xbf16>
    %c1_61 = arith.constant 1 : index
    %c0_62 = arith.constant 0 : index
    %c0_63 = arith.constant 0 : index
    %131 = vector.load %arg26[%c1_61, %c0_62, %c0_63] : memref<4x8x8xbf16, #tpu.memory_space<vmem>>, vector<1x8x8xbf16>
    %132 = vector.shape_cast %131 : vector<1x8x8xbf16> to vector<8x8xbf16>
    %c1_64 = arith.constant 1 : index
    %c1_65 = arith.constant 1 : index
    %133 = memref.load %arg9[%c1_64, %c1_65] : memref<4x4xf32, #tpu.memory_space<smem>>
    %134 = arith.truncf %133 : f32 to bf16
    %135 = vector.broadcast %134 : bf16 to vector<8x8xbf16>
    %136 = arith.mulf %132, %135 : vector<8x8xbf16>
    %137 = arith.addf %130, %136 : vector<8x8xbf16>
    %c2_66 = arith.constant 2 : index
    %c0_67 = arith.constant 0 : index
    %c0_68 = arith.constant 0 : index
    %138 = vector.load %arg26[%c2_66, %c0_67, %c0_68] : memref<4x8x8xbf16, #tpu.memory_space<vmem>>, vector<1x8x8xbf16>
    %139 = vector.shape_cast %138 : vector<1x8x8xbf16> to vector<8x8xbf16>
    %c1_69 = arith.constant 1 : index
    %c2_70 = arith.constant 2 : index
    %140 = memref.load %arg9[%c1_69, %c2_70] : memref<4x4xf32, #tpu.memory_space<smem>>
    %141 = arith.truncf %140 : f32 to bf16
    %142 = vector.broadcast %141 : bf16 to vector<8x8xbf16>
    %143 = arith.mulf %139, %142 : vector<8x8xbf16>
    %144 = arith.addf %137, %143 : vector<8x8xbf16>
    %c3_71 = arith.constant 3 : index
    %c0_72 = arith.constant 0 : index
    %c0_73 = arith.constant 0 : index
    %145 = vector.load %arg26[%c3_71, %c0_72, %c0_73] : memref<4x8x8xbf16, #tpu.memory_space<vmem>>, vector<1x8x8xbf16>
    %146 = vector.shape_cast %145 : vector<1x8x8xbf16> to vector<8x8xbf16>
    %c1_74 = arith.constant 1 : index
    %c3_75 = arith.constant 3 : index
    %147 = memref.load %arg9[%c1_74, %c3_75] : memref<4x4xf32, #tpu.memory_space<smem>>
    %148 = arith.truncf %147 : f32 to bf16
    %149 = vector.broadcast %148 : bf16 to vector<8x8xbf16>
    %150 = arith.mulf %146, %149 : vector<8x8xbf16>
    %151 = arith.addf %144, %150 : vector<8x8xbf16>
    %c1_76 = arith.constant 1 : index
    %152 = memref.load %arg10[%c1_76] : memref<4xf32, #tpu.memory_space<smem>>
    %153 = arith.truncf %152 : f32 to bf16
    %154 = vector.broadcast %153 : bf16 to vector<8x8xbf16>
    %155 = arith.addf %151, %154 : vector<8x8xbf16>
    %c0_77 = arith.constant 0 : index
    %c8 = arith.constant 8 : index
    %156 = vector.load %arg25[%c0_77, %c8] : memref<8x32xbf16, #tpu.memory_space<vmem>>, vector<8x8xbf16>
    %cst_78 = arith.constant dense<0.000000e+00> : vector<8x8xf32>
    %157 = tpu.matmul %155, %156, %cst_78 {dimension_numbers = #tpu.dot_dimension_numbers<[1], [0], [0], [1], [0, 0, 1, 1], [], []>} : vector<8x8xbf16>, vector<8x8xbf16>, vector<8x8xf32> -> vector<8x8xf32>
    %158 = arith.truncf %157 : vector<8x8xf32> to vector<8x8xbf16>
    %c0_79 = arith.constant 0 : index
    %c8_80 = arith.constant 8 : index
    %159 = vector.load %arg27[%c0_79, %c8_80] : memref<8x32xbf16, #tpu.memory_space<vmem>>, vector<8x8xbf16>
    tpu.vector_store %arg27[%c0_79, %c8_80], %158 {strides = array<i32>} : memref<8x32xbf16, #tpu.memory_space<vmem>>, vector<8x8xbf16>,
    %c0_81 = arith.constant 0 : index
    %c0_82 = arith.constant 0 : index
    %c0_83 = arith.constant 0 : index
    %160 = vector.load %arg26[%c0_81, %c0_82, %c0_83] : memref<4x8x8xbf16, #tpu.memory_space<vmem>>, vector<1x8x8xbf16>
    %161 = vector.shape_cast %160 : vector<1x8x8xbf16> to vector<8x8xbf16>
    %c2_84 = arith.constant 2 : index
    %c0_85 = arith.constant 0 : index
    %162 = memref.load %arg9[%c2_84, %c0_85] : memref<4x4xf32, #tpu.memory_space<smem>>
    %163 = arith.truncf %162 : f32 to bf16
    %164 = vector.broadcast %163 : bf16 to vector<8x8xbf16>
    %165 = arith.mulf %161, %164 : vector<8x8xbf16>
    %c1_86 = arith.constant 1 : index
    %c0_87 = arith.constant 0 : index
    %c0_88 = arith.constant 0 : index
    %166 = vector.load %arg26[%c1_86, %c0_87, %c0_88] : memref<4x8x8xbf16, #tpu.memory_space<vmem>>, vector<1x8x8xbf16>
    %167 = vector.shape_cast %166 : vector<1x8x8xbf16> to vector<8x8xbf16>
    %c2_89 = arith.constant 2 : index
    %c1_90 = arith.constant 1 : index
    %168 = memref.load %arg9[%c2_89, %c1_90] : memref<4x4xf32, #tpu.memory_space<smem>>
    %169 = arith.truncf %168 : f32 to bf16
    %170 = vector.broadcast %169 : bf16 to vector<8x8xbf16>
    %171 = arith.mulf %167, %170 : vector<8x8xbf16>
    %172 = arith.addf %165, %171 : vector<8x8xbf16>
    %c2_91 = arith.constant 2 : index
    %c0_92 = arith.constant 0 : index
    %c0_93 = arith.constant 0 : index
    %173 = vector.load %arg26[%c2_91, %c0_92, %c0_93] : memref<4x8x8xbf16, #tpu.memory_space<vmem>>, vector<1x8x8xbf16>
    %174 = vector.shape_cast %173 : vector<1x8x8xbf16> to vector<8x8xbf16>
    %c2_94 = arith.constant 2 : index
    %c2_95 = arith.constant 2 : index
    %175 = memref.load %arg9[%c2_94, %c2_95] : memref<4x4xf32, #tpu.memory_space<smem>>
    %176 = arith.truncf %175 : f32 to bf16
    %177 = vector.broadcast %176 : bf16 to vector<8x8xbf16>
    %178 = arith.mulf %174, %177 : vector<8x8xbf16>
    %179 = arith.addf %172, %178 : vector<8x8xbf16>
    %c3_96 = arith.constant 3 : index
    %c0_97 = arith.constant 0 : index
    %c0_98 = arith.constant 0 : index
    %180 = vector.load %arg26[%c3_96, %c0_97, %c0_98] : memref<4x8x8xbf16, #tpu.memory_space<vmem>>, vector<1x8x8xbf16>
    %181 = vector.shape_cast %180 : vector<1x8x8xbf16> to vector<8x8xbf16>
    %c2_99 = arith.constant 2 : index
    %c3_100 = arith.constant 3 : index
    %182 = memref.load %arg9[%c2_99, %c3_100] : memref<4x4xf32, #tpu.memory_space<smem>>
    %183 = arith.truncf %182 : f32 to bf16
    %184 = vector.broadcast %183 : bf16 to vector<8x8xbf16>
    %185 = arith.mulf %181, %184 : vector<8x8xbf16>
    %186 = arith.addf %179, %185 : vector<8x8xbf16>
    %c2_101 = arith.constant 2 : index
    %187 = memref.load %arg10[%c2_101] : memref<4xf32, #tpu.memory_space<smem>>
    %188 = arith.truncf %187 : f32 to bf16
    %189 = vector.broadcast %188 : bf16 to vector<8x8xbf16>
    %190 = arith.addf %186, %189 : vector<8x8xbf16>
    %c0_102 = arith.constant 0 : index
    %c16 = arith.constant 16 : index
    %191 = vector.load %arg25[%c0_102, %c16] : memref<8x32xbf16, #tpu.memory_space<vmem>>, vector<8x8xbf16>
    %cst_103 = arith.constant dense<0.000000e+00> : vector<8x8xf32>
    %192 = tpu.matmul %190, %191, %cst_103 {dimension_numbers = #tpu.dot_dimension_numbers<[1], [0], [0], [1], [0, 0, 1, 1], [], []>} : vector<8x8xbf16>, vector<8x8xbf16>, vector<8x8xf32> -> vector<8x8xf32>
    %193 = arith.truncf %192 : vector<8x8xf32> to vector<8x8xbf16>
    %c0_104 = arith.constant 0 : index
    %c16_105 = arith.constant 16 : index
    %194 = vector.load %arg27[%c0_104, %c16_105] : memref<8x32xbf16, #tpu.memory_space<vmem>>, vector<8x8xbf16>
    tpu.vector_store %arg27[%c0_104, %c16_105], %193 {strides = array<i32>} : memref<8x32xbf16, #tpu.memory_space<vmem>>, vector<8x8xbf16>,
    %c0_106 = arith.constant 0 : index
    %c0_107 = arith.constant 0 : index
    %c0_108 = arith.constant 0 : index
    %195 = vector.load %arg26[%c0_106, %c0_107, %c0_108] : memref<4x8x8xbf16, #tpu.memory_space<vmem>>, vector<1x8x8xbf16>
    %196 = vector.shape_cast %195 : vector<1x8x8xbf16> to vector<8x8xbf16>
    %c3_109 = arith.constant 3 : index
    %c0_110 = arith.constant 0 : index
    %197 = memref.load %arg9[%c3_109, %c0_110] : memref<4x4xf32, #tpu.memory_space<smem>>
    %198 = arith.truncf %197 : f32 to bf16
    %199 = vector.broadcast %198 : bf16 to vector<8x8xbf16>
    %200 = arith.mulf %196, %199 : vector<8x8xbf16>
    %c1_111 = arith.constant 1 : index
    %c0_112 = arith.constant 0 : index
    %c0_113 = arith.constant 0 : index
    %201 = vector.load %arg26[%c1_111, %c0_112, %c0_113] : memref<4x8x8xbf16, #tpu.memory_space<vmem>>, vector<1x8x8xbf16>
    %202 = vector.shape_cast %201 : vector<1x8x8xbf16> to vector<8x8xbf16>
    %c3_114 = arith.constant 3 : index
    %c1_115 = arith.constant 1 : index
    %203 = memref.load %arg9[%c3_114, %c1_115] : memref<4x4xf32, #tpu.memory_space<smem>>
    %204 = arith.truncf %203 : f32 to bf16
    %205 = vector.broadcast %204 : bf16 to vector<8x8xbf16>
    %206 = arith.mulf %202, %205 : vector<8x8xbf16>
    %207 = arith.addf %200, %206 : vector<8x8xbf16>
    %c2_116 = arith.constant 2 : index
    %c0_117 = arith.constant 0 : index
    %c0_118 = arith.constant 0 : index
    %208 = vector.load %arg26[%c2_116, %c0_117, %c0_118] : memref<4x8x8xbf16, #tpu.memory_space<vmem>>, vector<1x8x8xbf16>
    %209 = vector.shape_cast %208 : vector<1x8x8xbf16> to vector<8x8xbf16>
    %c3_119 = arith.constant 3 : index
    %c2_120 = arith.constant 2 : index
    %210 = memref.load %arg9[%c3_119, %c2_120] : memref<4x4xf32, #tpu.memory_space<smem>>
    %211 = arith.truncf %210 : f32 to bf16
    %212 = vector.broadcast %211 : bf16 to vector<8x8xbf16>
    %213 = arith.mulf %209, %212 : vector<8x8xbf16>
    %214 = arith.addf %207, %213 : vector<8x8xbf16>
    %c3_121 = arith.constant 3 : index
    %c0_122 = arith.constant 0 : index
    %c0_123 = arith.constant 0 : index
    %215 = vector.load %arg26[%c3_121, %c0_122, %c0_123] : memref<4x8x8xbf16, #tpu.memory_space<vmem>>, vector<1x8x8xbf16>
    %216 = vector.shape_cast %215 : vector<1x8x8xbf16> to vector<8x8xbf16>
    %c3_124 = arith.constant 3 : index
    %c3_125 = arith.constant 3 : index
    %217 = memref.load %arg9[%c3_124, %c3_125] : memref<4x4xf32, #tpu.memory_space<smem>>
    %218 = arith.truncf %217 : f32 to bf16
    %219 = vector.broadcast %218 : bf16 to vector<8x8xbf16>
    %220 = arith.mulf %216, %219 : vector<8x8xbf16>
    %221 = arith.addf %214, %220 : vector<8x8xbf16>
    %c3_126 = arith.constant 3 : index
    %222 = memref.load %arg10[%c3_126] : memref<4xf32, #tpu.memory_space<smem>>
    %223 = arith.truncf %222 : f32 to bf16
    %224 = vector.broadcast %223 : bf16 to vector<8x8xbf16>
    %225 = arith.addf %221, %224 : vector<8x8xbf16>
    %c0_127 = arith.constant 0 : index
    %c24 = arith.constant 24 : index
    %226 = vector.load %arg25[%c0_127, %c24] : memref<8x32xbf16, #tpu.memory_space<vmem>>, vector<8x8xbf16>
    %cst_128 = arith.constant dense<0.000000e+00> : vector<8x8xf32>
    %227 = tpu.matmul %225, %226, %cst_128 {dimension_numbers = #tpu.dot_dimension_numbers<[1], [0], [0], [1], [0, 0, 1, 1], [], []>} : vector<8x8xbf16>, vector<8x8xbf16>, vector<8x8xf32> -> vector<8x8xf32>
    %228 = arith.truncf %227 : vector<8x8xf32> to vector<8x8xbf16>
    %c0_129 = arith.constant 0 : index
    %c24_130 = arith.constant 24 : index
    %229 = vector.load %arg27[%c0_129, %c24_130] : memref<8x32xbf16, #tpu.memory_space<vmem>>, vector<8x8xbf16>
    tpu.vector_store %arg27[%c0_129, %c24_130], %228 {strides = array<i32>} : memref<8x32xbf16, #tpu.memory_space<vmem>>, vector<8x8xbf16>,
    %c0_131 = arith.constant 0 : index
    %c0_132 = arith.constant 0 : index
    %230 = vector.load %arg27[%c0_131, %c0_132] : memref<8x32xbf16, #tpu.memory_space<vmem>>, vector<8x32xbf16>
    %c0_133 = arith.constant 0 : index
    %c0_134 = arith.constant 0 : index
    %231 = vector.load %arg11[%c0_133, %c0_134] : memref<32x32xbf16, #tpu.memory_space<vmem>>, vector<32x32xbf16>
    %cst_135 = arith.constant dense<0.000000e+00> : vector<8x32xf32>
    %232 = tpu.matmul %230, %231, %cst_135 {dimension_numbers = #tpu.dot_dimension_numbers<[1], [0], [0], [1], [0, 0, 1, 1], [], []>} : vector<8x32xbf16>, vector<32x32xbf16>, vector<8x32xf32> -> vector<8x32xf32>
    %c0_136 = arith.constant 0 : index
    %c0_137 = arith.constant 0 : index
    %233 = vector.load %arg12[%c0_136, %c0_137] : memref<1x32xf32, #tpu.memory_space<vmem>>, vector<1x32xf32>
    %234 = vector.broadcast %233 : vector<1x32xf32> to vector<8x32xf32>
    %235 = arith.addf %232, %234 : vector<8x32xf32>
    %c0_138 = arith.constant 0 : index
    %c0_139 = arith.constant 0 : index
    %236 = vector.load %arg19[%c0_138, %c0_139] : memref<1x32xf32, #tpu.memory_space<vmem>>, vector<1x32xf32>
    %237 = vector.broadcast %236 : vector<1x32xf32> to vector<8x32xf32>
    %238 = arith.mulf %237, %235 : vector<8x32xf32>
    %239 = arith.addf %7, %238 : vector<8x32xf32>
    %c0_140 = arith.constant 0 : index
    %c0_141 = arith.constant 0 : index
    %240 = vector.load %arg13[%c0_140, %c0_141] : memref<1x32xf32, #tpu.memory_space<vmem>>, vector<1x32xf32>
    %c0_142 = arith.constant 0 : index
    %c0_143 = arith.constant 0 : index
    %241 = vector.load %arg14[%c0_142, %c0_143] : memref<1x32xf32, #tpu.memory_space<vmem>>, vector<1x32xf32>
    %cst_144 = arith.constant dense<0.000000e+00> : vector<8xf32>
    %242 = vector.multi_reduction <add>, %239, %cst_144 [1] : vector<8x32xf32> to vector<8xf32>
    %243 = vector.shape_cast %242 : vector<8xf32> to vector<8x1xf32>
    %cst_145 = arith.constant 3.200000e+01 : f32
    %244 = vector.broadcast %cst_145 : f32 to vector<8x1xf32>
    %245 = arith.divf %243, %244 : vector<8x1xf32>
    %246 = vector.broadcast %245 : vector<8x1xf32> to vector<8x32xf32>
    %247 = arith.subf %239, %246 : vector<8x32xf32>
    %248 = arith.mulf %247, %247 : vector<8x32xf32>
    %cst_146 = arith.constant dense<0.000000e+00> : vector<8xf32>
    %249 = vector.multi_reduction <add>, %248, %cst_146 [1] : vector<8x32xf32> to vector<8xf32>
    %250 = vector.shape_cast %249 : vector<8xf32> to vector<8x1xf32>
    %cst_147 = arith.constant 3.200000e+01 : f32
    %251 = vector.broadcast %cst_147 : f32 to vector<8x1xf32>
    %252 = arith.divf %250, %251 : vector<8x1xf32>
    %253 = vector.broadcast %245 : vector<8x1xf32> to vector<8x32xf32>
    %254 = arith.subf %239, %253 : vector<8x32xf32>
    %cst_148 = arith.constant 9.99999974E-6 : f32
    %255 = vector.broadcast %cst_148 : f32 to vector<8x1xf32>
    %256 = arith.addf %252, %255 : vector<8x1xf32>
    %257 = math.rsqrt %256 : vector<8x1xf32>
    %258 = vector.broadcast %257 : vector<8x1xf32> to vector<8x32xf32>
    %259 = arith.mulf %254, %258 : vector<8x32xf32>
    %260 = vector.broadcast %240 : vector<1x32xf32> to vector<8x32xf32>
    %261 = arith.mulf %259, %260 : vector<8x32xf32>
    %262 = vector.broadcast %241 : vector<1x32xf32> to vector<8x32xf32>
    %263 = arith.addf %261, %262 : vector<8x32xf32>
    %264 = arith.truncf %263 : vector<8x32xf32> to vector<8x32xbf16>
    %c0_149 = arith.constant 0 : index
    %c0_150 = arith.constant 0 : index
    %265 = vector.load %arg15[%c0_149, %c0_150] : memref<32x128xbf16, #tpu.memory_space<vmem>>, vector<32x128xbf16>
    %cst_151 = arith.constant dense<0.000000e+00> : vector<8x128xf32>
    %266 = tpu.matmul %264, %265, %cst_151 {dimension_numbers = #tpu.dot_dimension_numbers<[1], [0], [0], [1], [0, 0, 1, 1], [], []>} : vector<8x32xbf16>, vector<32x128xbf16>, vector<8x128xf32> -> vector<8x128xf32>
    %c0_152 = arith.constant 0 : index
    %c0_153 = arith.constant 0 : index
    %267 = vector.load %arg16[%c0_152, %c0_153] : memref<1x128xf32, #tpu.memory_space<vmem>>, vector<1x128xf32>
    %268 = vector.broadcast %267 : vector<1x128xf32> to vector<8x128xf32>
    %269 = arith.addf %266, %268 : vector<8x128xf32>
    %270 = arith.mulf %269, %269 : vector<8x128xf32>
    %271 = arith.mulf %269, %270 : vector<8x128xf32>
    %cst_154 = arith.constant 4.471500e-02 : f32
    %272 = vector.broadcast %cst_154 : f32 to vector<8x128xf32>
    %273 = arith.mulf %272, %271 : vector<8x128xf32>
    %274 = arith.addf %269, %273 : vector<8x128xf32>
    %cst_155 = arith.constant 0.797884583 : f32
    %275 = vector.broadcast %cst_155 : f32 to vector<8x128xf32>
    %276 = arith.mulf %275, %274 : vector<8x128xf32>
    %277 = math.tanh %276 : vector<8x128xf32>
    %cst_156 = arith.constant 1.000000e+00 : f32
    %278 = vector.broadcast %cst_156 : f32 to vector<8x128xf32>
    %279 = arith.addf %278, %277 : vector<8x128xf32>
    %cst_157 = arith.constant 5.000000e-01 : f32
    %280 = vector.broadcast %cst_157 : f32 to vector<8x128xf32>
    %281 = arith.mulf %280, %279 : vector<8x128xf32>
    %282 = arith.mulf %269, %281 : vector<8x128xf32>
    %283 = arith.truncf %282 : vector<8x128xf32> to vector<8x128xbf16>
    %c0_158 = arith.constant 0 : index
    %c0_159 = arith.constant 0 : index
    %284 = vector.load %arg17[%c0_158, %c0_159] : memref<128x32xbf16, #tpu.memory_space<vmem>>, vector<128x32xbf16>
    %cst_160 = arith.constant dense<0.000000e+00> : vector<8x32xf32>
    %285 = tpu.matmul %283, %284, %cst_160 {dimension_numbers = #tpu.dot_dimension_numbers<[1], [0], [0], [1], [0, 0, 1, 1], [], []>} : vector<8x128xbf16>, vector<128x32xbf16>, vector<8x32xf32> -> vector<8x32xf32>
    %c0_161 = arith.constant 0 : index
    %c0_162 = arith.constant 0 : index
    %286 = vector.load %arg18[%c0_161, %c0_162] : memref<1x32xf32, #tpu.memory_space<vmem>>, vector<1x32xf32>
    %287 = vector.broadcast %286 : vector<1x32xf32> to vector<8x32xf32>
    %288 = arith.addf %285, %287 : vector<8x32xf32>
    %c0_163 = arith.constant 0 : index
    %c0_164 = arith.constant 0 : index
    %289 = vector.load %arg20[%c0_163, %c0_164] : memref<1x32xf32, #tpu.memory_space<vmem>>, vector<1x32xf32>
    %290 = vector.broadcast %289 : vector<1x32xf32> to vector<8x32xf32>
    %291 = arith.mulf %290, %288 : vector<8x32xf32>
    %292 = arith.addf %239, %291 : vector<8x32xf32>
    %c0_165 = arith.constant 0 : index
    %c0_166 = arith.constant 0 : index
    %c0_167 = arith.constant 0 : index
    %293 = vector.load %arg21[%c0_165, %c0_166, %c0_167] : memref<1x8x32xf32, #tpu.memory_space<vmem>>, vector<1x8x32xf32>
    %294 = vector.shape_cast %293 : vector<1x8x32xf32> to vector<8x32xf32>
    %295 = vector.shape_cast %239 : vector<8x32xf32> to vector<1x8x32xf32>
    tpu.vector_store %arg21[%c0_165, %c0_166, %c0_167], %295 {strides = array<i32>} : memref<1x8x32xf32, #tpu.memory_space<vmem>>, vector<1x8x32xf32>,
    %c0_168 = arith.constant 0 : index
    %c0_169 = arith.constant 0 : index
    %c0_170 = arith.constant 0 : index
    %296 = vector.load %arg22[%c0_168, %c0_169, %c0_170] : memref<1x8x32xf32, #tpu.memory_space<vmem>>, vector<1x8x32xf32>
    %297 = vector.shape_cast %296 : vector<1x8x32xf32> to vector<8x32xf32>
    %298 = vector.shape_cast %292 : vector<8x32xf32> to vector<1x8x32xf32>
    tpu.vector_store %arg22[%c0_168, %c0_169, %c0_170], %298 {strides = array<i32>} : memref<1x8x32xf32, #tpu.memory_space<vmem>>, vector<1x8x32xf32>,
    return
  }
  func.func @transform_0(%arg0: i32, %arg1: i32) -> (i32, i32, i32) {
    %c0_i32 = arith.constant 0 : i32
    %c0_i32_0 = arith.constant 0 : i32
    %c0_i32_1 = arith.constant 0 : i32
    return %arg0, %c0_i32, %c0_i32_0 : i32, i32, i32
  }
  func.func @transform_1(%arg0: i32, %arg1: i32) -> (i32, i32) {
    %c0_i32 = arith.constant 0 : i32
    %c0_i32_0 = arith.constant 0 : i32
    %c0_i32_1 = arith.constant 0 : i32
    return %c0_i32, %c0_i32_0 : i32, i32
  }
  func.func @transform_2(%arg0: i32, %arg1: i32) -> (i32, i32) {
    %c0_i32 = arith.constant 0 : i32
    %c0_i32_0 = arith.constant 0 : i32
    %c0_i32_1 = arith.constant 0 : i32
    return %c0_i32, %c0_i32_0 : i32, i32
  }
  func.func @transform_3(%arg0: i32, %arg1: i32) -> (i32, i32) {
    %c0_i32 = arith.constant 0 : i32
    %c0_i32_0 = arith.constant 0 : i32
    %c0_i32_1 = arith.constant 0 : i32
    return %c0_i32, %c0_i32_0 : i32, i32
  }
  func.func @transform_4(%arg0: i32, %arg1: i32) -> (i32, i32) {
    %c0_i32 = arith.constant 0 : i32
    %c0_i32_0 = arith.constant 0 : i32
    %c0_i32_1 = arith.constant 0 : i32
    return %c0_i32, %c0_i32_0 : i32, i32
  }
  func.func @transform_5(%arg0: i32, %arg1: i32) -> (i32, i32) {
    %c0_i32 = arith.constant 0 : i32
    %c0_i32_0 = arith.constant 0 : i32
    %c0_i32_1 = arith.constant 0 : i32
    return %c0_i32, %c0_i32_0 : i32, i32
  }
  func.func @transform_6(%arg0: i32, %arg1: i32) -> (i32, i32) {
    %c0_i32 = arith.constant 0 : i32
    %c0_i32_0 = arith.constant 0 : i32
    %c0_i32_1 = arith.constant 0 : i32
    return %c0_i32, %c0_i32_0 : i32, i32
  }
  func.func @transform_7(%arg0: i32, %arg1: i32) -> (i32, i32) {
    %c0_i32 = arith.constant 0 : i32
    %c0_i32_0 = arith.constant 0 : i32
    %c0_i32_1 = arith.constant 0 : i32
    return %c0_i32, %c0_i32_0 : i32, i32
  }
  func.func @transform_8(%arg0: i32, %arg1: i32) -> i32 {
    %c0_i32 = arith.constant 0 : i32
    %c0_i32_0 = arith.constant 0 : i32
    return %c0_i32 : i32
  }
  func.func @transform_9(%arg0: i32, %arg1: i32) -> (i32, i32) {
    %c0_i32 = arith.constant 0 : i32
    %c0_i32_0 = arith.constant 0 : i32
    %c0_i32_1 = arith.constant 0 : i32
    return %c0_i32, %c0_i32_0 : i32, i32
  }
  func.func @transform_10(%arg0: i32, %arg1: i32) -> (i32, i32) {
    %c0_i32 = arith.constant 0 : i32
    %c0_i32_0 = arith.constant 0 : i32
    %c0_i32_1 = arith.constant 0 : i32
    return %c0_i32, %c0_i32_0 : i32, i32
  }
  func.func @transform_11(%arg0: i32, %arg1: i32) -> (i32, i32) {
    %c0_i32 = arith.constant 0 : i32
    %c0_i32_0 = arith.constant 0 : i32
    %c0_i32_1 = arith.constant 0 : i32
    return %c0_i32, %c0_i32_0 : i32, i32
  }
  func.func @transform_12(%arg0: i32, %arg1: i32) -> (i32, i32) {
    %c0_i32 = arith.constant 0 : i32
    %c0_i32_0 = arith.constant 0 : i32
    %c0_i32_1 = arith.constant 0 : i32
    return %c0_i32, %c0_i32_0 : i32, i32
  }
  func.func @transform_13(%arg0: i32, %arg1: i32) -> (i32, i32) {
    %c0_i32 = arith.constant 0 : i32
    %c0_i32_0 = arith.constant 0 : i32
    %c0_i32_1 = arith.constant 0 : i32
    return %c0_i32, %c0_i32_0 : i32, i32
  }
  func.func @transform_14(%arg0: i32, %arg1: i32) -> (i32, i32) {
    %c0_i32 = arith.constant 0 : i32
    %c0_i32_0 = arith.constant 0 : i32
    %c0_i32_1 = arith.constant 0 : i32
    return %c0_i32, %c0_i32_0 : i32, i32
  }
  func.func @transform_15(%arg0: i32, %arg1: i32) -> (i32, i32) {
    %c0_i32 = arith.constant 0 : i32
    %c0_i32_0 = arith.constant 0 : i32
    %c0_i32_1 = arith.constant 0 : i32
    return %c0_i32, %c0_i32_0 : i32, i32
  }
  func.func @transform_16(%arg0: i32, %arg1: i32) -> (i32, i32) {
    %c0_i32 = arith.constant 0 : i32
    %c0_i32_0 = arith.constant 0 : i32
    %c0_i32_1 = arith.constant 0 : i32
    return %c0_i32, %c0_i32_0 : i32, i32
  }
  func.func @transform_17(%arg0: i32, %arg1: i32) -> (i32, i32) {
    %c0_i32 = arith.constant 0 : i32
    %c0_i32_0 = arith.constant 0 : i32
    %c0_i32_1 = arith.constant 0 : i32
    return %c0_i32, %c0_i32_0 : i32, i32
  }
  func.func @transform_18(%arg0: i32, %arg1: i32) -> (i32, i32) {
    %c0_i32 = arith.constant 0 : i32
    %c0_i32_0 = arith.constant 0 : i32
    %c0_i32_1 = arith.constant 0 : i32
    return %c0_i32, %c0_i32_0 : i32, i32
  }
  func.func @transform_19(%arg0: i32, %arg1: i32) -> (i32, i32, i32) {
    %c0_i32 = arith.constant 0 : i32
    %c0_i32_0 = arith.constant 0 : i32
    return %arg0, %arg1, %c0_i32 : i32, i32, i32
  }
  func.func @transform_20(%arg0: i32, %arg1: i32) -> (i32, i32, i32) {
    %c0_i32 = arith.constant 0 : i32
    %c0_i32_0 = arith.constant 0 : i32
    return %arg0, %arg1, %c0_i32 : i32, i32, i32
  }
}

module attributes {stable_mosaic.version = 11 : i64} {
  func.func @layer_scale_block_kernel(%arg0: i32, %arg1: i32, %arg2: memref<1x8x32xf32, #tpu.memory_space<vmem>>, %arg3: memref<1x32xf32, #tpu.memory_space<vmem>>, %arg4: memref<1x32xf32, #tpu.memory_space<vmem>>, %arg5: memref<32x32xbf16, #tpu.memory_space<vmem>>, %arg6: memref<32x32xbf16, #tpu.memory_space<vmem>>, %arg7: memref<32x32xbf16, #tpu.memory_space<vmem>>, %arg8: memref<4x32xf32, #tpu.memory_space<vmem>>, %arg9: memref<4x4xf32, #tpu.memory_space<smem>>, %arg10: memref<4xf32, #tpu.memory_space<smem>>, %arg11: memref<32x32xbf16, #tpu.memory_space<vmem>>, %arg12: memref<1x32xf32, #tpu.memory_space<vmem>>, %arg13: memref<1x32xf32, #tpu.memory_space<vmem>>, %arg14: memref<1x32xf32, #tpu.memory_space<vmem>>, %arg15: memref<32x128xbf16, #tpu.memory_space<vmem>>, %arg16: memref<1x128xf32, #tpu.memory_space<vmem>>, %arg17: memref<128x32xbf16, #tpu.memory_space<vmem>>, %arg18: memref<1x32xf32, #tpu.memory_space<vmem>>, %arg19: memref<1x32xf32, #tpu.memory_space<vmem>>, %arg20: memref<1x32xf32, #tpu.memory_space<vmem>>, %arg21: memref<1x8x32xf32, #tpu.memory_space<vmem>>, %arg22: memref<1x8x32xf32, #tpu.memory_space<vmem>>, %arg23: memref<8x32xbf16, #tpu.memory_space<vmem>>, %arg24: memref<8x32xbf16, #tpu.memory_space<vmem>>, %arg25: memref<8x32xbf16, #tpu.memory_space<vmem>>, %arg26: memref<4x8x8xbf16, #tpu.memory_space<vmem>>, %arg27: memref<8x32xbf16, #tpu.memory_space<vmem>>) attributes {dimension_semantics = [#tpu.dimension_semantics<parallel>, #tpu.dimension_semantics<arbitrary>], iteration_bounds = array<i64: 2, 1>, scalar_prefetch = 0 : i64, scratch_operands = 5 : i64, tpu.core_type = #tpu.core_type<tc>, window_params = [{transform_indices = @transform_0, window_bounds = array<i64: 1, 8, 32>}, {pipeline_mode = #tpu.pipeline_mode<synchronous>, transform_indices = @transform_1, window_bounds = array<i64: 1, 32>}, {pipeline_mode = #tpu.pipeline_mode<synchronous>, transform_indices = @transform_2, window_bounds = array<i64: 1, 32>}, {pipeline_mode = #tpu.pipeline_mode<synchronous>, transform_indices = @transform_3, window_bounds = array<i64: 32, 32>}, {pipeline_mode = #tpu.pipeline_mode<synchronous>, transform_indices = @transform_4, window_bounds = array<i64: 32, 32>}, {pipeline_mode = #tpu.pipeline_mode<synchronous>, transform_indices = @transform_5, window_bounds = array<i64: 32, 32>}, {pipeline_mode = #tpu.pipeline_mode<synchronous>, transform_indices = @transform_6, window_bounds = array<i64: 4, 32>}, {transform_indices = @transform_7, window_bounds = array<i64: 4, 4>}, {transform_indices = @transform_8, window_bounds = array<i64: 4>}, {pipeline_mode = #tpu.pipeline_mode<synchronous>, transform_indices = @transform_9, window_bounds = array<i64: 32, 32>}, {pipeline_mode = #tpu.pipeline_mode<synchronous>, transform_indices = @transform_10, window_bounds = array<i64: 1, 32>}, {pipeline_mode = #tpu.pipeline_mode<synchronous>, transform_indices = @transform_11, window_bounds = array<i64: 1, 32>}, {pipeline_mode = #tpu.pipeline_mode<synchronous>, transform_indices = @transform_12, window_bounds = array<i64: 1, 32>}, {pipeline_mode = #tpu.pipeline_mode<synchronous>, transform_indices = @transform_13, window_bounds = array<i64: 32, 128>}, {pipeline_mode = #tpu.pipeline_mode<synchronous>, transform_indices = @transform_14, window_bounds = array<i64: 1, 128>}, {pipeline_mode = #tpu.pipeline_mode<synchronous>, transform_indices = @transform_15, window_bounds = array<i64: 128, 32>}, {pipeline_mode = #tpu.pipeline_mode<synchronous>, transform_indices = @transform_16, window_bounds = array<i64: 1, 32>}, {pipeline_mode = #tpu.pipeline_mode<synchronous>, transform_indices = @transform_17, window_bounds = array<i64: 1, 32>}, {pipeline_mode = #tpu.pipeline_mode<synchronous>, transform_indices = @transform_18, window_bounds = array<i64: 1, 32>}, {transform_indices = @transform_19, window_bounds = array<i64: 1, 8, 32>}, {transform_indices = @transform_20, window_bounds = array<i64: 1, 8, 32>}]} {
    %c0_i32 = arith.constant 0 : i32
    %0 = arith.cmpi eq, %arg1, %c0_i32 : i32
    %1 = arith.extui %0 : i1 to i32
    %c0_i32_0 = arith.constant 0 : i32
    %2 = arith.cmpi ne, %1, %c0_i32_0 : i32
    scf.if %2 {
      %c0_171 = arith.constant 0 : index
      %c0_172 = arith.constant 0 : index
      %c0_173 = arith.constant 0 : index
      %299 = vector.load %arg2[%c0_171, %c0_172, %c0_173] : memref<1x8x32xf32, #tpu.memory_space<vmem>>, vector<1x8x32xf32>
      %300 = vector.shape_cast %299 : vector<1x8x32xf32> to vector<8x32xf32>
      %c0_174 = arith.constant 0 : index
      %c0_175 = arith.constant 0 : index
      %301 = vector.load %arg3[%c0_174, %c0_175] : memref<1x32xf32, #tpu.memory_space<vmem>>, vector<1x32xf32>
      %c0_176 = arith.constant 0 : index
      %c0_177 = arith.constant 0 : index
      %302 = vector.load %arg4[%c0_176, %c0_177] : memref<1x32xf32, #tpu.memory_space<vmem>>, vector<1x32xf32>
      %cst_178 = arith.constant dense<0.000000e+00> : vector<8xf32>
      %303 = vector.multi_reduction <add>, %300, %cst_178 [1] : vector<8x32xf32> to vector<8xf32>
      %304 = vector.shape_cast %303 : vector<8xf32> to vector<8x1xf32>
      %cst_179 = arith.constant 3.200000e+01 : f32
      %305 = vector.broadcast %cst_179 : f32 to vector<8x1xf32>
      %306 = arith.divf %304, %305 : vector<8x1xf32>
      %307 = vector.broadcast %306 : vector<8x1xf32> to vector<8x32xf32>
      %308 = arith.subf %300, %307 : vector<8x32xf32>
      %309 = arith.mulf %308, %308 : vector<8x32xf32>
      %cst_180 = arith.constant dense<0.000000e+00> : vector<8xf32>
      %310 = vector.multi_reduction <add>, %309, %cst_180 [1] : vector<8x32xf32> to vector<8xf32>
      %311 = vector.shape_cast %310 : vector<8xf32> to vector<8x1xf32>
      %cst_181 = arith.constant 3.200000e+01 : f32
      %312 = vector.broadcast %cst_181 : f32 to vector<8x1xf32>
      %313 = arith.divf %311, %312 : vector<8x1xf32>
      %314 = vector.broadcast %306 : vector<8x1xf32> to vector<8x32xf32>
      %315 = arith.subf %300, %314 : vector<8x32xf32>
      %cst_182 = arith.constant 9.99999974E-6 : f32
      %316 = vector.broadcast %cst_182 : f32 to vector<8x1xf32>
      %317 = arith.addf %313, %316 : vector<8x1xf32>
      %318 = math.rsqrt %317 : vector<8x1xf32>
      %319 = vector.broadcast %318 : vector<8x1xf32> to vector<8x32xf32>
      %320 = arith.mulf %315, %319 : vector<8x32xf32>
      %321 = vector.broadcast %301 : vector<1x32xf32> to vector<8x32xf32>
      %322 = arith.mulf %320, %321 : vector<8x32xf32>
      %323 = vector.broadcast %302 : vector<1x32xf32> to vector<8x32xf32>
      %324 = arith.addf %322, %323 : vector<8x32xf32>
      %325 = arith.truncf %324 : vector<8x32xf32> to vector<8x32xbf16>
      %c0_183 = arith.constant 0 : index
      %c0_184 = arith.constant 0 : index
      %326 = vector.load %arg23[%c0_183, %c0_184] : memref<8x32xbf16, #tpu.memory_space<vmem>>, vector<8x32xbf16>
      tpu.vector_store %arg23[%c0_183, %c0_184], %325 {strides = array<i32>} : memref<8x32xbf16, #tpu.memory_space<vmem>>, vector<8x32xbf16>,
      %c0_185 = arith.constant 0 : index
      %c0_186 = arith.constant 0 : index
      %327 = vector.load %arg6[%c0_185, %c0_186] : memref<32x32xbf16, #tpu.memory_space<vmem>>, vector<32x32xbf16>
      %cst_187 = arith.constant dense<0.000000e+00> : vector<8x32xf32>
      %328 = tpu.matmul %325, %327, %cst_187 {dimension_numbers = #tpu.dot_dimension_numbers<[1], [0], [0], [1], [0, 0, 1, 1], [], []>} : vector<8x32xbf16>, vector<32x32xbf16>, vector<8x32xf32> -> vector<8x32xf32>
      %329 = arith.truncf %328 : vector<8x32xf32> to vector<8x32xbf16>
      %c0_188 = arith.constant 0 : index
      %c0_189 = arith.constant 0 : index
      %330 = vector.load %arg24[%c0_188, %c0_189] : memref<8x32xbf16, #tpu.memory_space<vmem>>, vector<8x32xbf16>
      tpu.vector_store %arg24[%c0_188, %c0_189], %329 {strides = array<i32>} : memref<8x32xbf16, #tpu.memory_space<vmem>>, vector<8x32xbf16>,
      %c0_190 = arith.constant 0 : index
      %c0_191 = arith.constant 0 : index
      %331 = vector.load %arg7[%c0_190, %c0_191] : memref<32x32xbf16, #tpu.memory_space<vmem>>, vector<32x32xbf16>
      %cst_192 = arith.constant dense<0.000000e+00> : vector<8x32xf32>
      %332 = tpu.matmul %325, %331, %cst_192 {dimension_numbers = #tpu.dot_dimension_numbers<[1], [0], [0], [1], [0, 0, 1, 1], [], []>} : vector<8x32xbf16>, vector<32x32xbf16>, vector<8x32xf32> -> vector<8x32xf32>
      %333 = arith.truncf %332 : vector<8x32xf32> to vector<8x32xbf16>
      %c0_193 = arith.constant 0 : index
      %c0_194 = arith.constant 0 : index
      %334 = vector.load %arg25[%c0_193, %c0_194] : memref<8x32xbf16, #tpu.memory_space<vmem>>, vector<8x32xbf16>
      tpu.vector_store %arg25[%c0_193, %c0_194], %333 {strides = array<i32>} : memref<8x32xbf16, #tpu.memory_space<vmem>>, vector<8x32xbf16>,
    } else {
    }
    %c8_i32 = arith.constant 8 : i32
    %3 = arith.muli %arg1, %c8_i32 : i32
    %4 = tpu.assume_multiple %3, 8 : i32
    %c0 = arith.constant 0 : index
    %5 = arith.index_cast %4 : i32 to index
    %c0_1 = arith.constant 0 : index
    %6 = vector.load %arg2[%c0, %5, %c0_1] : memref<1x8x32xf32, #tpu.memory_space<vmem>>, vector<1x8x32xf32>
    %7 = vector.shape_cast %6 : vector<1x8x32xf32> to vector<8x32xf32>
    %8 = arith.index_cast %4 : i32 to index
    %c0_2 = arith.constant 0 : index
    %9 = vector.load %arg23[%8, %c0_2] : memref<8x32xbf16, #tpu.memory_space<vmem>>, vector<8x32xbf16>
    %c0_3 = arith.constant 0 : index
    %c0_4 = arith.constant 0 : index
    %10 = vector.load %arg5[%c0_3, %c0_4] : memref<32x32xbf16, #tpu.memory_space<vmem>>, vector<32x32xbf16>
    %cst = arith.constant dense<0.000000e+00> : vector<8x32xf32>
    %11 = tpu.matmul %9, %10, %cst {dimension_numbers = #tpu.dot_dimension_numbers<[1], [0], [0], [1], [0, 0, 1, 1], [], []>} : vector<8x32xbf16>, vector<32x32xbf16>, vector<8x32xf32> -> vector<8x32xf32>
    %c0_5 = arith.constant 0 : index
    %c0_6 = arith.constant 0 : index
    %12 = vector.load %arg8[%c0_5, %c0_6] : memref<4x32xf32, #tpu.memory_space<vmem>>, vector<4x32xf32>
    %c0_7 = arith.constant 0 : index
    %c0_8 = arith.constant 0 : index
    %13 = vector.load %arg24[%c0_7, %c0_8] : memref<8x32xbf16, #tpu.memory_space<vmem>>, vector<8x32xbf16>
    %14 = vector.extract_strided_slice %12 {offsets = [0, 0], sizes = [1, 32], strides = [1, 1]} : vector<4x32xf32> to vector<1x32xf32>
    %15 = vector.broadcast %14 : vector<1x32xf32> to vector<8x32xf32>
    %16 = arith.mulf %11, %15 : vector<8x32xf32>
    %17 = arith.truncf %16 : vector<8x32xf32> to vector<8x32xbf16>
    %cst_9 = arith.constant dense<0.000000e+00> : vector<8x8xf32>
    %18 = tpu.matmul %17, %13, %cst_9 {dimension_numbers = #tpu.dot_dimension_numbers<[1], [1], [0], [0], [0, 0, 1, 0], [], []>} : vector<8x32xbf16>, vector<8x32xbf16>, vector<8x8xf32> -> vector<8x8xf32>
    %cst_10 = arith.constant dense<0xFF800000> : vector<8xf32>
    %19 = vector.multi_reduction <maximumf>, %18, %cst_10 [1] : vector<8x8xf32> to vector<8xf32>
    %20 = vector.shape_cast %19 : vector<8xf32> to vector<8x1xf32>
    %21 = vector.broadcast %20 : vector<8x1xf32> to vector<8x8xf32>
    %22 = arith.subf %18, %21 : vector<8x8xf32>
    %23 = math.exp %22 : vector<8x8xf32>
    %cst_11 = arith.constant dense<0.000000e+00> : vector<8xf32>
    %24 = vector.multi_reduction <add>, %23, %cst_11 [1] : vector<8x8xf32> to vector<8xf32>
    %25 = vector.shape_cast %24 : vector<8xf32> to vector<8x1xf32>
    %26 = tpu.reciprocal %25 {approx = true} : vector<8x1xf32> -> vector<8x1xf32>
    %27 = vector.broadcast %26 : vector<8x1xf32> to vector<8x8xf32>
    %28 = arith.mulf %23, %27 : vector<8x8xf32>
    %29 = arith.truncf %28 : vector<8x8xf32> to vector<8x8xbf16>
    %c0_12 = arith.constant 0 : index
    %c0_13 = arith.constant 0 : index
    %c0_14 = arith.constant 0 : index
    %30 = vector.load %arg26[%c0_12, %c0_13, %c0_14] : memref<4x8x8xbf16, #tpu.memory_space<vmem>>, vector<1x8x8xbf16>
    %31 = vector.shape_cast %30 : vector<1x8x8xbf16> to vector<8x8xbf16>
    %32 = vector.shape_cast %29 : vector<8x8xbf16> to vector<1x8x8xbf16>
    tpu.vector_store %arg26[%c0_12, %c0_13, %c0_14], %32 {strides = array<i32>} : memref<4x8x8xbf16, #tpu.memory_space<vmem>>, vector<1x8x8xbf16>,
    %33 = vector.extract_strided_slice %12 {offsets = [1, 0], sizes = [1, 32], strides = [1, 1]} : vector<4x32xf32> to vector<1x32xf32>
    %34 = vector.broadcast %33 : vector<1x32xf32> to vector<8x32xf32>
    %35 = arith.mulf %11, %34 : vector<8x32xf32>
    %36 = arith.truncf %35 : vector<8x32xf32> to vector<8x32xbf16>
    %cst_15 = arith.constant dense<0.000000e+00> : vector<8x8xf32>
    %37 = tpu.matmul %36, %13, %cst_15 {dimension_numbers = #tpu.dot_dimension_numbers<[1], [1], [0], [0], [0, 0, 1, 0], [], []>} : vector<8x32xbf16>, vector<8x32xbf16>, vector<8x8xf32> -> vector<8x8xf32>
    %cst_16 = arith.constant dense<0xFF800000> : vector<8xf32>
    %38 = vector.multi_reduction <maximumf>, %37, %cst_16 [1] : vector<8x8xf32> to vector<8xf32>
    %39 = vector.shape_cast %38 : vector<8xf32> to vector<8x1xf32>
    %40 = vector.broadcast %39 : vector<8x1xf32> to vector<8x8xf32>
    %41 = arith.subf %37, %40 : vector<8x8xf32>
    %42 = math.exp %41 : vector<8x8xf32>
    %cst_17 = arith.constant dense<0.000000e+00> : vector<8xf32>
    %43 = vector.multi_reduction <add>, %42, %cst_17 [1] : vector<8x8xf32> to vector<8xf32>
    %44 = vector.shape_cast %43 : vector<8xf32> to vector<8x1xf32>
    %45 = tpu.reciprocal %44 {approx = true} : vector<8x1xf32> -> vector<8x1xf32>
    %46 = vector.broadcast %45 : vector<8x1xf32> to vector<8x8xf32>
    %47 = arith.mulf %42, %46 : vector<8x8xf32>
    %48 = arith.truncf %47 : vector<8x8xf32> to vector<8x8xbf16>
    %c1 = arith.constant 1 : index
    %c0_18 = arith.constant 0 : index
    %c0_19 = arith.constant 0 : index
    %49 = vector.load %arg26[%c1, %c0_18, %c0_19] : memref<4x8x8xbf16, #tpu.memory_space<vmem>>, vector<1x8x8xbf16>
    %50 = vector.shape_cast %49 : vector<1x8x8xbf16> to vector<8x8xbf16>
    %51 = vector.shape_cast %48 : vector<8x8xbf16> to vector<1x8x8xbf16>
    tpu.vector_store %arg26[%c1, %c0_18, %c0_19], %51 {strides = array<i32>} : memref<4x8x8xbf16, #tpu.memory_space<vmem>>, vector<1x8x8xbf16>,
    %52 = vector.extract_strided_slice %12 {offsets = [2, 0], sizes = [1, 32], strides = [1, 1]} : vector<4x32xf32> to vector<1x32xf32>
    %53 = vector.broadcast %52 : vector<1x32xf32> to vector<8x32xf32>
    %54 = arith.mulf %11, %53 : vector<8x32xf32>
    %55 = arith.truncf %54 : vector<8x32xf32> to vector<8x32xbf16>
    %cst_20 = arith.constant dense<0.000000e+00> : vector<8x8xf32>
    %56 = tpu.matmul %55, %13, %cst_20 {dimension_numbers = #tpu.dot_dimension_numbers<[1], [1], [0], [0], [0, 0, 1, 0], [], []>} : vector<8x32xbf16>, vector<8x32xbf16>, vector<8x8xf32> -> vector<8x8xf32>
    %cst_21 = arith.constant dense<0xFF800000> : vector<8xf32>
    %57 = vector.multi_reduction <maximumf>, %56, %cst_21 [1] : vector<8x8xf32> to vector<8xf32>
    %58 = vector.shape_cast %57 : vector<8xf32> to vector<8x1xf32>
    %59 = vector.broadcast %58 : vector<8x1xf32> to vector<8x8xf32>
    %60 = arith.subf %56, %59 : vector<8x8xf32>
    %61 = math.exp %60 : vector<8x8xf32>
    %cst_22 = arith.constant dense<0.000000e+00> : vector<8xf32>
    %62 = vector.multi_reduction <add>, %61, %cst_22 [1] : vector<8x8xf32> to vector<8xf32>
    %63 = vector.shape_cast %62 : vector<8xf32> to vector<8x1xf32>
    %64 = tpu.reciprocal %63 {approx = true} : vector<8x1xf32> -> vector<8x1xf32>
    %65 = vector.broadcast %64 : vector<8x1xf32> to vector<8x8xf32>
    %66 = arith.mulf %61, %65 : vector<8x8xf32>
    %67 = arith.truncf %66 : vector<8x8xf32> to vector<8x8xbf16>
    %c2 = arith.constant 2 : index
    %c0_23 = arith.constant 0 : index
    %c0_24 = arith.constant 0 : index
    %68 = vector.load %arg26[%c2, %c0_23, %c0_24] : memref<4x8x8xbf16, #tpu.memory_space<vmem>>, vector<1x8x8xbf16>
    %69 = vector.shape_cast %68 : vector<1x8x8xbf16> to vector<8x8xbf16>
    %70 = vector.shape_cast %67 : vector<8x8xbf16> to vector<1x8x8xbf16>
    tpu.vector_store %arg26[%c2, %c0_23, %c0_24], %70 {strides = array<i32>} : memref<4x8x8xbf16, #tpu.memory_space<vmem>>, vector<1x8x8xbf16>,
    %71 = vector.extract_strided_slice %12 {offsets = [3, 0], sizes = [1, 32], strides = [1, 1]} : vector<4x32xf32> to vector<1x32xf32>
    %72 = vector.broadcast %71 : vector<1x32xf32> to vector<8x32xf32>
    %73 = arith.mulf %11, %72 : vector<8x32xf32>
    %74 = arith.truncf %73 : vector<8x32xf32> to vector<8x32xbf16>
    %cst_25 = arith.constant dense<0.000000e+00> : vector<8x8xf32>
    %75 = tpu.matmul %74, %13, %cst_25 {dimension_numbers = #tpu.dot_dimension_numbers<[1], [1], [0], [0], [0, 0, 1, 0], [], []>} : vector<8x32xbf16>, vector<8x32xbf16>, vector<8x8xf32> -> vector<8x8xf32>
    %cst_26 = arith.constant dense<0xFF800000> : vector<8xf32>
    %76 = vector.multi_reduction <maximumf>, %75, %cst_26 [1] : vector<8x8xf32> to vector<8xf32>
    %77 = vector.shape_cast %76 : vector<8xf32> to vector<8x1xf32>
    %78 = vector.broadcast %77 : vector<8x1xf32> to vector<8x8xf32>
    %79 = arith.subf %75, %78 : vector<8x8xf32>
    %80 = math.exp %79 : vector<8x8xf32>
    %cst_27 = arith.constant dense<0.000000e+00> : vector<8xf32>
    %81 = vector.multi_reduction <add>, %80, %cst_27 [1] : vector<8x8xf32> to vector<8xf32>
    %82 = vector.shape_cast %81 : vector<8xf32> to vector<8x1xf32>
    %83 = tpu.reciprocal %82 {approx = true} : vector<8x1xf32> -> vector<8x1xf32>
    %84 = vector.broadcast %83 : vector<8x1xf32> to vector<8x8xf32>
    %85 = arith.mulf %80, %84 : vector<8x8xf32>
    %86 = arith.truncf %85 : vector<8x8xf32> to vector<8x8xbf16>
    %c3 = arith.constant 3 : index
    %c0_28 = arith.constant 0 : index
    %c0_29 = arith.constant 0 : index
    %87 = vector.load %arg26[%c3, %c0_28, %c0_29] : memref<4x8x8xbf16, #tpu.memory_space<vmem>>, vector<1x8x8xbf16>
    %88 = vector.shape_cast %87 : vector<1x8x8xbf16> to vector<8x8xbf16>
    %89 = vector.shape_cast %86 : vector<8x8xbf16> to vector<1x8x8xbf16>
    tpu.vector_store %arg26[%c3, %c0_28, %c0_29], %89 {strides = array<i32>} : memref<4x8x8xbf16, #tpu.memory_space<vmem>>, vector<1x8x8xbf16>,
    %c0_30 = arith.constant 0 : index
    %c0_31 = arith.constant 0 : index
    %c0_32 = arith.constant 0 : index
    %90 = vector.load %arg26[%c0_30, %c0_31, %c0_32] : memref<4x8x8xbf16, #tpu.memory_space<vmem>>, vector<1x8x8xbf16>
    %91 = vector.shape_cast %90 : vector<1x8x8xbf16> to vector<8x8xbf16>
    %c0_33 = arith.constant 0 : index
    %c0_34 = arith.constant 0 : index
    %92 = memref.load %arg9[%c0_33, %c0_34] : memref<4x4xf32, #tpu.memory_space<smem>>
    %93 = arith.truncf %92 : f32 to bf16
    %94 = vector.broadcast %93 : bf16 to vector<8x8xbf16>
    %95 = arith.mulf %91, %94 : vector<8x8xbf16>
    %c1_35 = arith.constant 1 : index
    %c0_36 = arith.constant 0 : index
    %c0_37 = arith.constant 0 : index
    %96 = vector.load %arg26[%c1_35, %c0_36, %c0_37] : memref<4x8x8xbf16, #tpu.memory_space<vmem>>, vector<1x8x8xbf16>
    %97 = vector.shape_cast %96 : vector<1x8x8xbf16> to vector<8x8xbf16>
    %c0_38 = arith.constant 0 : index
    %c1_39 = arith.constant 1 : index
    %98 = memref.load %arg9[%c0_38, %c1_39] : memref<4x4xf32, #tpu.memory_space<smem>>
    %99 = arith.truncf %98 : f32 to bf16
    %100 = vector.broadcast %99 : bf16 to vector<8x8xbf16>
    %101 = arith.mulf %97, %100 : vector<8x8xbf16>
    %102 = arith.addf %95, %101 : vector<8x8xbf16>
    %c2_40 = arith.constant 2 : index
    %c0_41 = arith.constant 0 : index
    %c0_42 = arith.constant 0 : index
    %103 = vector.load %arg26[%c2_40, %c0_41, %c0_42] : memref<4x8x8xbf16, #tpu.memory_space<vmem>>, vector<1x8x8xbf16>
    %104 = vector.shape_cast %103 : vector<1x8x8xbf16> to vector<8x8xbf16>
    %c0_43 = arith.constant 0 : index
    %c2_44 = arith.constant 2 : index
    %105 = memref.load %arg9[%c0_43, %c2_44] : memref<4x4xf32, #tpu.memory_space<smem>>
    %106 = arith.truncf %105 : f32 to bf16
    %107 = vector.broadcast %106 : bf16 to vector<8x8xbf16>
    %108 = arith.mulf %104, %107 : vector<8x8xbf16>
    %109 = arith.addf %102, %108 : vector<8x8xbf16>
    %c3_45 = arith.constant 3 : index
    %c0_46 = arith.constant 0 : index
    %c0_47 = arith.constant 0 : index
    %110 = vector.load %arg26[%c3_45, %c0_46, %c0_47] : memref<4x8x8xbf16, #tpu.memory_space<vmem>>, vector<1x8x8xbf16>
    %111 = vector.shape_cast %110 : vector<1x8x8xbf16> to vector<8x8xbf16>
    %c0_48 = arith.constant 0 : index
    %c3_49 = arith.constant 3 : index
    %112 = memref.load %arg9[%c0_48, %c3_49] : memref<4x4xf32, #tpu.memory_space<smem>>
    %113 = arith.truncf %112 : f32 to bf16
    %114 = vector.broadcast %113 : bf16 to vector<8x8xbf16>
    %115 = arith.mulf %111, %114 : vector<8x8xbf16>
    %116 = arith.addf %109, %115 : vector<8x8xbf16>
    %c0_50 = arith.constant 0 : index
    %117 = memref.load %arg10[%c0_50] : memref<4xf32, #tpu.memory_space<smem>>
    %118 = arith.truncf %117 : f32 to bf16
    %119 = vector.broadcast %118 : bf16 to vector<8x8xbf16>
    %120 = arith.addf %116, %119 : vector<8x8xbf16>
    %c0_51 = arith.constant 0 : index
    %c0_52 = arith.constant 0 : index
    %121 = vector.load %arg25[%c0_51, %c0_52] : memref<8x32xbf16, #tpu.memory_space<vmem>>, vector<8x8xbf16>
    %cst_53 = arith.constant dense<0.000000e+00> : vector<8x8xf32>
    %122 = tpu.matmul %120, %121, %cst_53 {dimension_numbers = #tpu.dot_dimension_numbers<[1], [0], [0], [1], [0, 0, 1, 1], [], []>} : vector<8x8xbf16>, vector<8x8xbf16>, vector<8x8xf32> -> vector<8x8xf32>
    %123 = arith.truncf %122 : vector<8x8xf32> to vector<8x8xbf16>
    %c0_54 = arith.constant 0 : index
    %c0_55 = arith.constant 0 : index
    %124 = vector.load %arg27[%c0_54, %c0_55] : memref<8x32xbf16, #tpu.memory_space<vmem>>, vector<8x8xbf16>
    tpu.vector_store %arg27[%c0_54, %c0_55], %123 {strides = array<i32>} : memref<8x32xbf16, #tpu.memory_space<vmem>>, vector<8x8xbf16>,
    %c0_56 = arith.constant 0 : index
    %c0_57 = arith.constant 0 : index
    %c0_58 = arith.constant 0 : index
    %125 = vector.load %arg26[%c0_56, %c0_57, %c0_58] : memref<4x8x8xbf16, #tpu.memory_space<vmem>>, vector<1x8x8xbf16>
    %126 = vector.shape_cast %125 : vector<1x8x8xbf16> to vector<8x8xbf16>
    %c1_59 = arith.constant 1 : index
    %c0_60 = arith.constant 0 : index
    %127 = memref.load %arg9[%c1_59, %c0_60] : memref<4x4xf32, #tpu.memory_space<smem>>
    %128 = arith.truncf %127 : f32 to bf16
    %129 = vector.broadcast %128 : bf16 to vector<8x8xbf16>
    %130 = arith.mulf %126, %129 : vector<8x8xbf16>
    %c1_61 = arith.constant 1 : index
    %c0_62 = arith.constant 0 : index
    %c0_63 = arith.constant 0 : index
    %131 = vector.load %arg26[%c1_61, %c0_62, %c0_63] : memref<4x8x8xbf16, #tpu.memory_space<vmem>>, vector<1x8x8xbf16>
    %132 = vector.shape_cast %131 : vector<1x8x8xbf16> to vector<8x8xbf16>
    %c1_64 = arith.constant 1 : index
    %c1_65 = arith.constant 1 : index
    %133 = memref.load %arg9[%c1_64, %c1_65] : memref<4x4xf32, #tpu.memory_space<smem>>
    %134 = arith.truncf %133 : f32 to bf16
    %135 = vector.broadcast %134 : bf16 to vector<8x8xbf16>
    %136 = arith.mulf %132, %135 : vector<8x8xbf16>
    %137 = arith.addf %130, %136 : vector<8x8xbf16>
    %c2_66 = arith.constant 2 : index
    %c0_67 = arith.constant 0 : index
    %c0_68 = arith.constant 0 : index
    %138 = vector.load %arg26[%c2_66, %c0_67, %c0_68] : memref<4x8x8xbf16, #tpu.memory_space<vmem>>, vector<1x8x8xbf16>
    %139 = vector.shape_cast %138 : vector<1x8x8xbf16> to vector<8x8xbf16>
    %c1_69 = arith.constant 1 : index
    %c2_70 = arith.constant 2 : index
    %140 = memref.load %arg9[%c1_69, %c2_70] : memref<4x4xf32, #tpu.memory_space<smem>>
    %141 = arith.truncf %140 : f32 to bf16
    %142 = vector.broadcast %141 : bf16 to vector<8x8xbf16>
    %143 = arith.mulf %139, %142 : vector<8x8xbf16>
    %144 = arith.addf %137, %143 : vector<8x8xbf16>
    %c3_71 = arith.constant 3 : index
    %c0_72 = arith.constant 0 : index
    %c0_73 = arith.constant 0 : index
    %145 = vector.load %arg26[%c3_71, %c0_72, %c0_73] : memref<4x8x8xbf16, #tpu.memory_space<vmem>>, vector<1x8x8xbf16>
    %146 = vector.shape_cast %145 : vector<1x8x8xbf16> to vector<8x8xbf16>
    %c1_74 = arith.constant 1 : index
    %c3_75 = arith.constant 3 : index
    %147 = memref.load %arg9[%c1_74, %c3_75] : memref<4x4xf32, #tpu.memory_space<smem>>
    %148 = arith.truncf %147 : f32 to bf16
    %149 = vector.broadcast %148 : bf16 to vector<8x8xbf16>
    %150 = arith.mulf %146, %149 : vector<8x8xbf16>
    %151 = arith.addf %144, %150 : vector<8x8xbf16>
    %c1_76 = arith.constant 1 : index
    %152 = memref.load %arg10[%c1_76] : memref<4xf32, #tpu.memory_space<smem>>
    %153 = arith.truncf %152 : f32 to bf16
    %154 = vector.broadcast %153 : bf16 to vector<8x8xbf16>
    %155 = arith.addf %151, %154 : vector<8x8xbf16>
    %c0_77 = arith.constant 0 : index
    %c8 = arith.constant 8 : index
    %156 = vector.load %arg25[%c0_77, %c8] : memref<8x32xbf16, #tpu.memory_space<vmem>>, vector<8x8xbf16>
    %cst_78 = arith.constant dense<0.000000e+00> : vector<8x8xf32>
    %157 = tpu.matmul %155, %156, %cst_78 {dimension_numbers = #tpu.dot_dimension_numbers<[1], [0], [0], [1], [0, 0, 1, 1], [], []>} : vector<8x8xbf16>, vector<8x8xbf16>, vector<8x8xf32> -> vector<8x8xf32>
    %158 = arith.truncf %157 : vector<8x8xf32> to vector<8x8xbf16>
    %c0_79 = arith.constant 0 : index
    %c8_80 = arith.constant 8 : index
    %159 = vector.load %arg27[%c0_79, %c8_80] : memref<8x32xbf16, #tpu.memory_space<vmem>>, vector<8x8xbf16>
    tpu.vector_store %arg27[%c0_79, %c8_80], %158 {strides = array<i32>} : memref<8x32xbf16, #tpu.memory_space<vmem>>, vector<8x8xbf16>,
    %c0_81 = arith.constant 0 : index
    %c0_82 = arith.constant 0 : index
    %c0_83 = arith.constant 0 : index
    %160 = vector.load %arg26[%c0_81, %c0_82, %c0_83] : memref<4x8x8xbf16, #tpu.memory_space<vmem>>, vector<1x8x8xbf16>
    %161 = vector.shape_cast %160 : vector<1x8x8xbf16> to vector<8x8xbf16>
    %c2_84 = arith.constant 2 : index
    %c0_85 = arith.constant 0 : index
    %162 = memref.load %arg9[%c2_84, %c0_85] : memref<4x4xf32, #tpu.memory_space<smem>>
    %163 = arith.truncf %162 : f32 to bf16
    %164 = vector.broadcast %163 : bf16 to vector<8x8xbf16>
    %165 = arith.mulf %161, %164 : vector<8x8xbf16>
    %c1_86 = arith.constant 1 : index
    %c0_87 = arith.constant 0 : index
    %c0_88 = arith.constant 0 : index
    %166 = vector.load %arg26[%c1_86, %c0_87, %c0_88] : memref<4x8x8xbf16, #tpu.memory_space<vmem>>, vector<1x8x8xbf16>
    %167 = vector.shape_cast %166 : vector<1x8x8xbf16> to vector<8x8xbf16>
    %c2_89 = arith.constant 2 : index
    %c1_90 = arith.constant 1 : index
    %168 = memref.load %arg9[%c2_89, %c1_90] : memref<4x4xf32, #tpu.memory_space<smem>>
    %169 = arith.truncf %168 : f32 to bf16
    %170 = vector.broadcast %169 : bf16 to vector<8x8xbf16>
    %171 = arith.mulf %167, %170 : vector<8x8xbf16>
    %172 = arith.addf %165, %171 : vector<8x8xbf16>
    %c2_91 = arith.constant 2 : index
    %c0_92 = arith.constant 0 : index
    %c0_93 = arith.constant 0 : index
    %173 = vector.load %arg26[%c2_91, %c0_92, %c0_93] : memref<4x8x8xbf16, #tpu.memory_space<vmem>>, vector<1x8x8xbf16>
    %174 = vector.shape_cast %173 : vector<1x8x8xbf16> to vector<8x8xbf16>
    %c2_94 = arith.constant 2 : index
    %c2_95 = arith.constant 2 : index
    %175 = memref.load %arg9[%c2_94, %c2_95] : memref<4x4xf32, #tpu.memory_space<smem>>
    %176 = arith.truncf %175 : f32 to bf16
    %177 = vector.broadcast %176 : bf16 to vector<8x8xbf16>
    %178 = arith.mulf %174, %177 : vector<8x8xbf16>
    %179 = arith.addf %172, %178 : vector<8x8xbf16>
    %c3_96 = arith.constant 3 : index
    %c0_97 = arith.constant 0 : index
    %c0_98 = arith.constant 0 : index
    %180 = vector.load %arg26[%c3_96, %c0_97, %c0_98] : memref<4x8x8xbf16, #tpu.memory_space<vmem>>, vector<1x8x8xbf16>
    %181 = vector.shape_cast %180 : vector<1x8x8xbf16> to vector<8x8xbf16>
    %c2_99 = arith.constant 2 : index
    %c3_100 = arith.constant 3 : index
    %182 = memref.load %arg9[%c2_99, %c3_100] : memref<4x4xf32, #tpu.memory_space<smem>>
    %183 = arith.truncf %182 : f32 to bf16
    %184 = vector.broadcast %183 : bf16 to vector<8x8xbf16>
    %185 = arith.mulf %181, %184 : vector<8x8xbf16>
    %186 = arith.addf %179, %185 : vector<8x8xbf16>
    %c2_101 = arith.constant 2 : index
    %187 = memref.load %arg10[%c2_101] : memref<4xf32, #tpu.memory_space<smem>>
    %188 = arith.truncf %187 : f32 to bf16
    %189 = vector.broadcast %188 : bf16 to vector<8x8xbf16>
    %190 = arith.addf %186, %189 : vector<8x8xbf16>
    %c0_102 = arith.constant 0 : index
    %c16 = arith.constant 16 : index
    %191 = vector.load %arg25[%c0_102, %c16] : memref<8x32xbf16, #tpu.memory_space<vmem>>, vector<8x8xbf16>
    %cst_103 = arith.constant dense<0.000000e+00> : vector<8x8xf32>
    %192 = tpu.matmul %190, %191, %cst_103 {dimension_numbers = #tpu.dot_dimension_numbers<[1], [0], [0], [1], [0, 0, 1, 1], [], []>} : vector<8x8xbf16>, vector<8x8xbf16>, vector<8x8xf32> -> vector<8x8xf32>
    %193 = arith.truncf %192 : vector<8x8xf32> to vector<8x8xbf16>
    %c0_104 = arith.constant 0 : index
    %c16_105 = arith.constant 16 : index
    %194 = vector.load %arg27[%c0_104, %c16_105] : memref<8x32xbf16, #tpu.memory_space<vmem>>, vector<8x8xbf16>
    tpu.vector_store %arg27[%c0_104, %c16_105], %193 {strides = array<i32>} : memref<8x32xbf16, #tpu.memory_space<vmem>>, vector<8x8xbf16>,
    %c0_106 = arith.constant 0 : index
    %c0_107 = arith.constant 0 : index
    %c0_108 = arith.constant 0 : index
    %195 = vector.load %arg26[%c0_106, %c0_107, %c0_108] : memref<4x8x8xbf16, #tpu.memory_space<vmem>>, vector<1x8x8xbf16>
    %196 = vector.shape_cast %195 : vector<1x8x8xbf16> to vector<8x8xbf16>
    %c3_109 = arith.constant 3 : index
    %c0_110 = arith.constant 0 : index
    %197 = memref.load %arg9[%c3_109, %c0_110] : memref<4x4xf32, #tpu.memory_space<smem>>
    %198 = arith.truncf %197 : f32 to bf16
    %199 = vector.broadcast %198 : bf16 to vector<8x8xbf16>
    %200 = arith.mulf %196, %199 : vector<8x8xbf16>
    %c1_111 = arith.constant 1 : index
    %c0_112 = arith.constant 0 : index
    %c0_113 = arith.constant 0 : index
    %201 = vector.load %arg26[%c1_111, %c0_112, %c0_113] : memref<4x8x8xbf16, #tpu.memory_space<vmem>>, vector<1x8x8xbf16>
    %202 = vector.shape_cast %201 : vector<1x8x8xbf16> to vector<8x8xbf16>
    %c3_114 = arith.constant 3 : index
    %c1_115 = arith.constant 1 : index
    %203 = memref.load %arg9[%c3_114, %c1_115] : memref<4x4xf32, #tpu.memory_space<smem>>
    %204 = arith.truncf %203 : f32 to bf16
    %205 = vector.broadcast %204 : bf16 to vector<8x8xbf16>
    %206 = arith.mulf %202, %205 : vector<8x8xbf16>
    %207 = arith.addf %200, %206 : vector<8x8xbf16>
    %c2_116 = arith.constant 2 : index
    %c0_117 = arith.constant 0 : index
    %c0_118 = arith.constant 0 : index
    %208 = vector.load %arg26[%c2_116, %c0_117, %c0_118] : memref<4x8x8xbf16, #tpu.memory_space<vmem>>, vector<1x8x8xbf16>
    %209 = vector.shape_cast %208 : vector<1x8x8xbf16> to vector<8x8xbf16>
    %c3_119 = arith.constant 3 : index
    %c2_120 = arith.constant 2 : index
    %210 = memref.load %arg9[%c3_119, %c2_120] : memref<4x4xf32, #tpu.memory_space<smem>>
    %211 = arith.truncf %210 : f32 to bf16
    %212 = vector.broadcast %211 : bf16 to vector<8x8xbf16>
    %213 = arith.mulf %209, %212 : vector<8x8xbf16>
    %214 = arith.addf %207, %213 : vector<8x8xbf16>
    %c3_121 = arith.constant 3 : index
    %c0_122 = arith.constant 0 : index
    %c0_123 = arith.constant 0 : index
    %215 = vector.load %arg26[%c3_121, %c0_122, %c0_123] : memref<4x8x8xbf16, #tpu.memory_space<vmem>>, vector<1x8x8xbf16>
    %216 = vector.shape_cast %215 : vector<1x8x8xbf16> to vector<8x8xbf16>
    %c3_124 = arith.constant 3 : index
    %c3_125 = arith.constant 3 : index
    %217 = memref.load %arg9[%c3_124, %c3_125] : memref<4x4xf32, #tpu.memory_space<smem>>
    %218 = arith.truncf %217 : f32 to bf16
    %219 = vector.broadcast %218 : bf16 to vector<8x8xbf16>
    %220 = arith.mulf %216, %219 : vector<8x8xbf16>
    %221 = arith.addf %214, %220 : vector<8x8xbf16>
    %c3_126 = arith.constant 3 : index
    %222 = memref.load %arg10[%c3_126] : memref<4xf32, #tpu.memory_space<smem>>
    %223 = arith.truncf %222 : f32 to bf16
    %224 = vector.broadcast %223 : bf16 to vector<8x8xbf16>
    %225 = arith.addf %221, %224 : vector<8x8xbf16>
    %c0_127 = arith.constant 0 : index
    %c24 = arith.constant 24 : index
    %226 = vector.load %arg25[%c0_127, %c24] : memref<8x32xbf16, #tpu.memory_space<vmem>>, vector<8x8xbf16>
    %cst_128 = arith.constant dense<0.000000e+00> : vector<8x8xf32>
    %227 = tpu.matmul %225, %226, %cst_128 {dimension_numbers = #tpu.dot_dimension_numbers<[1], [0], [0], [1], [0, 0, 1, 1], [], []>} : vector<8x8xbf16>, vector<8x8xbf16>, vector<8x8xf32> -> vector<8x8xf32>
    %228 = arith.truncf %227 : vector<8x8xf32> to vector<8x8xbf16>
    %c0_129 = arith.constant 0 : index
    %c24_130 = arith.constant 24 : index
    %229 = vector.load %arg27[%c0_129, %c24_130] : memref<8x32xbf16, #tpu.memory_space<vmem>>, vector<8x8xbf16>
    tpu.vector_store %arg27[%c0_129, %c24_130], %228 {strides = array<i32>} : memref<8x32xbf16, #tpu.memory_space<vmem>>, vector<8x8xbf16>,
    %c0_131 = arith.constant 0 : index
    %c0_132 = arith.constant 0 : index
    %230 = vector.load %arg27[%c0_131, %c0_132] : memref<8x32xbf16, #tpu.memory_space<vmem>>, vector<8x32xbf16>
    %c0_133 = arith.constant 0 : index
    %c0_134 = arith.constant 0 : index
    %231 = vector.load %arg11[%c0_133, %c0_134] : memref<32x32xbf16, #tpu.memory_space<vmem>>, vector<32x32xbf16>
    %cst_135 = arith.constant dense<0.000000e+00> : vector<8x32xf32>
    %232 = tpu.matmul %230, %231, %cst_135 {dimension_numbers = #tpu.dot_dimension_numbers<[1], [0], [0], [1], [0, 0, 1, 1], [], []>} : vector<8x32xbf16>, vector<32x32xbf16>, vector<8x32xf32> -> vector<8x32xf32>
    %c0_136 = arith.constant 0 : index
    %c0_137 = arith.constant 0 : index
    %233 = vector.load %arg12[%c0_136, %c0_137] : memref<1x32xf32, #tpu.memory_space<vmem>>, vector<1x32xf32>
    %234 = vector.broadcast %233 : vector<1x32xf32> to vector<8x32xf32>
    %235 = arith.addf %232, %234 : vector<8x32xf32>
    %c0_138 = arith.constant 0 : index
    %c0_139 = arith.constant 0 : index
    %236 = vector.load %arg19[%c0_138, %c0_139] : memref<1x32xf32, #tpu.memory_space<vmem>>, vector<1x32xf32>
    %237 = vector.broadcast %236 : vector<1x32xf32> to vector<8x32xf32>
    %238 = arith.mulf %237, %235 : vector<8x32xf32>
    %239 = arith.addf %7, %238 : vector<8x32xf32>
    %c0_140 = arith.constant 0 : index
    %c0_141 = arith.constant 0 : index
    %240 = vector.load %arg13[%c0_140, %c0_141] : memref<1x32xf32, #tpu.memory_space<vmem>>, vector<1x32xf32>
    %c0_142 = arith.constant 0 : index
    %c0_143 = arith.constant 0 : index
    %241 = vector.load %arg14[%c0_142, %c0_143] : memref<1x32xf32, #tpu.memory_space<vmem>>, vector<1x32xf32>
    %cst_144 = arith.constant dense<0.000000e+00> : vector<8xf32>
    %242 = vector.multi_reduction <add>, %239, %cst_144 [1] : vector<8x32xf32> to vector<8xf32>
    %243 = vector.shape_cast %242 : vector<8xf32> to vector<8x1xf32>
    %cst_145 = arith.constant 3.200000e+01 : f32
    %244 = vector.broadcast %cst_145 : f32 to vector<8x1xf32>
    %245 = arith.divf %243, %244 : vector<8x1xf32>
    %246 = vector.broadcast %245 : vector<8x1xf32> to vector<8x32xf32>
    %247 = arith.subf %239, %246 : vector<8x32xf32>
    %248 = arith.mulf %247, %247 : vector<8x32xf32>
    %cst_146 = arith.constant dense<0.000000e+00> : vector<8xf32>
    %249 = vector.multi_reduction <add>, %248, %cst_146 [1] : vector<8x32xf32> to vector<8xf32>
    %250 = vector.shape_cast %249 : vector<8xf32> to vector<8x1xf32>
    %cst_147 = arith.constant 3.200000e+01 : f32
    %251 = vector.broadcast %cst_147 : f32 to vector<8x1xf32>
    %252 = arith.divf %250, %251 : vector<8x1xf32>
    %253 = vector.broadcast %245 : vector<8x1xf32> to vector<8x32xf32>
    %254 = arith.subf %239, %253 : vector<8x32xf32>
    %cst_148 = arith.constant 9.99999974E-6 : f32
    %255 = vector.broadcast %cst_148 : f32 to vector<8x1xf32>
    %256 = arith.addf %252, %255 : vector<8x1xf32>
    %257 = math.rsqrt %256 : vector<8x1xf32>
    %258 = vector.broadcast %257 : vector<8x1xf32> to vector<8x32xf32>
    %259 = arith.mulf %254, %258 : vector<8x32xf32>
    %260 = vector.broadcast %240 : vector<1x32xf32> to vector<8x32xf32>
    %261 = arith.mulf %259, %260 : vector<8x32xf32>
    %262 = vector.broadcast %241 : vector<1x32xf32> to vector<8x32xf32>
    %263 = arith.addf %261, %262 : vector<8x32xf32>
    %264 = arith.truncf %263 : vector<8x32xf32> to vector<8x32xbf16>
    %c0_149 = arith.constant 0 : index
    %c0_150 = arith.constant 0 : index
    %265 = vector.load %arg15[%c0_149, %c0_150] : memref<32x128xbf16, #tpu.memory_space<vmem>>, vector<32x128xbf16>
    %cst_151 = arith.constant dense<0.000000e+00> : vector<8x128xf32>
    %266 = tpu.matmul %264, %265, %cst_151 {dimension_numbers = #tpu.dot_dimension_numbers<[1], [0], [0], [1], [0, 0, 1, 1], [], []>} : vector<8x32xbf16>, vector<32x128xbf16>, vector<8x128xf32> -> vector<8x128xf32>
    %c0_152 = arith.constant 0 : index
    %c0_153 = arith.constant 0 : index
    %267 = vector.load %arg16[%c0_152, %c0_153] : memref<1x128xf32, #tpu.memory_space<vmem>>, vector<1x128xf32>
    %268 = vector.broadcast %267 : vector<1x128xf32> to vector<8x128xf32>
    %269 = arith.addf %266, %268 : vector<8x128xf32>
    %270 = arith.mulf %269, %269 : vector<8x128xf32>
    %271 = arith.mulf %269, %270 : vector<8x128xf32>
    %cst_154 = arith.constant 4.471500e-02 : f32
    %272 = vector.broadcast %cst_154 : f32 to vector<8x128xf32>
    %273 = arith.mulf %272, %271 : vector<8x128xf32>
    %274 = arith.addf %269, %273 : vector<8x128xf32>
    %cst_155 = arith.constant 0.797884583 : f32
    %275 = vector.broadcast %cst_155 : f32 to vector<8x128xf32>
    %276 = arith.mulf %275, %274 : vector<8x128xf32>
    %277 = math.tanh %276 : vector<8x128xf32>
    %cst_156 = arith.constant 1.000000e+00 : f32
    %278 = vector.broadcast %cst_156 : f32 to vector<8x128xf32>
    %279 = arith.addf %278, %277 : vector<8x128xf32>
    %cst_157 = arith.constant 5.000000e-01 : f32
    %280 = vector.broadcast %cst_157 : f32 to vector<8x128xf32>
    %281 = arith.mulf %280, %279 : vector<8x128xf32>
    %282 = arith.mulf %269, %281 : vector<8x128xf32>
    %283 = arith.truncf %282 : vector<8x128xf32> to vector<8x128xbf16>
    %c0_158 = arith.constant 0 : index
    %c0_159 = arith.constant 0 : index
    %284 = vector.load %arg17[%c0_158, %c0_159] : memref<128x32xbf16, #tpu.memory_space<vmem>>, vector<128x32xbf16>
    %cst_160 = arith.constant dense<0.000000e+00> : vector<8x32xf32>
    %285 = tpu.matmul %283, %284, %cst_160 {dimension_numbers = #tpu.dot_dimension_numbers<[1], [0], [0], [1], [0, 0, 1, 1], [], []>} : vector<8x128xbf16>, vector<128x32xbf16>, vector<8x32xf32> -> vector<8x32xf32>
    %c0_161 = arith.constant 0 : index
    %c0_162 = arith.constant 0 : index
    %286 = vector.load %arg18[%c0_161, %c0_162] : memref<1x32xf32, #tpu.memory_space<vmem>>, vector<1x32xf32>
    %287 = vector.broadcast %286 : vector<1x32xf32> to vector<8x32xf32>
    %288 = arith.addf %285, %287 : vector<8x32xf32>
    %c0_163 = arith.constant 0 : index
    %c0_164 = arith.constant 0 : index
    %289 = vector.load %arg20[%c0_163, %c0_164] : memref<1x32xf32, #tpu.memory_space<vmem>>, vector<1x32xf32>
    %290 = vector.broadcast %289 : vector<1x32xf32> to vector<8x32xf32>
    %291 = arith.mulf %290, %288 : vector<8x32xf32>
    %292 = arith.addf %239, %291 : vector<8x32xf32>
    %c0_165 = arith.constant 0 : index
    %c0_166 = arith.constant 0 : index
    %c0_167 = arith.constant 0 : index
    %293 = vector.load %arg21[%c0_165, %c0_166, %c0_167] : memref<1x8x32xf32, #tpu.memory_space<vmem>>, vector<1x8x32xf32>
    %294 = vector.shape_cast %293 : vector<1x8x32xf32> to vector<8x32xf32>
    %295 = vector.shape_cast %239 : vector<8x32xf32> to vector<1x8x32xf32>
    tpu.vector_store %arg21[%c0_165, %c0_166, %c0_167], %295 {strides = array<i32>} : memref<1x8x32xf32, #tpu.memory_space<vmem>>, vector<1x8x32xf32>,
    %c0_168 = arith.constant 0 : index
    %c0_169 = arith.constant 0 : index
    %c0_170 = arith.constant 0 : index
    %296 = vector.load %arg22[%c0_168, %c0_169, %c0_170] : memref<1x8x32xf32, #tpu.memory_space<vmem>>, vector<1x8x32xf32>
    %297 = vector.shape_cast %296 : vector<1x8x32xf32> to vector<8x32xf32>
    %298 = vector.shape_cast %292 : vector<8x32xf32> to vector<1x8x32xf32>
    tpu.vector_store %arg22[%c0_168, %c0_169, %c0_170], %298 {strides = array<i32>} : memref<1x8x32xf32, #tpu.memory_space<vmem>>, vector<1x8x32xf32>,
    return
  }
  func.func @transform_0(%arg0: i32, %arg1: i32) -> (i32, i32, i32) {
    %c0_i32 = arith.constant 0 : i32
    %c0_i32_0 = arith.constant 0 : i32
    %c0_i32_1 = arith.constant 0 : i32
    return %arg0, %c0_i32, %c0_i32_0 : i32, i32, i32
  }
  func.func @transform_1(%arg0: i32, %arg1: i32) -> (i32, i32) {
    %c0_i32 = arith.constant 0 : i32
    %c0_i32_0 = arith.constant 0 : i32
    %c0_i32_1 = arith.constant 0 : i32
    return %c0_i32, %c0_i32_0 : i32, i32
  }
  func.func @transform_2(%arg0: i32, %arg1: i32) -> (i32, i32) {
    %c0_i32 = arith.constant 0 : i32
    %c0_i32_0 = arith.constant 0 : i32
    %c0_i32_1 = arith.constant 0 : i32
    return %c0_i32, %c0_i32_0 : i32, i32
  }
  func.func @transform_3(%arg0: i32, %arg1: i32) -> (i32, i32) {
    %c0_i32 = arith.constant 0 : i32
    %c0_i32_0 = arith.constant 0 : i32
    %c0_i32_1 = arith.constant 0 : i32
    return %c0_i32, %c0_i32_0 : i32, i32
  }
  func.func @transform_4(%arg0: i32, %arg1: i32) -> (i32, i32) {
    %c0_i32 = arith.constant 0 : i32
    %c0_i32_0 = arith.constant 0 : i32
    %c0_i32_1 = arith.constant 0 : i32
    return %c0_i32, %c0_i32_0 : i32, i32
  }
  func.func @transform_5(%arg0: i32, %arg1: i32) -> (i32, i32) {
    %c0_i32 = arith.constant 0 : i32
    %c0_i32_0 = arith.constant 0 : i32
    %c0_i32_1 = arith.constant 0 : i32
    return %c0_i32, %c0_i32_0 : i32, i32
  }
  func.func @transform_6(%arg0: i32, %arg1: i32) -> (i32, i32) {
    %c0_i32 = arith.constant 0 : i32
    %c0_i32_0 = arith.constant 0 : i32
    %c0_i32_1 = arith.constant 0 : i32
    return %c0_i32, %c0_i32_0 : i32, i32
  }
  func.func @transform_7(%arg0: i32, %arg1: i32) -> (i32, i32) {
    %c0_i32 = arith.constant 0 : i32
    %c0_i32_0 = arith.constant 0 : i32
    %c0_i32_1 = arith.constant 0 : i32
    return %c0_i32, %c0_i32_0 : i32, i32
  }
  func.func @transform_8(%arg0: i32, %arg1: i32) -> i32 {
    %c0_i32 = arith.constant 0 : i32
    %c0_i32_0 = arith.constant 0 : i32
    return %c0_i32 : i32
  }
  func.func @transform_9(%arg0: i32, %arg1: i32) -> (i32, i32) {
    %c0_i32 = arith.constant 0 : i32
    %c0_i32_0 = arith.constant 0 : i32
    %c0_i32_1 = arith.constant 0 : i32
    return %c0_i32, %c0_i32_0 : i32, i32
  }
  func.func @transform_10(%arg0: i32, %arg1: i32) -> (i32, i32) {
    %c0_i32 = arith.constant 0 : i32
    %c0_i32_0 = arith.constant 0 : i32
    %c0_i32_1 = arith.constant 0 : i32
    return %c0_i32, %c0_i32_0 : i32, i32
  }
  func.func @transform_11(%arg0: i32, %arg1: i32) -> (i32, i32) {
    %c0_i32 = arith.constant 0 : i32
    %c0_i32_0 = arith.constant 0 : i32
    %c0_i32_1 = arith.constant 0 : i32
    return %c0_i32, %c0_i32_0 : i32, i32
  }
  func.func @transform_12(%arg0: i32, %arg1: i32) -> (i32, i32) {
    %c0_i32 = arith.constant 0 : i32
    %c0_i32_0 = arith.constant 0 : i32
    %c0_i32_1 = arith.constant 0 : i32
    return %c0_i32, %c0_i32_0 : i32, i32
  }
  func.func @transform_13(%arg0: i32, %arg1: i32) -> (i32, i32) {
    %c0_i32 = arith.constant 0 : i32
    %c0_i32_0 = arith.constant 0 : i32
    %c0_i32_1 = arith.constant 0 : i32
    return %c0_i32, %c0_i32_0 : i32, i32
  }
  func.func @transform_14(%arg0: i32, %arg1: i32) -> (i32, i32) {
    %c0_i32 = arith.constant 0 : i32
    %c0_i32_0 = arith.constant 0 : i32
    %c0_i32_1 = arith.constant 0 : i32
    return %c0_i32, %c0_i32_0 : i32, i32
  }
  func.func @transform_15(%arg0: i32, %arg1: i32) -> (i32, i32) {
    %c0_i32 = arith.constant 0 : i32
    %c0_i32_0 = arith.constant 0 : i32
    %c0_i32_1 = arith.constant 0 : i32
    return %c0_i32, %c0_i32_0 : i32, i32
  }
  func.func @transform_16(%arg0: i32, %arg1: i32) -> (i32, i32) {
    %c0_i32 = arith.constant 0 : i32
    %c0_i32_0 = arith.constant 0 : i32
    %c0_i32_1 = arith.constant 0 : i32
    return %c0_i32, %c0_i32_0 : i32, i32
  }
  func.func @transform_17(%arg0: i32, %arg1: i32) -> (i32, i32) {
    %c0_i32 = arith.constant 0 : i32
    %c0_i32_0 = arith.constant 0 : i32
    %c0_i32_1 = arith.constant 0 : i32
    return %c0_i32, %c0_i32_0 : i32, i32
  }
  func.func @transform_18(%arg0: i32, %arg1: i32) -> (i32, i32) {
    %c0_i32 = arith.constant 0 : i32
    %c0_i32_0 = arith.constant 0 : i32
    %c0_i32_1 = arith.constant 0 : i32
    return %c0_i32, %c0_i32_0 : i32, i32
  }
  func.func @transform_19(%arg0: i32, %arg1: i32) -> (i32, i32, i32) {
    %c0_i32 = arith.constant 0 : i32
    %c0_i32_0 = arith.constant 0 : i32
    return %arg0, %arg1, %c0_i32 : i32, i32, i32
  }
  func.func @transform_20(%arg0: i32, %arg1: i32) -> (i32, i32, i32) {
    %c0_i32 = arith.constant 0 : i32
    %c0_i32_0 = arith.constant 0 : i32
    return %arg0, %arg1, %c0_i32 : i32, i32, i32
  }
}

</mosaic_0001>

<bundles_post_ra>
// kernel: tpu_custom_call.1
= control target key start
LH: loop header
LB: loop body
LE: loop exit
PB: predicated region body
PF: predicated region fallthrough
CT: control target
= control target key end

     0   :  { %s3609_s0 = inlined_call_operand.vmem [shape: f32[2,8,32], index: 0, kind: input, shape index: {}]   ;;  %s3610_s1 = inlined_call_operand.vmem [shape: f32[1,32], index: 1, kind: input, shape index: {}]   ;;  %s3611_s2 = inlined_call_operand.vmem [shape: f32[1,32], index: 2, kind: input, shape index: {}]   ;;  %s3612_s3 = inlined_call_operand.vmem [shape: bf16[32,32], index: 3, kind: input, shape index: {}]   ;;  %s3613_s4 = inlined_call_operand.vmem [shape: bf16[32,32], index: 4, kind: input, shape index: {}]   ;;  %s3614_s5 = inlined_call_operand.vmem [shape: bf16[32,32], index: 5, kind: input, shape index: {}]   ;;  %s3615_s6 = inlined_call_operand.hbm [shape: f32[4,32], index: 6, kind: input, shape index: {}]   ;;  %s3616_s7 = inlined_call_operand.hbm [shape: f32[4,4], index: 7, kind: input, shape index: {}]   ;;  %s3617_s8 = inlined_call_operand.hbm [shape: f32[4], index: 8, kind: input, shape index: {}]   ;;  %s3618_s9 = inlined_call_operand.vmem [shape: bf16[32,32], index: 9, kind: input, shape index: {}]   ;;  %s3619_s10 = inlined_call_operand.vmem [shape: f32[1,32], index: 10, kind: input, shape index: {}]   ;;  %s3620_s11 = inlined_call_operand.vmem [shape: f32[1,32], index: 11, kind: input, shape index: {}]   ;;  %s3621_s12 = inlined_call_operand.vmem [shape: f32[1,32], index: 12, kind: input, shape index: {}]   ;;  %s3622_s13 = inlined_call_operand.vmem [shape: bf16[32,128], index: 13, kind: input, shape index: {}]   ;;  %s3623_s14 = inlined_call_operand.vmem [shape: f32[1,128], index: 14, kind: input, shape index: {}]   ;;  %s3624_s15 = inlined_call_operand.vmem [shape: bf16[128,32], index: 15, kind: input, shape index: {}]   ;;  %s3625_s16 = inlined_call_operand.vmem [shape: f32[1,32], index: 16, kind: input, shape index: {}]   ;;  %s3626_s17 = inlined_call_operand.vmem [shape: f32[1,32], index: 17, kind: input, shape index: {}]   ;;  %s3627_s18 = inlined_call_operand.vmem [shape: f32[1,32], index: 18, kind: input, shape index: {}]   ;;  %s3628_s19 = inlined_call_operand.hbm [shape: f32[2,8,32], index: 19, kind: output, shape index: {0}]   ;;  %s3629_s20 = inlined_call_operand.hbm [shape: f32[2,8,32], index: 20, kind: output, shape index: {1}]  }
   0x1   :  { %3658 = sst [smem:[#allocation36_spill]] %s3609_s0 }
   0x2   :  { %3659 = sst [smem:[#allocation37_spill]] %s3610_s1 }
   0x3   :  { %3660 = sst [smem:[#allocation38_spill]] %s3611_s2 }
   0x4   :  { %3661 = sst [smem:[#allocation39_spill]] %s3612_s3 }
   0x5   :  { %3662 = sst [smem:[#allocation40_spill]] %s3613_s4 }
   0x6   :  { %3663 = sst [smem:[#allocation41_spill]] %s3614_s5 }
   0x7   :  { %3664 = sst [smem:[#allocation42_spill]] %s3615_s6 }
   0x8   :  { %3665 = sst [smem:[#allocation43_spill]] %s3616_s7 }
   0x9   :  { %3666 = sst [smem:[#allocation44_spill]] %s3617_s8 }
   0xa   :  { %3667 = sst [smem:[#allocation45_spill]] %s3618_s9 }
   0xb   :  { %3668 = sst [smem:[#allocation46_spill]] %s3619_s10 }
   0xc   :  { %3669 = sst [smem:[#allocation47_spill]] %s3620_s11 }
   0xd   :  { %3670 = sst [smem:[#allocation48_spill]] %s3621_s12 }
   0xe   :  { %3671 = sst [smem:[#allocation49_spill]] %s3622_s13 }
   0xf   :  { %3672 = sst [smem:[#allocation50_spill]] %s3623_s14 }
  0x10   :  { %3673 = sst [smem:[#allocation51_spill]] %s3624_s15 }
  0x11   :  { %3674 = sst [smem:[#allocation52_spill]] %s3625_s16 }
  0x12   :  { %3675 = sst [smem:[#allocation53_spill]] %s3626_s17 }
  0x13   :  { %3676 = sst [smem:[#allocation54_spill]] %s3627_s18 }
  0x14   :  { %3677 = sst [smem:[#allocation55_spill]] %s3628_s19 }
  0x15   :  { %3678 = sst [smem:[#allocation56_spill]] %s3629_s20 }
  0x16   :  { %26 = vsyncpa [#allocation8], 0 }
  0x17   :  { %27 = vsyncpa [#allocation10], 0 }
  0x18   :  { %28 = vsyncpa [#allocation13], 0 }
  0x19   :  { %29 = vsyncpa [#allocation9], 0 }
  0x1a   :  { %31 = vsyncpa [#allocation9 + $0x1], 0 }
  0x1b   :  { %32 = vsyncpa [#allocation16], 0 }
  0x1c   :  { %34 = vsyncpa [#allocation16 + $0x1], 0  ;;  %s2906_s1 = smov 0   ;;  %s2908_s22 = smov 0  }
  0x1d   :  { %s2910_s23 = smov 0   ;;  %s2912_s24 = smov 0  }
  0x1e   :  { %s2914_s2 = smov 0   ;;  %s2916_s25 = smov 0  }
  0x1f LB: > { %3679 = sst [smem:[#allocation22_spill]] %s2766_s1  ;;  %s2232_s3 = sadd.s32 4294967295, %s2786_s25   ;;  %s2786_s25 = sphi %s2916_s25, %s40_s25   ;;  %s2782_s2 = sphi %s2914_s2, %s3741_s2   ;;  %s2778_s24 = sphi %s2912_s24, %s3740_s24   ;;  %s2774_s23 = sphi %s2910_s23, %s3739_s23   ;;  %s2770_s22 = sphi %s2908_s22, %s3738_s22   ;;  %s2766_s1 = sphi %s2906_s1, %s3737_s1  }
  0x20   : > { %3680 = sst [smem:[#allocation23_spill]] %s2770_s22  ;;  %s2233_s26 = sadd.s32 4294967294, %s2786_s25  }
  0x21   : > { %3681 = sst [smem:[#allocation24_spill]] %s2774_s23  ;;  %s52_s27 = sadd.s32 1, %s2782_s2 }
  0x22   : > { %3682 = sst [smem:[#allocation25_spill]] %s2778_s24  ;;  %s465_s28 = sadd.s32 1, %s2774_s23 }
  0x23   : > { %3683 = sst [smem:[#allocation26_spill]] %s2782_s2  ;;  %p54_p0 = scmp.ge.s32.totalorder %s52_s27, 2 }
  0x24   : > { %3684 = sst [smem:[#allocation27_spill]] %s2786_s25  ;;  %p475_p1 = scmp.ne.s32.totalorder %s2774_s23, %s2770_s22 }
  0x25   : > { %p476_p2 = scmp.eq.s32.totalorder %s2232_s3, 1  ;;  %p481_p3 = scmp.ne.s32.totalorder %s2770_s22, %s2766_s1 }
  0x26   : > { %s3743_s27 = smov (%p54_p0, %s52_s27), 0  ;;  %p482_p5 = scmp.eq.s32.totalorder %s2233_s26, 1 }
  0x27   : > { %3685 = sst [smem:[#allocation28_spill]] %s3743_s27  ;;  %p2946_p4 = por %p476_p2, %p475_p1 }
  0x28   : > { %s460_s29 = ssub.s32 %s2782_s2, %s3743_s27  ;;  %p2234_p6 = scmp.ge.s32.totalorder %s2786_s25, 1 }
  0x29   : > { %s3686_s4 = scalar_select %p2946_p4, 1, 0 }
  0x2a   : > { %p463_p7 = scmp.eq.s32.totalorder %s460_s29, 0  ;;  %p2953_p8 = por %p482_p5, %p481_p3 }
  0x2b   : > { %3687 = sst [smem:[#allocation29_spill]] %s3686_s4  ;;  %p517_p9 = scmp.lt.s32.totalorder %s2786_s25, 3 }
  0x2c   : > { %s3688_s30 = scalar_select %p2953_p8, 1, 0 }
  0x2d   : > { %s2959_s0 = scalar_select %p463_p7, %s2774_s23, %s465_s28  }
  0x2e   : > { %3689 = sst [smem:[#allocation30_spill]] %s3688_s30  ;;  %p2961_p10 = pnand %p2234_p6, %p517_p9 }
  0x2f   : > { %3690 = sst [smem:[#allocation31_spill]] %s2959_s0  ;;  %p2965_p11 = scmp.eq.s32.totalorder %s2232_s3, 0 }
  0x30   : > { %s3691_s21 = scalar_select %p2961_p10, 1, 0 }
  0x31   : > { %s3692_s1 = scalar_select %p2965_p11, 1, 0 }
  0x32   : > { %p2483_p12 = pneg %p2961_p10  ;;  %s2788_s26 = smov [#allocation7]  }
  0x33   : > { %s545_s29 = sshll.u32 %s2788_s26, 4  ;;  %s3694_s6 = sld [smem:[#allocation42_spill]]  ;;  %s546_s29 = int_to_ptr.vmem [resolvable:$true] %s545_s29 }
  0x34   : > { %p2973_p13 = pnand %p2965_p11, %p2483_p12 }
  0x36   : > { %p2612_p1 = pneg %p2973_p13 }
  0x39   : > { %s2610_s3 = scalar_lea.hbm %s3694_s6, 64 }
  0x3a   : > { %p2611_p0 = scmp.ne.s32.totalorder %s3694_s6, %s2610_s3  ;;  %p2617_p5 = scmp.lt.u32.totalorder %s2610_s3, %s3694_s6 }
  0x3c   : > { %p2613_p2 = pnand %p2612_p1, %p2611_p0 }
  0x3e   : > { %p2614_p3 = pneg %p2613_p2 }
  0x40   : > { %p2619_p6 = pnand %p2617_p5, %p2614_p3 }
  0x42   : > { %2622 = shalt.err (!%p2619_p6)
}
  0x43   : > { %s2623_s2 = scalar_lea.vmem %s546_s29, 64  ;;  %p2631_p8 = scmp.lt.s32.totalorder %s546_s29, %s546_s29 }
  0x44   : > { %p2624_p7 = scmp.ne.s32.totalorder %s546_s29, %s2623_s2  ;;  %p2632_p4 = scmp.lt.s32.totalorder %s2623_s2, %s2623_s2 }
  0x46   : > { %p2626_p9 = pnand %p2624_p7, %p2612_p1  ;;  %p2633_p11 = por %p2632_p4, %p2631_p8 }
  0x48   : > { %p2627_p12 = pneg %p2626_p9 }
  0x4a   : > { %p2634_p10 = pnand %p2633_p11, %p2627_p12 }
  0x4c   : > { %2637 = shalt.err (!%p2634_p10)
}
  0x4d   : > { %2486 = dma.hbm_to_vmem [thread:$0]  (!%p2973_p13), %s3694_s6, 64, %s546_s29, [#allocation8]  }
  0x4e   : > { %s3695_s7 = sld [smem:[#allocation43_spill]] }
  0x54   : > { %s2638_s3 = scalar_lea.hbm %s3695_s7, 64 }
  0x55   : > { %p2639_p0 = scmp.ne.s32.totalorder %s3695_s7, %s2638_s3  ;;  %p2645_p10 = scmp.lt.u32.totalorder %s2638_s3, %s3695_s7 }
  0x57   : > { %p2641_p4 = pnand %p2639_p0, %p2612_p1 }
  0x59   : > { %p2642_p8 = pneg %p2641_p4 }
  0x5b   : > { %p2647_p11 = pnand %p2645_p10, %p2642_p8 }
  0x5d   : > { %2650 = shalt.err (!%p2647_p11)
}
  0x5e   : > { %s2789_s23 = smov [#allocation11]   ;;  %s3696_s8 = sld [smem:[#allocation44_spill]] }
  0x5f   : > { %2489 = dma.hbm_to_smem (!%p2973_p13), %s3695_s7, 64, %s2789_s23, [#allocation10]  }
  0x64   : > { %s2651_s28 = scalar_lea.hbm %s3696_s8, 16 }
  0x65   : > { %p2652_p2 = scmp.ne.s32.totalorder %s3696_s8, %s2651_s28  ;;  %p2658_p6 = scmp.lt.u32.totalorder %s2651_s28, %s3696_s8 }
  0x67   : > { %p2654_p3 = pnand %p2652_p2, %p2612_p1 }
  0x69   : > { %p2655_p5 = pneg %p2654_p3 }
  0x6b   : > { %p2660_p7 = pnand %p2658_p6, %p2655_p5 }
  0x6d   : > { %2663 = shalt.err (!%p2660_p7)
}
  0x6e   : > { %s2790_s2 = smov [#allocation12]   ;;  %p3697_p9 = scmp.ne.s32.totalorder %s3691_s21, 0 }
  0x6f   : > { %2492 = dma.hbm_to_smem (!%p2973_p13), %s3696_s8, 16, %s2790_s2, [#allocation13]  }
  0x70   : > { %613 = sbr.rel (%p3697_p9) target bundleno = 2589 (0xa1d), region = 96 }
  0x77   : > { %p3698_p12 = scmp.ne.s32.totalorder %s3692_s1, 0 }
  0x79   : > { %2745 = dma.done.wait (%p3698_p12), [#allocation8], 64  }
  0x7a   : > { %2747 = vsyncadd (%p3698_p12), [#allocation8], 4294967232 }
  0x7b   : > { %2749 = dma.done.wait (%p3698_p12), [#allocation10], 64  }
  0x7c   : > { %2751 = vsyncadd (%p3698_p12), [#allocation10], 4294967232 }
  0x7d   : > { %2753 = dma.done.wait (%p3698_p12), [#allocation13], 16  }
  0x7e   : > { %2755 = vsyncadd (%p3698_p12), [#allocation13], 4294967280 }
  0x7f   : > { %627 = sfence }
  0x80   : > { %p684_p13 = scmp.lt.s32.totalorder %s2778_s24, 1  ;;  %vm696_vm0 = vcmask 261120   ;;  %s3699_s25 = sld [smem:[#allocation36_spill]]  ;;  %v2791_v8 = vmov 0.0   ;;  %vm2792_vm1 = vmmov 0   ;;  %vm726_vm2 = vcmask 257024  }
  0x81   : > { %s3701_s26 = sld [smem:[#allocation40_spill]]  ;;  %2359 = vmatprep.subr.bf16.mxu0 %v2791_v8  ;;  %2363 = vmatprep.mubr.msk.bf16.mxu0 %vm2792_vm1, %v2791_v8  ;;  %s3702_s29 = sld [smem:[#allocation37_spill]]  ;;  %v917_v28 = vlaneseq  ;;  %v915_v39 = vld [vmem:[#allocation7] sm:$0xf]  ;;  %vm1264_vm3 = vcmask 1043456   ;;  %vm969_vm4 = vcmask 64512  }
  0x82   : > { %s685_s6 = scalar_select %p684_p13, %s2778_s24, 1  ;;  %2383 = vmatprep.subr.bf16.mxu1 %v2791_v8  ;;  %2385 = vmatprep.mubr.msk.bf16.mxu1 %vm2792_vm1, %v2791_v8  ;;  %vm982_vm5 = vcmask 60416   ;;  %vm1456_vm6 = vcmask 126016   ;;  %vm1604_vm7 = vcmask 191616   ;;  %vm1752_vm8 = vcmask 257216  }
  0x83   : > { %s3703_s21 = sld [smem:[#allocation38_spill]]  ;;  %s3704_s5 = sld [smem:[#allocation41_spill]]  ;;  %v918_v31 = vshrl.u32 %v917_v28, 7 }
  0x84   : > { %s2245_s27 = sshll.u32 %s685_s6, 3  ;;  %s3705_s2 = sld [smem:[#allocation39_spill]] }
  0x85   : > { %v919_v35 = vsub.s32 0, %v918_v31  ;;  %v986_v36 = vsub.s32 1, %v918_v31  ;;  %v1049_v44 = vsub.s32 2, %v918_v31  ;;  %v1112_v45 = vsub.s32 3, %v918_v31  ;;  %s2795_s0 = smov 120   ;;  %s2261_s28 = sld [smem:[#allocation11 + $0x1]] }
  0x86   : > { %s3052_s30 = scalar_lea.vmem %s3699_s25, %s2245_s27  ;;  %s2793_s27 = smov 112  }
  0x87   : > { %3700 = sst [smem:[#allocation32_spill]] %s3052_s30  ;;  %v693_v0 = vld [vmem:[%s3052_s30] sm:$0xff]  ;;  %v2567_v9 = vld [vmem:[%s3701_s26 + $0x8] sm:$0xff]   ;;  %v920_v42 = vrot.slane %v915_v39, %v919_v35  ;;  %v987_v43 = vrot.slane %v915_v39, %v986_v36  ;;  %v1050_v53 = vrot.slane %v915_v39, %v1049_v44  ;;  %v1113_v54 = vrot.slane %v915_v39, %v1112_v45  ;;  %s1174_s25 = sld [smem:[#allocation11]] }
  0x88   : > { %v697_v1 = vsel %vm696_vm0, %v693_v0, 0.0  ;;  %v2566_v7 = vld [vmem:[%s3701_s26] sm:$0xff]   ;;  %s3144_s23 = sld [smem:[#allocation11 + $0x2]]  ;;  %s3154_s26 = sld [smem:[#allocation12]] }
  0x89   : > { %698 = vadd.xlane.f32.xlu0 %v697_v1  ;;  %2360 = vmatpush3.bf16.msra.mxu0 %v2566_v7  ;;  %v2246_v14 = vld [vmem:[%s3702_s29] ss:$0 sm:$0xff]  ;;  %v2569_v21 = vld [vmem:[%s3704_s5 + $0x8] sm:$0xff]   ;;  %s3159_s18 = sld [smem:[#allocation11 + $0x81]] }
  0x8a   : > { %2361 = vmatprep.subr.bf16.mxu0 %v2791_v8  ;;  %v2247_v16 = vld [vmem:[%s3703_s21] ss:$0 sm:$0xff]  ;;  %s3706_s29 = smov %s3705_s2  ;;  %s2794_s21 = smov 104  }
  0x8b   : > { %v2568_v19 = vld [vmem:[%s3704_s5] sm:$0xff]   ;;  %v2571_v23 = vld [vmem:[%s3706_s29 + $0x8] sm:$0xff]   ;;  %s1194_s6 = sshrl.u32 %s2261_s28, 16  ;;  %s3146_s5 = sld [smem:[#allocation11 + $0x3]] }
  0x8c   : > { %v2570_v22 = vld [vmem:[%s3705_s2] sm:$0xff]   ;;  %s1195_s7 = sand.u32 1, %s1194_s6  ;;  %p1193_p0 = scmp.ne.f32.partialorder %s2261_s28, %s2261_s28 }
  0x8d   : > { %2362 = vmatpush3.bf16.msra.mxu0 %v2567_v9  ;;  %s1177_s1 = sshrl.u32 %s1174_s25, 16  ;;  %p1176_p1 = scmp.ne.f32.partialorder %s1174_s25, %s1174_s25 }
  0x8e   : > { %2367 = vmatprep.subr.bf16.mxu0 %v2791_v8  ;;  %s1178_s20 = sand.u32 1, %s1177_s1  ;;  %p1211_p4 = scmp.ne.f32.partialorder %s3144_s23, %s3144_s23 }
  0x8f   : > { %s1179_s3 = sadd.s32 32767, %s1178_s20  ;;  %p1246_p10 = scmp.ne.f32.partialorder %s3154_s26, %s3154_s26 }
  0x90   : > { %s1180_s2 = sadd.s32 %s1179_s3, %s1174_s25  ;;  %s3152_s3 = sld [smem:[#allocation11 + $0x80]] }
  0x91   : > { %s1230_s1 = sshrl.u32 %s3146_s5, 16  ;;  %p1229_p8 = scmp.ne.f32.partialorder %s3146_s5, %s3146_s5 }
  0x92   : > { %s1231_s25 = sand.u32 1, %s1230_s1  ;;  %s3193_s14 = sld [smem:[#allocation12 + $0x1]] }
  0x93   : > { %s1232_s29 = sadd.s32 32767, %s1231_s25  ;;  %p1330_p2 = scmp.ne.f32.partialorder %s3159_s18, %s3159_s18 }
  0x94   : > { %s3203_s15 = sld [smem:[#allocation11 + $0x181]] }
  0x96   : > { %s1314_s16 = sshrl.u32 %s3152_s3, 16  ;;  %p1313_p11 = scmp.ne.f32.partialorder %s3152_s3, %s3152_s3 }
  0x97   : > { %s1315_s1 = sand.u32 1, %s1314_s16 }
  0x98   : > { %s1316_s25 = sadd.s32 32767, %s1315_s1  ;;  %p1383_p6 = scmp.ne.f32.partialorder %s3193_s14, %s3193_s14 }
  0x99   : > { %s1317_s16 = sadd.s32 %s3152_s3, %s1316_s25 }
  0x9a   : > { %s1318_s1 = sand.u32 4294901760, %s1317_s16 }
  0x9b   : > { %s3755_s1 = smov (%p1313_p11, %s1318_s1), 2143289344 }
 0x116   : > { %v699_v2 = vpop.xlane.xlu0 %698 }
 0x117   : > { %v701_v3 = vmul.f32 0.03125, %v699_v2 }
 0x119   : > { %v702_v4 = vsub.f32 %v693_v0, %v701_v3 }
 0x11b   : > { %v703_v5 = vmul.f32 %v702_v4, %v702_v4 }
 0x11d   : > { %v704_v6 = vsel %vm696_vm0, %v703_v5, 0.0 }
 0x11e   : > { %705 = vadd.xlane.f32.xlu0 %v704_v6 }
 0x1ab   : > { %v706_v10 = vpop.xlane.xlu0 %705 }
 0x1ac   : > { %v707_v11 = vmul.f32 0.03125, %v706_v10 }
 0x1ae   : > { %v708_v12 = vadd.f32 1e-05, %v707_v11 }
 0x1b0   : > { %2587 = vrsqrt.f32 %v708_v12 }
 0x1ba   : > { %v2588_v13 = vpop.eup %2587 }
 0x1bb   : > { %v710_v15 = vmul.f32 %v2588_v13, %v702_v4 }
 0x1bd   : > { %v717_v17 = vmul.f32 %v2246_v14, %v710_v15 }
 0x1bf   : > { %v724_v18 = vadd.f32 %v2247_v16, %v717_v17 }
 0x1c1   : > { %v725_v20 = vpack.c.bf16 %v724_v18, %v724_v18 }
 0x1c3   : > { %727 = vst.msk [vmem:[#allocation2] sm:$0xf] %vm726_vm2, %v725_v20  ;;  %2364 = vmatmul.mubr.msk.bf16.vlgmr.msra.gmra.mrb[0].mxu0 %vm696_vm0, %v725_v20 }
 0x1c4   : > { %2368 = vmatpush3.bf16.msra.mxu0 %v2568_v19  ;;  %2371 = vmatprep.mubr.msk.bf16.mxu0 %vm2792_vm1, %v2791_v8 }
 0x1c5   : > { %2369 = vmatprep.subr.bf16.mxu0 %v2791_v8 }
 0x1c8   : > { %2370 = vmatpush3.bf16.msra.mxu0 %v2569_v21 }
 0x1c9   : > { %2375 = vmatprep.subr.bf16.mxu0 %v2791_v8 }
 0x1ca   : > { %v854_v24 = vld [vmem:[#allocation2] sm:$0xf] }
 0x1cb   : > { %2372 = vmatmul.mubr.msk.bf16.vlgmr.msra.gmra.mrb[4].mxu0 %vm696_vm0, %v725_v20 }
 0x1cc   : > { %2376 = vmatpush3.bf16.msra.mxu0 %v2570_v22  ;;  %2379 = vmatprep.mubr.msk.bf16.mxu0 %vm2792_vm1, %v2791_v8 }
 0x1cd   : > { %2377 = vmatprep.subr.bf16.mxu0 %v2791_v8 }
 0x1d0   : > { %2378 = vmatpush3.bf16.msra.mxu0 %v2571_v23 }
 0x1d1   : > { %2389 = vmatprep.subr.bf16.mxu0 %v2791_v8 }
 0x1d3   : > { %2380 = vmatmul.mubr.msk.bf16.vlgmr.msra.gmra.mrb[8].mxu0 %vm696_vm0, %v854_v24 }
 0x1d4   : > { %2391 = vmatprep.mubr.msk.bf16.mxu0 %vm2792_vm1, %v2791_v8 }
 0x296   : > { %v781_v25 = vpop.f32.mrb[0].mxu0 }
 0x297   : > { %v787_v26 = vpack.c.bf16 %v781_v25, %v781_v25  ;;  %v2365_v27 = vpop.f32.mrb[1].mxu0 }
 0x298   : > { %v784_v29 = vpop.f32.mrb[2].mxu0 }
 0x299   : > { %788 = vst.msk [vmem:[#allocation3] sm:$0xf] %vm726_vm2, %v787_v26  ;;  %v2366_v30 = vpop.f32.mrb[3].mxu0 }
 0x29e   : > { %v839_v32 = vpop.f32.mrb[4].mxu0 }
 0x29f   : > { %v845_v33 = vpack.c.bf16 %v839_v32, %v839_v32  ;;  %v2373_v34 = vpop.f32.mrb[5].mxu0 }
 0x2a0   : > { %v842_v37 = vpop.f32.mrb[6].mxu0  ;;  %v916_v38 = vld [vmem:[#allocation3] sm:$0xf] }
 0x2a1   : > { %846 = vst.msk [vmem:[#allocation4] sm:$0xf] %vm726_vm2, %v845_v33  ;;  %v2374_v40 = vpop.f32.mrb[7].mxu0  ;;  %v927_v41 = vsel %vm696_vm0, %v916_v38, 0 }
 0x2a2   : > { %2384 = vmatpush3.bf16.xpose.msra.mxu1 %v927_v41  ;;  %2390 = vmatpush3.bf16.xpose.msra.mxu0 %v927_v41 }
 0x2a3   : > { %2395 = vmatprep.subr.bf16.mxu1 %v2791_v8  ;;  %2401 = vmatprep.subr.bf16.mxu0 %v2791_v8 }
 0x2a6   : > { %v909_v46 = vpop.f32.mrb[8].mxu0 }
 0x2a7   : > { %v921_v47 = vmul.f32 %v920_v42, %v909_v46  ;;  %v988_v48 = vmul.f32 %v987_v43, %v909_v46  ;;  %v2381_v49 = vpop.f32.mrb[9].mxu0  ;;  %v1051_v56 = vmul.f32 %v1050_v53, %v909_v46  ;;  %v1114_v57 = vmul.f32 %v1113_v54, %v909_v46 }
 0x2a8   : > { %v912_v50 = vpop.f32.mrb[10].mxu0  ;;  %v1260_v58 = vld [vmem:[#allocation4] sm:$0xf] }
 0x2a9   : > { %v922_v51 = vpack.c.bf16 %v921_v47, %v921_v47  ;;  %v989_v52 = vpack.c.bf16 %v988_v48, %v988_v48  ;;  %v2382_v55 = vpop.f32.mrb[11].mxu0  ;;  %v1052_v59 = vpack.c.bf16 %v1051_v56, %v1051_v56  ;;  %v1115_v60 = vpack.c.bf16 %v1114_v57, %v1114_v57  ;;  %v2572_v39 = vld [vmem:[#allocation4] ss:$0 sps:$4 sm:$0xff]  }
 0x2aa   : > { %v1266_v61 = vsel %vm1264_vm3, %v1260_v58, 0  ;;  %v2573_v40 = vld [vmem:[#allocation4] ss:$0 sps:$4 sm:$0xff]  }
 0x2ab   : > { %2386 = vmatmul.mubr.msk.bf16.vlgmr.msra.gmra.mrb[0].mxu1 %vm696_vm0, %v922_v51  ;;  %2392 = vmatmul.mubr.msk.bf16.vlgmr.msra.gmra.mrb[12].mxu0 %vm696_vm0, %v989_v52 }
 0x2ac   : > { %2396 = vmatpush3.bf16.xpose.msra.mxu1 %v927_v41  ;;  %2402 = vmatpush3.bf16.xpose.msra.mxu0 %v927_v41  ;;  %v2574_v41 = vld [vmem:[#allocation4] ss:$0 sps:$4 sm:$0xff]  }
 0x2ad   : > { %2397 = vmatprep.mubr.msk.bf16.mxu1 %vm2792_vm1, %v2791_v8  ;;  %2403 = vmatprep.mubr.msk.bf16.mxu0 %vm2792_vm1, %v2791_v8 }
 0x2ae   : > { %2407 = vmatprep.subr.bf16.mxu1 %v2791_v8  ;;  %2413 = vmatprep.subr.bf16.mxu0 %v2791_v8 }
 0x2b3   : > { %2398 = vmatmul.mubr.msk.bf16.vlgmr.msra.gmra.mrb[4].mxu1 %vm696_vm0, %v1052_v59  ;;  %2404 = vmatmul.mubr.msk.bf16.vlgmr.msra.gmra.mrb[16].mxu0 %vm696_vm0, %v1115_v60 }
 0x2b4   : > { %2408 = vmatpush3.bf16.msra.mxu1 %v1266_v61  ;;  %2409 = vmatprep.mubr.msk.bf16.mxu1 %vm2792_vm1, %v2791_v8 }
 0x2b5   : > { %2415 = vmatprep.mubr.msk.bf16.mxu0 %vm2792_vm1, %v2791_v8  ;;  %2419 = vmatprep.subr.bf16.mxu1 %v2791_v8 }
 0x37e   : > { %v963_v62 = vpop.f32.mrb[0].mxu1  ;;  %v1027_v63 = vpop.f32.mrb[12].mxu0 }
 0x37f   : > { %v2387_v0 = vpop.f32.mrb[1].mxu1  ;;  %v2393_v1 = vpop.f32.mrb[13].mxu0  ;;  %v970_v2 = vsel %vm969_vm4, %v963_v62, -inf  ;;  %v1033_v7 = vsel %vm969_vm4, %v1027_v63, -inf }
 0x380   : > { %971 = vmax.xlane.f32.xlu1 %v970_v2  ;;  %v966_v3 = vpop.f32.mrb[2].mxu1  ;;  %v1030_v4 = vpop.f32.mrb[14].mxu0 }
 0x381   : > { %v2388_v5 = vpop.f32.mrb[3].mxu1  ;;  %v2394_v6 = vpop.f32.mrb[15].mxu0 }
 0x384   : > { %1034 = vmax.xlane.f32.xlu1 %v1033_v7 }
 0x386   : > { %v1090_v9 = vpop.f32.mrb[4].mxu1  ;;  %v1153_v10 = vpop.f32.mrb[16].mxu0 }
 0x387   : > { %v2399_v11 = vpop.f32.mrb[5].mxu1  ;;  %v2405_v12 = vpop.f32.mrb[17].mxu0  ;;  %v1096_v13 = vsel %vm969_vm4, %v1090_v9, -inf  ;;  %v1159_v14 = vsel %vm969_vm4, %v1153_v10, -inf }
 0x388   : > { %1097 = vmax.xlane.f32.xlu0 %v1096_v13  ;;  %v1093_v15 = vpop.f32.mrb[6].mxu1  ;;  %1160 = vmax.xlane.f32.xlu1 %v1159_v14  ;;  %v1156_v16 = vpop.f32.mrb[18].mxu0 }
 0x389   : > { %v2400_v17 = vpop.f32.mrb[7].mxu1  ;;  %v2406_v18 = vpop.f32.mrb[19].mxu0 }
 0x40d   : > { %v972_v19 = vpop.xlane.xlu1 %971 }
 0x40e   : > { %v973_v20 = vsub.f32 %v963_v62, %v972_v19 }
 0x410   : > { %v974_v21 = vmul.f32 1.442695, %v973_v20 }
 0x411   : > { %v1035_v22 = vpop.xlane.xlu1 %1034 }
 0x412   : > { %2589 = vpow2.f32 %v974_v21  ;;  %v1036_v23 = vsub.f32 %v1027_v63, %v1035_v22 }
 0x414   : > { %v1037_v24 = vmul.f32 1.442695, %v1036_v23 }
 0x415   : > { %v1098_v25 = vpop.xlane.xlu0 %1097  ;;  %v1161_v26 = vpop.xlane.xlu1 %1160 }
 0x416   : > { %2591 = vpow2.f32 %v1037_v24  ;;  %v1099_v27 = vsub.f32 %v1090_v9, %v1098_v25  ;;  %v1162_v28 = vsub.f32 %v1153_v10, %v1161_v26 }
 0x418   : > { %v1100_v29 = vmul.f32 1.442695, %v1099_v27  ;;  %v1163_v30 = vmul.f32 1.442695, %v1162_v28 }
 0x41a   : > { %2593 = vpow2.f32 %v1100_v29 }
 0x41b   : > { %2595 = vpow2.f32 %v1163_v30 }
 0x41c   : > { %v3128_v31 = vpop.eup %2589 }
 0x41d   : > { %v976_v32 = vsel %vm969_vm4, %v3128_v31, 0.0 }
 0x41e   : > { %977 = vadd.xlane.f32.xlu0 %v976_v32 }
 0x420   : > { %v3132_v33 = vpop.eup %2591 }
 0x421   : > { %v1039_v34 = vsel %vm969_vm4, %v3132_v33, 0.0 }
 0x422   : > { %1040 = vadd.xlane.f32.xlu1 %v1039_v34 }
 0x424   : > { %v3136_v35 = vpop.eup %2593 }
 0x425   : > { %v3138_v36 = vpop.eup %2595  ;;  %v1102_v37 = vsel %vm969_vm4, %v3136_v35, 0.0 }
 0x426   : > { %1103 = vadd.xlane.f32.xlu0 %v1102_v37  ;;  %v1165_v38 = vsel %vm969_vm4, %v3138_v36, 0.0 }
 0x427   : > { %1166 = vadd.xlane.f32.xlu1 %v1165_v38 }
 0x438   : > { %1549 = vrot.lane.b32.xlu1 %v2572_v39, %s2793_s27  ;;  %s1181_s27 = sand.u32 4294901760, %s1180_s2 }
 0x439   : > { %s3745_s27 = smov (%p1176_p1, %s1181_s27), 2143289344 }
 0x43a   : > { %s1184_s4 = sshrl.u32 %s3745_s27, 16  ;;  %s3197_s27 = sld [smem:[#allocation11 + $0x180]] }
 0x43c   : > { %1697 = vrot.lane.b32.xlu1 %v2573_v40, %s2794_s21  ;;  %1401 = vrot.lane.b32.xlu0 %v2574_v41, %s2795_s0  ;;  %s1196_s21 = sadd.s32 32767, %s1195_s7  ;;  %s1212_s0 = sshrl.u32 %s3144_s23, 16 }
 0x43d   : > { %s1197_s20 = sadd.s32 %s2261_s28, %s1196_s21  ;;  %s1213_s8 = sand.u32 1, %s1212_s0 }
 0x43e   : > { %s1198_s2 = sand.u32 4294901760, %s1197_s20  ;;  %s1214_s6 = sadd.s32 32767, %s1213_s8 }
 0x43f   : > { %s3747_s2 = smov (%p1193_p0, %s1198_s2), 2143289344  ;;  %s1215_s7 = sadd.s32 %s3144_s23, %s1214_s6 }
 0x440   : > { %s1233_s21 = sadd.s32 %s3146_s5, %s1232_s29  ;;  %s1247_s0 = sshrl.u32 %s3154_s26, 16 }
 0x441   : > { %s1216_s19 = sand.u32 4294901760, %s1215_s7  ;;  %s1234_s28 = sand.u32 4294901760, %s1233_s21 }
 0x442   : > { %s1248_s8 = sand.u32 1, %s1247_s0  ;;  %s3749_s19 = smov (%p1211_p4, %s1216_s19), 2143289344 }
 0x443   : > { %s3751_s28 = smov (%p1229_p8, %s1234_s28), 2143289344  ;;  %s1249_s20 = sadd.s32 32767, %s1248_s8 }
 0x444   : > { %s1331_s29 = sshrl.u32 %s3159_s18, 16  ;;  %s3173_s23 = sld [smem:[#allocation11 + $0x82]] }
 0x445   : > { %s1250_s6 = sadd.s32 %s1249_s20, %s3154_s26  ;;  %s1332_s7 = sand.u32 1, %s1331_s29 }
 0x446   : > { %s3176_s5 = sld [smem:[#allocation11 + $0x83]]  ;;  %s1251_s21 = sand.u32 4294901760, %s1250_s6 }
 0x447   : > { %s3181_s0 = sld [smem:[#allocation11 + $0x100]]  ;;  %s1333_s8 = sadd.s32 32767, %s1332_s7 }
 0x448   : > { %s3753_s21 = smov (%p1246_p10, %s1251_s21), 2143289344  ;;  %s1334_s24 = sadd.s32 %s3159_s18, %s1333_s8 }
 0x449   : > { %3707 = sst [smem:[#allocation33_spill]] %s3753_s21  ;;  %s1335_s3 = sand.u32 4294901760, %s1334_s24 }
 0x44a   : > { %s1349_s20 = sshrl.u32 %s3173_s23, 16  ;;  %s3199_s6 = sld [smem:[#allocation11 + $0x101]] }
 0x44b   : > { %s1350_s26 = sand.u32 1, %s1349_s20  ;;  %s1185_s7 = sshll.u32 %s1184_s4, 16 }
 0x44c   : > { %s1367_s29 = sshrl.u32 %s3176_s5, 16  ;;  %s1351_s16 = sadd.s32 32767, %s1350_s26 }
 0x44d   : > { %s1368_s25 = sand.u32 1, %s1367_s29  ;;  %s3757_s3 = smov (%p1330_p2, %s1335_s3), 2143289344 }
 0x44e   : > { %s1369_s8 = sadd.s32 32767, %s1368_s25  ;;  %s1352_s12 = sadd.s32 %s3173_s23, %s1351_s16 }
 0x44f   : > { %s1462_s18 = sshrl.u32 %s3181_s0, 16  ;;  %s3207_s20 = sor.u32 %s1185_s7, %s1184_s4 }
 0x450   : > { %3708 = sst [smem:[#allocation34_spill]] %s3207_s20  ;;  %s1384_s24 = sshrl.u32 %s3193_s14, 16 }
 0x451   : > { %p1348_p3 = scmp.ne.f32.partialorder %s3173_s23, %s3173_s23  ;;  %s1370_s29 = sadd.s32 %s3176_s5, %s1369_s8 }
 0x452   : > { %s1353_s11 = sand.u32 4294901760, %s1352_s12  ;;  %s1463_s26 = sand.u32 1, %s1462_s18 }
 0x453   : > { %p1366_p5 = scmp.ne.f32.partialorder %s3176_s5, %s3176_s5  ;;  %s1385_s25 = sand.u32 1, %s1384_s24 }
 0x454   : > { %s1201_s13 = sshrl.u32 %s3747_s2, 16  ;;  %s1371_s16 = sand.u32 4294901760, %s1370_s29 }
 0x455   : > { %s3759_s11 = smov (%p1348_p3, %s1353_s11), 2143289344  ;;  %s1386_s17 = sadd.s32 32767, %s1385_s25 }
 0x456   : > { %s1464_s4 = sadd.s32 32767, %s1463_s26  ;;  %s3761_s16 = smov (%p1366_p5, %s1371_s16), 2143289344 }
 0x457   : > { %s1219_s7 = sshrl.u32 %s3749_s19, 16  ;;  %s1479_s10 = sshrl.u32 %s3199_s6, 16 }
 0x458   : > { %s1387_s12 = sadd.s32 %s3193_s14, %s1386_s17  ;;  %s1465_s23 = sadd.s32 %s3181_s0, %s1464_s4 }
 0x459   : > { %s3226_s5 = sld [smem:[#allocation11 + $0x102]]  ;;  %s1480_s2 = sand.u32 1, %s1479_s10 }
 0x45a   : > { %s3228_s8 = sld [smem:[#allocation11 + $0x103]]  ;;  %s1388_s18 = sand.u32 4294901760, %s1387_s12 }
 0x45b   : > { %p1461_p7 = scmp.ne.f32.partialorder %s3181_s0, %s3181_s0  ;;  %s1202_s24 = sshll.u32 %s1201_s13, 16 }
 0x45c   : > { %s1466_s19 = sand.u32 4294901760, %s1465_s23  ;;  %s1220_s29 = sshll.u32 %s1219_s7, 16 }
 0x45d   : > { %s1481_s26 = sadd.s32 32767, %s1480_s2  ;;  %s3763_s18 = smov (%p1383_p6, %s1388_s18), 2143289344 }
 0x45e   : > { %s3765_s19 = smov (%p1461_p7, %s1466_s19), 2143289344  ;;  %s1237_s14 = sshrl.u32 %s3751_s28, 16 }
 0x45f   : > { %s1482_s17 = sadd.s32 %s3199_s6, %s1481_s26  ;;  %s1497_s25 = sshrl.u32 %s3226_s5, 16 }
 0x460   : > { %s3239_s10 = sld [smem:[#allocation12 + $0x2]]  ;;  %p1478_p9 = scmp.ne.f32.partialorder %s3199_s6, %s3199_s6 }
 0x461   : > { %s1515_s0 = sshrl.u32 %s3228_s8, 16  ;;  %s3244_s4 = sor.u32 %s1202_s24, %s1201_s13 }
 0x462   : > { %s1483_s12 = sand.u32 4294901760, %s1482_s17  ;;  %s3246_s23 = sor.u32 %s1220_s29, %s1219_s7  ;;  %v1204_v60 = vstv %s3244_s4 }
 0x463   : > { %s1498_s2 = sand.u32 1, %s1497_s25  ;;  %s1238_s30 = sshll.u32 %s1237_s14, 16  ;;  %v1222_v11 = vstv %s3246_s23 }
 0x464   : > { %s1516_s28 = sand.u32 1, %s1515_s0  ;;  %s3767_s12 = smov (%p1478_p9, %s1483_s12), 2143289344 }
 0x465   : > { %s3656_s26 = sshrl.u32 %s3753_s21, 16  ;;  %s1499_s22 = sadd.s32 32767, %s1498_s2 }
 0x466   : > { %s1321_s6 = sshrl.u32 %s3755_s1, 16  ;;  %s1517_s9 = sadd.s32 32767, %s1516_s28 }
 0x467   : > { %s3252_s20 = sor.u32 %s1238_s30, %s1237_s14  ;;  %s1532_s13 = sshrl.u32 %s3239_s10, 16 }
 0x468   : > { %s3257_s24 = sshll.u32 %s3656_s26, 16  ;;  %s1500_s7 = sadd.s32 %s3226_s5, %s1499_s22  ;;  %v1240_v12 = vstv %s3252_s20 }
 0x469   : > { %3709 = sst [smem:[#allocation35_spill]] %s3257_s24  ;;  %s1322_s29 = sshll.u32 %s1321_s6, 16 }
 0x46a   : > { %s1518_s17 = sadd.s32 %s3228_s8, %s1517_s9  ;;  %p1496_p12 = scmp.ne.f32.partialorder %s3226_s5, %s3226_s5 }
 0x46b   : > { %s1533_s25 = sand.u32 1, %s1532_s13  ;;  %s1501_s0 = sand.u32 4294901760, %s1500_s7 }
 0x46c   : > { %p1514_p13 = scmp.ne.f32.partialorder %s3228_s8, %s3228_s8  ;;  %s1338_s1 = sshrl.u32 %s3757_s3, 16 }
 0x46d   : > { %s1519_s30 = sand.u32 4294901760, %s1518_s17  ;;  %s1534_s14 = sadd.s32 32767, %s1533_s25 }
 0x46e   : > { %s1610_s2 = sshrl.u32 %s3197_s27, 16  ;;  %s3769_s0 = smov (%p1496_p12, %s1501_s0), 2143289344 }
 0x46f   : > { %s3771_s30 = smov (%p1514_p13, %s1519_s30), 2143289344  ;;  %s1339_s22 = sshll.u32 %s1338_s1, 16 }
 0x470   : > { %s1535_s28 = sadd.s32 %s3239_s10, %s1534_s14  ;;  %s1611_s9 = sand.u32 1, %s1610_s2 }
 0x471   : > { %s3272_s26 = sld [smem:[#allocation11 + $0x182]]  ;;  %p1531_p1 = scmp.ne.f32.partialorder %s3239_s10, %s3239_s10 }
 0x472   : > { %s1627_s5 = sshrl.u32 %s3203_s15, 16  ;;  %s3277_s8 = sor.u32 %s1322_s29, %s1321_s6 }
 0x473   : > { %s1536_s3 = sand.u32 4294901760, %s1535_s28  ;;  %s1356_s13 = sshrl.u32 %s3759_s11, 16  ;;  %v1324_v2 = vstv %s3277_s8 }
 0x474   : > { %s1612_s7 = sadd.s32 32767, %s1611_s9  ;;  %s3280_s17 = sor.u32 %s1339_s22, %s1338_s1 }
 0x475   : > { %s1628_s25 = sand.u32 1, %s1627_s5  ;;  %s3773_s3 = smov (%p1531_p1, %s1536_s3), 2143289344  ;;  %v1341_v61 = vstv %s3280_s17 }
 0x476   : > { %s1357_s14 = sshll.u32 %s1356_s13, 16  ;;  %s1613_s2 = sadd.s32 %s3197_s27, %s1612_s7 }
 0x477   : > { %s1629_s24 = sadd.s32 32767, %s1628_s25  ;;  %s3285_s21 = sld [smem:[#allocation11 + $0x183]] }
 0x478   : > { %p1609_p0 = scmp.ne.f32.partialorder %s3197_s27, %s3197_s27  ;;  %s1645_s10 = sshrl.u32 %s3272_s26, 16 }
 0x479   : > { %s3290_s11 = sor.u32 %s1357_s14, %s1356_s13  ;;  %s1614_s6 = sand.u32 4294901760, %s1613_s2 }
 0x47a   : > { %s1374_s29 = sshrl.u32 %s3761_s16, 16  ;;  %s1630_s1 = sadd.s32 %s3203_s15, %s1629_s24  ;;  %v1359_v13 = vstv %s3290_s11 }
 0x47b   : > { %p1626_p4 = scmp.ne.f32.partialorder %s3203_s15, %s3203_s15  ;;  %s1646_s22 = sand.u32 1, %s1645_s10 }
 0x47c   : > { %s3775_s6 = smov (%p1609_p0, %s1614_s6), 2143289344  ;;  %s1375_s28 = sshll.u32 %s1374_s29, 16 }
 0x47d   : > { %s1631_s27 = sand.u32 4294901760, %s1630_s1  ;;  %s1647_s9 = sadd.s32 32767, %s1646_s22 }
 0x47e   : > { %s3298_s5 = sld [smem:[#allocation12 + $0x3]]  ;;  %s1469_s13 = sshrl.u32 %s3765_s19, 16 }
 0x47f   : > { %s1663_s7 = sshrl.u32 %s3285_s21, 16  ;;  %s3777_s27 = smov (%p1626_p4, %s1631_s27), 2143289344 }
 0x480   : > { %s3304_s15 = sor.u32 %s1375_s28, %s1374_s29  ;;  %s1648_s16 = sadd.s32 %s3272_s26, %s1647_s9 }
 0x481   : > { %s1470_s24 = sshll.u32 %s1469_s13, 16  ;;  %s1664_s25 = sand.u32 1, %s1663_s7  ;;  %v1377_v24 = vstv %s3304_s15 }
 0x482   : > { %s1486_s14 = sshrl.u32 %s3767_s12, 16  ;;  %p1644_p8 = scmp.ne.f32.partialorder %s3272_s26, %s3272_s26 }
 0x483   : > { %s1391_s19 = sshrl.u32 %s3763_s18, 16  ;;  %s1649_s2 = sand.u32 4294901760, %s1648_s16 }
 0x484   : > { %s3313_s10 = sor.u32 %s1470_s24, %s1469_s13  ;;  %s1665_s29 = sadd.s32 32767, %s1664_s25 }
 0x485   : > { %s1487_s12 = sshll.u32 %s1486_s14, 16  ;;  %s1680_s1 = sshrl.u32 %s3298_s5, 16  ;;  %v1472_v14 = vstv %s3313_s10 }
 0x486   : > { %s3779_s2 = smov (%p1644_p8, %s1649_s2), 2143289344  ;;  %s1504_s22 = sshrl.u32 %s3769_s0, 16 }
 0x487   : > { %s1666_s28 = sadd.s32 %s3285_s21, %s1665_s29  ;;  %s3326_s9 = sor.u32 %s1487_s12, %s1486_s14 }
 0x488   : > { %s1681_s13 = sand.u32 1, %s1680_s1  ;;  %s1634_s7 = sshrl.u32 %s3777_s27, 16  ;;  %v1489_v7 = vstv %s3326_s9 }
 0x489   : > { %p1662_p10 = scmp.ne.f32.partialorder %s3285_s21, %s3285_s21  ;;  %s3333_s26 = sshll.u32 %s1504_s22, 16 }
 0x48a   : > { %s1667_s16 = sand.u32 4294901760, %s1666_s28  ;;  %s1617_s24 = sshrl.u32 %s3775_s6, 16 }
 0x48b   : > { %s1682_s25 = sadd.s32 32767, %s1681_s13  ;;  %s1635_s21 = sshll.u32 %s1634_s7, 16 }
 0x48c   : > { %s1652_s27 = sshrl.u32 %s3779_s2, 16  ;;  %s3710_s14 = sld [smem:[#allocation34_spill]] }
 0x48d   : > { %s3781_s16 = smov (%p1662_p10, %s1667_s16), 2143289344  ;;  %s1522_s29 = sshrl.u32 %s3771_s30, 16 }
 0x48e   : > { %s3344_s12 = sadd.s32 %s3298_s5, %s1682_s25  ;;  %s1618_s6 = sshll.u32 %s1617_s24, 16 }
 0x48f   : > { %s3347_s1 = sor.u32 %s1635_s21, %s1634_s7  ;;  %s1653_s28 = sshll.u32 %s1652_s27, 16 }
 0x490   : > { %p1679_p11 = scmp.ne.f32.partialorder %s3298_s5, %s3298_s5  ;;  %s1670_s13 = sshrl.u32 %s3781_s16, 16  ;;  %v1637_v10 = vstv %s3347_s1 }
 0x491   : > { %s1684_s25 = sand.u32 4294901760, %s3344_s12  ;;  %s3363_s4 = sor.u32 %s3333_s26, %s1504_s22 }
 0x492   : > { %v1187_v63 = vstv %s3710_s14  ;;  %s3365_s17 = sor.u32 %s1618_s6, %s1617_s24  ;;  %s3369_s7 = sshll.u32 %s1391_s19, 16  ;;  %v1507_v18 = vstv %s3363_s4 }
 0x493   : > { %s3375_s0 = sor.u32 %s1653_s28, %s1652_s27  ;;  %s1523_s8 = sshll.u32 %s1522_s29, 16  ;;  %v1620_v20 = vstv %s3365_s17 }
 0x494   : > { %s3385_s22 = sshll.u32 %s1670_s13, 16  ;;  %s3711_s9 = sld [smem:[#allocation33_spill]]  ;;  %v1655_v28 = vstv %s3375_s0 }
 0x495   : > { %s3712_s26 = sld [smem:[#allocation35_spill]]  ;;  %s3783_s25 = smov (%p1679_p11, %s1684_s25), 2143289344 }
 0x496   : > { %s1393_s11 = sor.u32 %s3369_s7, %s1391_s19  ;;  %s3406_s5 = sor.u32 %s1523_s8, %s1522_s29 }
 0x497   : > { %s1539_s15 = sshrl.u32 %s3773_s3, 16  ;;  %s1672_s2 = sor.u32 %s3385_s22, %s1670_s13 }
 0x498   : > { %s1687_s10 = sshrl.u32 %s3783_s25, 16  ;;  %s1540_s18 = sshll.u32 %s1539_s15, 16 }
 0x499   : > { %s1688_s30 = sshll.u32 %s1687_s10, 16  ;;  %s1541_s19 = sor.u32 %s1540_s18, %s1539_s15 }
 0x49a   : > { %s3713_s20 = sshrl.u32 %s3711_s9, 16  ;;  %s1689_s16 = sor.u32 %s1688_s30, %s1687_s10 }
 0x49b   : > { %s3399_s23 = sor.u32 %s3712_s26, %s3713_s20  ;;  %s3714_s21 = sld [smem:[#allocation45_spill]] }
 0x49c   : > { %s2796_s29 = smov 8   ;;  %s2797_s12 = smov 16  }
 0x49d   : > { %s2798_s6 = smov 24   ;;  %s3715_s1 = sld [smem:[#allocation23_spill]] }
 0x49e   : > { %s3716_s28 = sld [smem:[#allocation32_spill]]  ;;  %s3717_s4 = sld [smem:[#allocation46_spill]] }
 0x49f   : > { %s3718_s8 = sld [smem:[#allocation53_spill]]  ;;  %s3721_s18 = sld [smem:[#allocation47_spill]] }
 0x4a0   : > { %s3723_s27 = sld [smem:[#allocation51_spill]]  ;;  %s3724_s15 = sld [smem:[#allocation50_spill]] }
 0x4a1   : > { %s3726_s10 = sld [smem:[#allocation29_spill]] }
 0x4a3   : > { %s3451_s17 = sand.u32 1, %s3715_s1  }
 0x4a4   : > { %s2243_s22 = sshll.u32 %s3451_s17, 3  ;;  %s2060_s14 = scalar_lea.sflag [#allocation9], %s3451_s17 }
 0x4a5   : > { %s3464_s9 = scalar_lea.vmem [#allocation14], %s2243_s22 }
 0x4a6   : > { %s2079_s24 = sshll.u32 %s3464_s9, 4  ;;  %s2080_s24 = int_to_ptr.vmem [resolvable:$true] %s2079_s24 }
 0x4a7   : > { %p3728_p3 = scmp.ne.s32.totalorder %s3726_s10, 0 }
 0x4ab   : > { %v978_v42 = vpop.xlane.xlu0 %977 }
 0x4ac   : > { %2597 = vrcp.f32 %v978_v42 }
 0x4af   : > { %v1041_v43 = vpop.xlane.xlu1 %1040 }
 0x4b0   : > { %2599 = vrcp.f32 %v1041_v43 }
 0x4b3   : > { %v1104_v44 = vpop.xlane.xlu0 %1103 }
 0x4b4   : > { %2601 = vrcp.f32 %v1104_v44  ;;  %v1167_v45 = vpop.xlane.xlu1 %1166  ;;  %v1257_v44 = vstv %s3399_s23  ;;  %s3719_s23 = sld [smem:[#allocation49_spill]] }
 0x4b5   : > { %2603 = vrcp.f32 %v1167_v45  ;;  %v1394_v45 = vstv %s1393_s11 }
 0x4b6   : > { %v2598_v46 = vpop.eup %2597 }
 0x4b7   : > { %v980_v47 = vmul.f32 %v2598_v46, %v3128_v31  ;;  %v1402_v48 = vpop.permute.xlu0 %1401 }
 0x4b8   : > { %v1407_v49 = vsel %vm1264_vm3, %v1402_v48, 0  ;;  %v1550_v21 = vpop.permute.xlu1 %1549 }
 0x4b9   : > { %v981_v50 = vpack.c.bf16 %v980_v47, %v980_v47  ;;  %2414 = vmatpush3.bf16.msra.mxu0 %v1407_v49 }
 0x4ba   : > { %v2600_v51 = vpop.eup %2599  ;;  %2425 = vmatprep.subr.bf16.mxu0 %v2791_v8  ;;  %s3720_s11 = smov %s3719_s23 }
 0x4bb   : > { %983 = vst.msk [vmem:[#allocation5] sm:$0xf] %vm982_vm5, %v981_v50  ;;  %v1043_v52 = vmul.f32 %v2600_v51, %v3132_v33 }
 0x4bc   : > { %v1698_v50 = vpop.permute.xlu1 %1697 }
 0x4bd   : > { %v1044_v53 = vpack.c.bf16 %v1043_v52, %v1043_v52  ;;  %v1525_v52 = vstv %s3406_s5 }
 0x4be   : > { %v2602_v54 = vpop.eup %2601 }
 0x4bf   : > { %v2604_v55 = vpop.eup %2603  ;;  %1046 = vst.msk [vmem:[#allocation5 + $0x4] sm:$0xf] %vm982_vm5, %v1044_v53  ;;  %v1106_v56 = vmul.f32 %v2602_v54, %v3136_v35  ;;  %v1673_v54 = vstv %s1672_s2  ;;  %s3725_s2 = sld [smem:[#allocation25_spill]] }
 0x4c0   : > { %v1169_v57 = vmul.f32 %v2604_v55, %v3138_v36 }
 0x4c1   : > { %v1107_v58 = vpack.c.bf16 %v1106_v56, %v1106_v56 }
 0x4c2   : > { %v1170_v59 = vpack.c.bf16 %v1169_v57, %v1169_v57  ;;  %v1173_v62 = vld [vmem:[#allocation5] sm:$0xf] }
 0x4c3   : > { %1109 = vst.msk [vmem:[#allocation5 + $0x8] sm:$0xf] %vm982_vm5, %v1107_v58  ;;  %v1310_v1 = vld [vmem:[#allocation5] sm:$0xf]  ;;  %v1189_v15 = vmul.bf16 %v1187_v63, %v1173_v62 }
 0x4c4   : > { %1172 = vst.msk [vmem:[#allocation5 + $0xc] sm:$0xf] %vm982_vm5, %v1170_v59  ;;  %v1326_v16 = vmul.bf16 %v1324_v2, %v1310_v1  ;;  %v1458_v17 = vld [vmem:[#allocation5] sm:$0xf]  ;;  %v1555_v59 = vsel %vm1264_vm3, %v1550_v21, 0  ;;  %v1542_v1 = vstv %s1541_s19  ;;  %v1690_v2 = vstv %s1689_s16  ;;  %s3722_s16 = sld [smem:[#allocation48_spill]] }
 0x4c5   : > { %v1606_v19 = vld [vmem:[#allocation5] sm:$0xf]  ;;  %v1474_v36 = vmul.bf16 %v1472_v14, %v1458_v17 }
 0x4c6   : > { %v1190_v0 = vld [vmem:[#allocation5 + $0x4] sm:$0xf]  ;;  %v1622_v38 = vmul.bf16 %v1620_v20, %v1606_v19 }
 0x4c7   : > { %v1327_v3 = vld [vmem:[#allocation5 + $0x4] sm:$0xf]  ;;  %v1206_v4 = vmul.bf16 %v1204_v60, %v1190_v0  ;;  %v1703_v60 = vsel %vm1264_vm3, %v1698_v50, 0 }
 0x4c8   : > { %v1343_v5 = vmul.bf16 %v1341_v61, %v1327_v3  ;;  %v1475_v6 = vld [vmem:[#allocation5 + $0x4] sm:$0xf] }
 0x4c9   : > { %v1623_v9 = vld [vmem:[#allocation5 + $0x4] sm:$0xf]  ;;  %v1491_v25 = vmul.bf16 %v1489_v7, %v1475_v6  ;;  %v1207_v29 = vadd.bf16 %v1206_v4, %v1189_v15 }
 0x4ca   : > { %v1208_v22 = vld [vmem:[#allocation5 + $0x8] sm:$0xf]  ;;  %v1639_v27 = vmul.bf16 %v1637_v10, %v1623_v9  ;;  %v1344_v32 = vadd.bf16 %v1343_v5, %v1326_v16  ;;  %v2575_v5 = vld [vmem:[%s3714_s21] sm:$0xff]  }
 0x4cb   : > { %v1345_v23 = vld [vmem:[#allocation5 + $0x8] sm:$0xf]  ;;  %v1224_v30 = vmul.bf16 %v1222_v11, %v1208_v22  ;;  %v1226_v31 = vld [vmem:[#allocation5 + $0xc] sm:$0xf]  ;;  %v1492_v48 = vadd.bf16 %v1491_v25, %v1474_v36 }
 0x4cc   : > { %v1493_v26 = vld [vmem:[#allocation5 + $0x8] sm:$0xf]  ;;  %v1361_v33 = vmul.bf16 %v1359_v13, %v1345_v23  ;;  %v1363_v34 = vld [vmem:[#allocation5 + $0xc] sm:$0xf]  ;;  %v1242_v35 = vmul.bf16 %v1240_v12, %v1226_v31  ;;  %v1640_v49 = vadd.bf16 %v1639_v27, %v1622_v38  ;;  %v2576_v13 = vld [vmem:[%s3714_s21 + $0x8] sm:$0xff]  }
 0x4cd   : > { %v1509_v37 = vmul.bf16 %v1507_v18, %v1493_v26  ;;  %v1641_v39 = vld [vmem:[#allocation5 + $0x8] sm:$0xf]  ;;  %v1225_v40 = vadd.bf16 %v1224_v30, %v1207_v29  ;;  %v1379_v42 = vmul.bf16 %v1377_v24, %v1363_v34  ;;  %v1511_v51 = vld [vmem:[#allocation5 + $0xc] sm:$0xf]  ;;  %v2293_v34 = vld [vmem:[%s3718_s8] ss:$0 sm:$0xff] }
 0x4ce   : > { %v1362_v41 = vadd.bf16 %v1361_v33, %v1344_v32  ;;  %v1657_v43 = vmul.bf16 %v1655_v28, %v1641_v39  ;;  %v1659_v53 = vld [vmem:[#allocation5 + $0xc] sm:$0xf]  ;;  %v1527_v61 = vmul.bf16 %v1525_v52, %v1511_v51  ;;  %v2289_v32 = vld [vmem:[%s3717_s4] ss:$0 sm:$0xff] }
 0x4cf   : > { %v1243_v46 = vadd.bf16 %v1242_v35, %v1225_v40  ;;  %v1510_v57 = vadd.bf16 %v1509_v37, %v1492_v48  ;;  %v1675_v62 = vmul.bf16 %v1673_v54, %v1659_v53  ;;  %v2609_v40 = vld [vmem:[%s3716_s28] sm:$0xff] }
 0x4d0   : > { %v1380_v47 = vadd.bf16 %v1379_v42, %v1362_v41  ;;  %v1658_v58 = vadd.bf16 %v1657_v43, %v1640_v49  ;;  %v2577_v48 = vld [vmem:[%s3719_s23] sm:$0xff]   ;;  %v2578_v49 = vld [vmem:[%s3720_s11 + $0x8] sm:$0xff]  }
 0x4d1   : > { %v1259_v55 = vadd.bf16 %v1257_v44, %v1243_v46  ;;  %v1528_v63 = vadd.bf16 %v1527_v61, %v1510_v57  ;;  %v2294_v54 = vld [vmem:[%s3721_s18] ss:$0 sm:$0xff]  ;;  %v2580_v61 = vld [vmem:[%s3723_s27 + $0x8] sm:$0xff]   ;;  %s2312_s18 = sshll.u32 %s3725_s2, 7 }
 0x4d2   : > { %v1396_v56 = vadd.bf16 %v1394_v45, %v1380_v47  ;;  %v1676_v0 = vadd.bf16 %v1675_v62, %v1658_v58  ;;  %v2581_v62 = vld [vmem:[%s3723_s27 + $0x10] sm:$0xff]  }
 0x4d3   : > { %2410 = vmatmul.mubr.msk.bf16.vlgmr.msra.gmra.mrb[8].mxu1 %vm969_vm4, %v1259_v55  ;;  %v1544_v3 = vadd.bf16 %v1542_v1, %v1528_v63  ;;  %v2582_v63 = vld [vmem:[%s3723_s27 + $0x18] sm:$0xff]   ;;  %v2584_v1 = vld [vmem:[%s3723_s27 + $0x28] sm:$0xff]  }
 0x4d4   : > { %2416 = vmatmul.mubr.msk.bf16.vlgmr.msra.gmra.mrb[20].mxu0 %vm969_vm4, %v1396_v56  ;;  %2420 = vmatpush3.bf16.msra.mxu1 %v1555_v59  ;;  %v1692_v4 = vadd.bf16 %v1690_v2, %v1676_v0  ;;  %v2295_v56 = vld [vmem:[%s3722_s16] ss:$0 sm:$0xff]  ;;  %v2585_v2 = vld [vmem:[%s3723_s27 + $0x30] sm:$0xff]   ;;  %s3727_s16 = sld [smem:[#allocation55_spill]] }
 0x4d5   : > { %2426 = vmatpush3.bf16.msra.mxu0 %v1703_v60  ;;  %2421 = vmatprep.mubr.msk.bf16.mxu1 %vm2792_vm1, %v2791_v8  ;;  %v2579_v60 = vld [vmem:[%s3723_s27] sm:$0xff]  }
 0x4d6   : > { %2427 = vmatprep.mubr.msk.bf16.mxu0 %vm2792_vm1, %v2791_v8  ;;  %2431 = vmatprep.subr.bf16.mxu1 %v2791_v8  ;;  %v2583_v0 = vld [vmem:[%s3723_s27 + $0x20] sm:$0xff]  }
 0x4d7   : > { %2439 = vmatprep.subr.bf16.mxu0 %v2791_v8 }
 0x4da   : > { %s3525_s3 = scalar_lea.hbm %s3727_s16, %s2312_s18 }
 0x4db   : > { %2422 = vmatmul.mubr.msk.bf16.vlgmr.msra.gmra.mrb[12].mxu1 %vm969_vm4, %v1544_v3  ;;  %v2586_v3 = vld [vmem:[%s3723_s27 + $0x38] sm:$0xff]  }
 0x4dc   : > { %2428 = vmatmul.mubr.msk.bf16.vlgmr.msra.gmra.mrb[24].mxu0 %vm969_vm4, %v1692_v4  ;;  %2435 = vmatprep.mubr.msk.bf16.mxu1 %vm2792_vm1, %v2791_v8  ;;  %v2296_v4 = vld [vmem:[%s3724_s15] ss:$0 sm:$0xff] }
 0x4dd   : > { %2443 = vmatprep.mubr.msk.bf16.mxu0 %vm2792_vm1, %v2791_v8  ;;  %2432 = vmatpush3.bf16.msra.mxu1 %v2575_v5 }
 0x4de   : > { %2433 = vmatprep.subr.bf16.mxu1 %v2791_v8  ;;  %2440 = vmatpush3.bf16.msra.mxu0 %v2577_v48 }
 0x4df   : > { %2441 = vmatprep.subr.bf16.mxu0 %v2791_v8 }
 0x4e1   : > { %2434 = vmatpush3.bf16.msra.mxu1 %v2576_v13 }
 0x4e2   : > { %2447 = vmatprep.subr.bf16.mxu1 %v2791_v8  ;;  %2442 = vmatpush3.bf16.msra.mxu0 %v2578_v49 }
 0x5a6   : > { %v1302_v6 = vpop.f32.mrb[8].mxu1 }
 0x5a7   : > { %v1443_v7 = vpop.f32.mrb[20].mxu0  ;;  %v1308_v9 = vpack.c.bf16 %v1302_v6, %v1302_v6  ;;  %v2411_v11 = vpop.f32.mrb[9].mxu1 }
 0x5a8   : > { %v2316_v10 = vpack.c.bf16 %v1443_v7, %v1443_v7  ;;  %v2417_v12 = vpop.f32.mrb[21].mxu0  ;;  %v1305_v14 = vpop.f32.mrb[10].mxu1 }
 0x5a9   : > { %v1446_v15 = vpop.f32.mrb[22].mxu0  ;;  %1309 = vst.msk [vmem:[#allocation6] sm:$0xf] %vm982_vm5, %v1308_v9  ;;  %v2412_v16 = vpop.f32.mrb[11].mxu1 }
 0x5aa   : > { %1453 = vrot.lane.b32.xlu1 %v2316_v10, %s2796_s29  ;;  %v2418_v17 = vpop.f32.mrb[23].mxu0  ;;  %s2664_s29 = scalar_lea.vmem %s2080_s24, 128 }
 0x5ab   : > { %p2665_p2 = scmp.ne.s32.totalorder %s2080_s24, %s2664_s29 }
 0x5ad   : > { %p2666_p5 = pnand %p2665_p2, %p3728_p3 }
 0x5ae   : > { %v1591_v18 = vpop.f32.mrb[12].mxu1 }
 0x5af   : > { %v1739_v19 = vpop.f32.mrb[24].mxu0  ;;  %v2317_v20 = vpack.c.bf16 %v1591_v18, %v1591_v18  ;;  %v2423_v22 = vpop.f32.mrb[13].mxu1  ;;  %p2667_p6 = pneg %p2666_p5 }
 0x5b0   : > { %v2318_v21 = vpack.c.bf16 %v1739_v19, %v1739_v19  ;;  %v2429_v23 = vpop.f32.mrb[25].mxu0  ;;  %v1594_v24 = vpop.f32.mrb[14].mxu1 }
 0x5b1   : > { %v1742_v25 = vpop.f32.mrb[26].mxu0  ;;  %1601 = vrot.lane.b32.xlu0 %v2317_v20, %s2797_s12  ;;  %v2424_v26 = vpop.f32.mrb[15].mxu1  ;;  %s2799_s12 = smov [#allocation14]  }
 0x5b2   : > { %1749 = vrot.lane.b32.xlu1 %v2318_v21, %s2798_s6  ;;  %v2430_v27 = vpop.f32.mrb[27].mxu0  ;;  %s2668_s6 = sshll.u32 %s2799_s12, 4  ;;  %s2669_s6 = int_to_ptr.vmem [resolvable:$false] %s2668_s6 }
 0x5b3   : > { %s2670_s1 = scalar_lea.vmem %s2669_s6, 256  ;;  %p2671_p7 = scmp.lt.s32.totalorder %s2080_s24, %s2669_s6 }
 0x5b4   : > { %p2672_p9 = scmp.lt.s32.totalorder %s2670_s1, %s2664_s29 }
 0x5b6   : > { %p2673_p12 = por %p2672_p9, %p2671_p7 }
 0x5b8   : > { %p2674_p13 = pnand %p2673_p12, %p2667_p6 }
 0x61c   : > { %v1454_v28 = vpop.permute.xlu1 %1453 }
 0x61d   : > { %1457 = vst.msk [vmem:[#allocation6] sm:$0xf] %vm1456_vm6, %v1454_v28 }
 0x623   : > { %v1602_v29 = vpop.permute.xlu0 %1601 }
 0x624   : > { %v1750_v30 = vpop.permute.xlu1 %1749  ;;  %1605 = vst.msk [vmem:[#allocation6] sm:$0xf] %vm1604_vm7, %v1602_v29 }
 0x625   : > { %1753 = vst.msk [vmem:[#allocation6] sm:$0xf] %vm1752_vm8, %v1750_v30 }
 0x62c   : > { %v1754_v31 = vld [vmem:[#allocation6] sm:$0xf] }
 0x62d   : > { %2436 = vmatmul.mubr.msk.bf16.vlgmr.msra.gmra.mrb[16].mxu1 %vm696_vm0, %v1754_v31 }
 0x62e   : > { %2463 = vmatprep.mubr.msk.bf16.mxu1 %vm2792_vm1, %v2791_v8  ;;  %2448 = vmatpush3.bf16.msra.mxu1 %v2579_v60 }
 0x62f   : > { %2449 = vmatprep.subr.bf16.mxu1 %v2791_v8 }
 0x632   : > { %2450 = vmatpush3.bf16.msra.mxu1 %v2580_v61 }
 0x633   : > { %2451 = vmatprep.subr.bf16.mxu1 %v2791_v8 }
 0x636   : > { %2452 = vmatpush3.bf16.msra.mxu1 %v2581_v62 }
 0x637   : > { %2453 = vmatprep.subr.bf16.mxu1 %v2791_v8 }
 0x63a   : > { %2454 = vmatpush3.bf16.msra.mxu1 %v2582_v63 }
 0x63b   : > { %2455 = vmatprep.subr.bf16.mxu1 %v2791_v8 }
 0x63e   : > { %2456 = vmatpush3.bf16.msra.mxu1 %v2583_v0 }
 0x63f   : > { %2457 = vmatprep.subr.bf16.mxu1 %v2791_v8 }
 0x642   : > { %2458 = vmatpush3.bf16.msra.mxu1 %v2584_v1 }
 0x643   : > { %2459 = vmatprep.subr.bf16.mxu1 %v2791_v8 }
 0x646   : > { %2460 = vmatpush3.bf16.msra.mxu1 %v2585_v2 }
 0x647   : > { %2461 = vmatprep.subr.bf16.mxu1 %v2791_v8 }
 0x64a   : > { %2462 = vmatpush3.bf16.msra.mxu1 %v2586_v3 }
 0x700   : > { %v1815_v33 = vpop.f32.mrb[16].mxu1 }
 0x701   : > { %v1816_v35 = vadd.f32 %v2289_v32, %v1815_v33  ;;  %v2437_v36 = vpop.f32.mrb[17].mxu1 }
 0x702   : > { %v1818_v37 = vpop.f32.mrb[18].mxu1 }
 0x703   : > { %v1828_v38 = vmul.f32 %v2293_v34, %v1816_v35  ;;  %v2438_v39 = vpop.f32.mrb[19].mxu1 }
 0x705   : > { %v3458_v41 = vadd.f32 %v2609_v40, %v1828_v38 }
 0x707   : > { %v1832_v42 = vsel %vm696_vm0, %v3458_v41, 0.0  ;;  %2057 = vst.msk [vmem:[%s3464_s9] sm:$0xff] %vm696_vm0, %v3458_v41 }
 0x708   : > { %1833 = vadd.xlane.f32.xlu0 %v1832_v42 }
 0x795   : > { %v1834_v43 = vpop.xlane.xlu0 %1833 }
 0x796   : > { %v1836_v44 = vmul.f32 0.03125, %v1834_v43 }
 0x798   : > { %v1837_v45 = vsub.f32 %v3458_v41, %v1836_v44 }
 0x79a   : > { %v1838_v46 = vmul.f32 %v1837_v45, %v1837_v45 }
 0x79c   : > { %v1839_v47 = vsel %vm696_vm0, %v1838_v46, 0.0 }
 0x79d   : > { %1840 = vadd.xlane.f32.xlu1 %v1839_v47 }
 0x82a   : > { %v1841_v50 = vpop.xlane.xlu1 %1840 }
 0x82b   : > { %v1842_v51 = vmul.f32 0.03125, %v1841_v50 }
 0x82d   : > { %v1843_v52 = vadd.f32 1e-05, %v1842_v51 }
 0x82f   : > { %2605 = vrsqrt.f32 %v1843_v52 }
 0x839   : > { %v2606_v53 = vpop.eup %2605 }
 0x83a   : > { %v1845_v55 = vmul.f32 %v2606_v53, %v1837_v45 }
 0x83c   : > { %v1852_v57 = vmul.f32 %v2294_v54, %v1845_v55 }
 0x83e   : > { %v1859_v58 = vadd.f32 %v2295_v56, %v1852_v57 }
 0x840   : > { %v1860_v59 = vpack.c.bf16 %v1859_v58, %v1859_v58 }
 0x842   : > { %2444 = vmatmul.mubr.msk.bf16.vlgmr.msra.gmra.mrb[28].mxu0 %vm696_vm0, %v1860_v59 }
 0x915   : > { %v1921_v5 = vpop.f32.mrb[28].mxu0 }
 0x916   : > { %v1922_v6 = vadd.f32 %v2296_v4, %v1921_v5  ;;  %v2445_v7 = vpop.f32.mrb[29].mxu0 }
 0x917   : > { %v1924_v9 = vpop.f32.mrb[30].mxu0 }
 0x918   : > { %v1927_v10 = vmul.f32 %v1922_v6, %v1922_v6  ;;  %v2446_v11 = vpop.f32.mrb[31].mxu0 }
 0x91a   : > { %v1928_v12 = vmul.f32 %v1927_v10, %v1922_v6 }
 0x91c   : > { %v1929_v13 = vmul.f32 0.044715, %v1928_v12 }
 0x91e   : > { %v1930_v14 = vadd.f32 %v1929_v13, %v1922_v6 }
 0x920   : > { %v1931_v8 = vmul.f32 0.7978846, %v1930_v14 }
 0x922   : > { %2607 = vtanh.f32 %v1931_v8 }
 0x92c   : > { %v2608_v15 = vpop.eup %2607 }
 0x92d   : > { %v1933_v16 = vadd.f32 1.0, %v2608_v15 }
 0x92f   : > { %v1934_v17 = vmul.f32 0.5, %v1933_v16 }
 0x931   : > { %v1935_v18 = vmul.f32 %v1934_v17, %v1922_v6 }
 0x933   : > { %v1936_v19 = vpack.c.bf16 %v1935_v18, %v1935_v18 }
 0x935   : > { %2464 = vmatmul.mubr.bf16.vlgmr.msra.gmra.mrb[20].mxu1 %v1936_v19 }
 0x936   : > { %2677 = shalt.err (!%p2674_p13)
}
 0x937   : > { %s2678_s9 = scalar_lea.hbm %s3525_s3, 128  ;;  %s2682_s25 = scalar_lea.hbm %s3727_s16, 256 }
 0x938   : > { %p2679_p1 = scmp.ne.s32.totalorder %s3525_s3, %s2678_s9  ;;  %p2683_p8 = scmp.lt.u32.totalorder %s3525_s3, %s3727_s16 }
 0x939   : > { %p2684_p10 = scmp.lt.u32.totalorder %s2682_s25, %s2678_s9  ;;  %p2686_p2 = scmp.lt.u32.totalorder %s2678_s9, %s3525_s3 }
 0x93a   : > { %p2680_p0 = pnand %p2679_p1, %p3728_p3 }
 0x93b   : > { %p2685_p11 = por %p2684_p10, %p2683_p8 }
 0x93c   : > { %p2681_p4 = pneg %p2680_p0 }
 0x93d   : > { %p2687_p5 = por %p2686_p2, %p2685_p11 }
 0x93f   : > { %p2688_p6 = pnand %p2687_p5, %p2681_p4 }
 0x941   : > { %2691 = shalt.err (!%p2688_p6)
}
 0x942   : > { %2479 = dma.vmem_to_hbm [thread:$0]  (%p3728_p3), %s2080_s24, 128, %s3525_s3, %s2060_s14  }
 0x943   : > { %s3729_s26 = sld [smem:[#allocation52_spill]]  ;;  %s3730_s5 = sld [smem:[#allocation54_spill]] }
 0x944   : > { %s683_s15 = scalar_lea.vmem [#allocation15], %s2243_s22  ;;  %s3731_s24 = sld [smem:[#allocation56_spill]] }
 0x945   : > { %s2093_s30 = sshll.u32 %s683_s15, 4  ;;  %s2065_s12 = scalar_lea.sflag [#allocation16], %s3451_s17  ;;  %s3562_s30 = int_to_ptr.vmem [resolvable:$true] %s2093_s30 }
 0x946   : > { %s2692_s22 = scalar_lea.vmem %s3562_s30, 128  ;;  %s2800_s6 = smov [#allocation15]  }
 0x947   : > { %p2693_p7 = scmp.ne.s32.totalorder %s3562_s30, %s2692_s22  ;;  %s2696_s2 = sshll.u32 %s2800_s6, 4  ;;  %s2697_s2 = int_to_ptr.vmem [resolvable:$false] %s2696_s2 }
 0x948   : > { %s2698_s1 = scalar_lea.vmem %s2697_s2, 256  ;;  %p2699_p13 = scmp.lt.s32.totalorder %s3562_s30, %s2697_s2 }
 0x949   : > { %v2300_v20 = vld [vmem:[%s3729_s26] ss:$0 sm:$0xff]  ;;  %p2694_p9 = pnand %p2693_p7, %p3728_p3  ;;  %p2700_p1 = scmp.lt.s32.totalorder %s2698_s1, %s2692_s22 }
 0x94a   : > { %v2309_v22 = vld [vmem:[%s3730_s5] ss:$0 sm:$0xff]  ;;  %s3732_s14 = smov %s3731_s24  ;;  %s3560_s29 = scalar_lea.hbm %s3731_s24, %s2312_s18 }
 0x94b   : > { %p2695_p12 = pneg %p2694_p9  ;;  %p2701_p0 = por %p2700_p1, %p2699_p13 }
 0x94d   : > { %p2702_p4 = pnand %p2701_p0, %p2695_p12 }
 0xa08   : > { %v2042_v21 = vpop.f32.mrb[20].mxu1 }
 0xa09   : > { %v2043_v23 = vadd.f32 %v2300_v20, %v2042_v21  ;;  %v2465_v24 = vpop.f32.mrb[21].mxu1 }
 0xa0a   : > { %v2045_v25 = vpop.f32.mrb[22].mxu1 }
 0xa0b   : > { %v2055_v26 = vmul.f32 %v2309_v22, %v2043_v23  ;;  %v2466_v27 = vpop.f32.mrb[23].mxu1 }
 0xa0d   : > { %v2056_v28 = vadd.f32 %v2055_v26, %v3458_v41 }
 0xa0f   : > { %2058 = vst.msk [vmem:[%s683_s15] sm:$0xff] %vm696_vm0, %v2056_v28 }
 0xa10   : > { %2705 = shalt.err (!%p2702_p4)
}
 0xa11   : > { %s2706_s17 = scalar_lea.hbm %s3560_s29, 128  ;;  %s2710_s28 = scalar_lea.hbm %s3732_s14, 256 }
 0xa12   : > { %p2707_p8 = scmp.ne.s32.totalorder %s3560_s29, %s2706_s17  ;;  %p2711_p2 = scmp.lt.u32.totalorder %s3560_s29, %s3732_s14 }
 0xa13   : > { %p2712_p5 = scmp.lt.u32.totalorder %s2710_s28, %s2706_s17  ;;  %p2714_p7 = scmp.lt.u32.totalorder %s2706_s17, %s3560_s29 }
 0xa14   : > { %p2708_p10 = pnand %p2707_p8, %p3728_p3 }
 0xa15   : > { %p2713_p6 = por %p2712_p5, %p2711_p2 }
 0xa16   : > { %p2709_p11 = pneg %p2708_p10 }
 0xa17   : > { %p2715_p9 = por %p2714_p7, %p2713_p6 }
 0xa19   : > { %p2716_p12 = pnand %p2715_p9, %p2709_p11 }
 0xa1b   : > { %2719 = shalt.err (!%p2716_p12)
}
 0xa1c   : > { %2480 = dma.vmem_to_hbm [thread:$0]  (%p3728_p3), %s3562_s30, 128, %s3560_s29, %s2065_s12  }
 0xa1d PF: > { %s3733_s4 = sld [smem:[#allocation27_spill]]  ;;  %s3734_s7 = sld [smem:[#allocation22_spill]] }
 0xa1e   : > { %s3735_s0 = sld [smem:[#allocation30_spill]] }
 0xa23   : > { %p2506_p13 = scmp.ge.s32.totalorder %s3733_s4, 2  ;;  %s2105_s8 = sand.u32 1, %s3734_s7  }
 0xa24   : > { %p3736_p1 = scmp.ne.s32.totalorder %s3735_s0, 0  ;;  %s2106_s26 = scalar_lea.sflag [#allocation9], %s2105_s8 }
 0xa26   : > { %p2494_p0 = pnand %p2506_p13, %p3736_p1 }
 0xa28   : > { %2757 = dma.done.wait (!%p2494_p0), %s2106_s26, 128  }
 0xa29   : > { %2759 = vsyncadd (!%p2494_p0), %s2106_s26, 4294967168  ;;  %s2115_s20 = scalar_lea.sflag [#allocation16], %s2105_s8 }
 0xa2a   : > { %2761 = dma.done.wait (!%p2494_p0), %s2115_s20, 128  }
 0xa2b   : > { %2763 = vsyncadd (!%p2494_p0), %s2115_s20, 4294967168  ;;  %s40_s25 = sadd.s32 1, %s3733_s4   ;;  %s3737_s1 = sld [smem:[#allocation23_spill]] }
 0xa2c   : > { %p37_p4 = scmp.ge.s32.totalorder %s40_s25, 4   ;;  %s3738_s22 = sld [smem:[#allocation24_spill]] }
 0xa2d   : > { %s3739_s23 = sld [smem:[#allocation31_spill]]  ;;  %s3740_s24 = sld [smem:[#allocation26_spill]] }
 0xa2e   : > { %s3741_s2 = sld [smem:[#allocation28_spill]]  ;;  %39 = sbr.rel (!%p37_p4) target bundleno = 31 (0x1f), region = 171 }
 0xa35   :  { %2120 = vsyncpa [#allocation8], 1 }
 0xa36   :  { %2122 = vsyncpa [#allocation8 + $0x1], 1 }
 0xa37   :  { %2123 = vsyncpa [#allocation9], 1 }
 0xa38   :  { %2125 = vsyncpa [#allocation9 + $0x1], 1 }
 0xa39   :  { %2126 = vsyncpa [#allocation16], 1 }
 0xa3a   :  { %2128 = vsyncpa [#allocation16 + $0x1], 1 }
 0xa3b   :  { %2129 = vsyncpa [#allocation10], 1 }
 0xa3c   :  { %2131 = vsyncpa [#allocation10 + $0x1], 1 }
 0xa3d   :  { %2132 = vsyncpa [#allocation13], 1 }

// kernel: tpu_custom_call.1
= control target key start
LH: loop header
LB: loop body
LE: loop exit
PB: predicated region body
PF: predicated region fallthrough
CT: control target
= control target key end

     0   :  { %s3609_s0 = inlined_call_operand.vmem [shape: f32[2,8,32], index: 0, kind: input, shape index: {}]   ;;  %s3610_s1 = inlined_call_operand.vmem [shape: f32[1,32], index: 1, kind: input, shape index: {}]   ;;  %s3611_s2 = inlined_call_operand.vmem [shape: f32[1,32], index: 2, kind: input, shape index: {}]   ;;  %s3612_s3 = inlined_call_operand.vmem [shape: bf16[32,32], index: 3, kind: input, shape index: {}]   ;;  %s3613_s4 = inlined_call_operand.vmem [shape: bf16[32,32], index: 4, kind: input, shape index: {}]   ;;  %s3614_s5 = inlined_call_operand.vmem [shape: bf16[32,32], index: 5, kind: input, shape index: {}]   ;;  %s3615_s6 = inlined_call_operand.hbm [shape: f32[4,32], index: 6, kind: input, shape index: {}]   ;;  %s3616_s7 = inlined_call_operand.hbm [shape: f32[4,4], index: 7, kind: input, shape index: {}]   ;;  %s3617_s8 = inlined_call_operand.hbm [shape: f32[4], index: 8, kind: input, shape index: {}]   ;;  %s3618_s9 = inlined_call_operand.vmem [shape: bf16[32,32], index: 9, kind: input, shape index: {}]   ;;  %s3619_s10 = inlined_call_operand.vmem [shape: f32[1,32], index: 10, kind: input, shape index: {}]   ;;  %s3620_s11 = inlined_call_operand.vmem [shape: f32[1,32], index: 11, kind: input, shape index: {}]   ;;  %s3621_s12 = inlined_call_operand.vmem [shape: f32[1,32], index: 12, kind: input, shape index: {}]   ;;  %s3622_s13 = inlined_call_operand.vmem [shape: bf16[32,128], index: 13, kind: input, shape index: {}]   ;;  %s3623_s14 = inlined_call_operand.vmem [shape: f32[1,128], index: 14, kind: input, shape index: {}]   ;;  %s3624_s15 = inlined_call_operand.vmem [shape: bf16[128,32], index: 15, kind: input, shape index: {}]   ;;  %s3625_s16 = inlined_call_operand.vmem [shape: f32[1,32], index: 16, kind: input, shape index: {}]   ;;  %s3626_s17 = inlined_call_operand.vmem [shape: f32[1,32], index: 17, kind: input, shape index: {}]   ;;  %s3627_s18 = inlined_call_operand.vmem [shape: f32[1,32], index: 18, kind: input, shape index: {}]   ;;  %s3628_s19 = inlined_call_operand.hbm [shape: f32[2,8,32], index: 19, kind: output, shape index: {0}]   ;;  %s3629_s20 = inlined_call_operand.hbm [shape: f32[2,8,32], index: 20, kind: output, shape index: {1}]  }
   0x1   :  { %3658 = sst [smem:[#allocation36_spill]] %s3609_s0 }
   0x2   :  { %3659 = sst [smem:[#allocation37_spill]] %s3610_s1 }
   0x3   :  { %3660 = sst [smem:[#allocation38_spill]] %s3611_s2 }
   0x4   :  { %3661 = sst [smem:[#allocation39_spill]] %s3612_s3 }
   0x5   :  { %3662 = sst [smem:[#allocation40_spill]] %s3613_s4 }
   0x6   :  { %3663 = sst [smem:[#allocation41_spill]] %s3614_s5 }
   0x7   :  { %3664 = sst [smem:[#allocation42_spill]] %s3615_s6 }
   0x8   :  { %3665 = sst [smem:[#allocation43_spill]] %s3616_s7 }
   0x9   :  { %3666 = sst [smem:[#allocation44_spill]] %s3617_s8 }
   0xa   :  { %3667 = sst [smem:[#allocation45_spill]] %s3618_s9 }
   0xb   :  { %3668 = sst [smem:[#allocation46_spill]] %s3619_s10 }
   0xc   :  { %3669 = sst [smem:[#allocation47_spill]] %s3620_s11 }
   0xd   :  { %3670 = sst [smem:[#allocation48_spill]] %s3621_s12 }
   0xe   :  { %3671 = sst [smem:[#allocation49_spill]] %s3622_s13 }
   0xf   :  { %3672 = sst [smem:[#allocation50_spill]] %s3623_s14 }
  0x10   :  { %3673 = sst [smem:[#allocation51_spill]] %s3624_s15 }
  0x11   :  { %3674 = sst [smem:[#allocation52_spill]] %s3625_s16 }
  0x12   :  { %3675 = sst [smem:[#allocation53_spill]] %s3626_s17 }
  0x13   :  { %3676 = sst [smem:[#allocation54_spill]] %s3627_s18 }
  0x14   :  { %3677 = sst [smem:[#allocation55_spill]] %s3628_s19 }
  0x15   :  { %3678 = sst [smem:[#allocation56_spill]] %s3629_s20 }
  0x16   :  { %26 = vsyncpa [#allocation8], 0 }
  0x17   :  { %27 = vsyncpa [#allocation10], 0 }
  0x18   :  { %28 = vsyncpa [#allocation13], 0 }
  0x19   :  { %29 = vsyncpa [#allocation9], 0 }
  0x1a   :  { %31 = vsyncpa [#allocation9 + $0x1], 0 }
  0x1b   :  { %32 = vsyncpa [#allocation16], 0 }
  0x1c   :  { %34 = vsyncpa [#allocation16 + $0x1], 0  ;;  %s2906_s1 = smov 0   ;;  %s2908_s22 = smov 0  }
  0x1d   :  { %s2910_s23 = smov 0   ;;  %s2912_s24 = smov 0  }
  0x1e   :  { %s2914_s2 = smov 0   ;;  %s2916_s25 = smov 0  }
  0x1f LB: > { %3679 = sst [smem:[#allocation22_spill]] %s2766_s1  ;;  %s2232_s3 = sadd.s32 4294967295, %s2786_s25   ;;  %s2786_s25 = sphi %s2916_s25, %s40_s25   ;;  %s2782_s2 = sphi %s2914_s2, %s3741_s2   ;;  %s2778_s24 = sphi %s2912_s24, %s3740_s24   ;;  %s2774_s23 = sphi %s2910_s23, %s3739_s23   ;;  %s2770_s22 = sphi %s2908_s22, %s3738_s22   ;;  %s2766_s1 = sphi %s2906_s1, %s3737_s1  }
  0x20   : > { %3680 = sst [smem:[#allocation23_spill]] %s2770_s22  ;;  %s2233_s26 = sadd.s32 4294967294, %s2786_s25  }
  0x21   : > { %3681 = sst [smem:[#allocation24_spill]] %s2774_s23  ;;  %s52_s27 = sadd.s32 1, %s2782_s2 }
  0x22   : > { %3682 = sst [smem:[#allocation25_spill]] %s2778_s24  ;;  %s465_s28 = sadd.s32 1, %s2774_s23 }
  0x23   : > { %3683 = sst [smem:[#allocation26_spill]] %s2782_s2  ;;  %p54_p0 = scmp.ge.s32.totalorder %s52_s27, 2 }
  0x24   : > { %3684 = sst [smem:[#allocation27_spill]] %s2786_s25  ;;  %p475_p1 = scmp.ne.s32.totalorder %s2774_s23, %s2770_s22 }
  0x25   : > { %p476_p2 = scmp.eq.s32.totalorder %s2232_s3, 1  ;;  %p481_p3 = scmp.ne.s32.totalorder %s2770_s22, %s2766_s1 }
  0x26   : > { %s3743_s27 = smov (%p54_p0, %s52_s27), 0  ;;  %p482_p5 = scmp.eq.s32.totalorder %s2233_s26, 1 }
  0x27   : > { %3685 = sst [smem:[#allocation28_spill]] %s3743_s27  ;;  %p2946_p4 = por %p476_p2, %p475_p1 }
  0x28   : > { %s460_s29 = ssub.s32 %s2782_s2, %s3743_s27  ;;  %p2234_p6 = scmp.ge.s32.totalorder %s2786_s25, 1 }
  0x29   : > { %s3686_s4 = scalar_select %p2946_p4, 1, 0 }
  0x2a   : > { %p463_p7 = scmp.eq.s32.totalorder %s460_s29, 0  ;;  %p2953_p8 = por %p482_p5, %p481_p3 }
  0x2b   : > { %3687 = sst [smem:[#allocation29_spill]] %s3686_s4  ;;  %p517_p9 = scmp.lt.s32.totalorder %s2786_s25, 3 }
  0x2c   : > { %s3688_s30 = scalar_select %p2953_p8, 1, 0 }
  0x2d   : > { %s2959_s0 = scalar_select %p463_p7, %s2774_s23, %s465_s28  }
  0x2e   : > { %3689 = sst [smem:[#allocation30_spill]] %s3688_s30  ;;  %p2961_p10 = pnand %p2234_p6, %p517_p9 }
  0x2f   : > { %3690 = sst [smem:[#allocation31_spill]] %s2959_s0  ;;  %p2965_p11 = scmp.eq.s32.totalorder %s2232_s3, 0 }
  0x30   : > { %s3691_s21 = scalar_select %p2961_p10, 1, 0 }
  0x31   : > { %s3692_s1 = scalar_select %p2965_p11, 1, 0 }
  0x32   : > { %p2483_p12 = pneg %p2961_p10  ;;  %s2788_s26 = smov [#allocation7]  }
  0x33   : > { %s545_s29 = sshll.u32 %s2788_s26, 4  ;;  %s3694_s6 = sld [smem:[#allocation42_spill]]  ;;  %s546_s29 = int_to_ptr.vmem [resolvable:$true] %s545_s29 }
  0x34   : > { %p2973_p13 = pnand %p2965_p11, %p2483_p12 }
  0x36   : > { %p2612_p1 = pneg %p2973_p13 }
  0x39   : > { %s2610_s3 = scalar_lea.hbm %s3694_s6, 64 }
  0x3a   : > { %p2611_p0 = scmp.ne.s32.totalorder %s3694_s6, %s2610_s3  ;;  %p2617_p5 = scmp.lt.u32.totalorder %s2610_s3, %s3694_s6 }
  0x3c   : > { %p2613_p2 = pnand %p2612_p1, %p2611_p0 }
  0x3e   : > { %p2614_p3 = pneg %p2613_p2 }
  0x40   : > { %p2619_p6 = pnand %p2617_p5, %p2614_p3 }
  0x42   : > { %2622 = shalt.err (!%p2619_p6)
}
  0x43   : > { %s2623_s2 = scalar_lea.vmem %s546_s29, 64  ;;  %p2631_p8 = scmp.lt.s32.totalorder %s546_s29, %s546_s29 }
  0x44   : > { %p2624_p7 = scmp.ne.s32.totalorder %s546_s29, %s2623_s2  ;;  %p2632_p4 = scmp.lt.s32.totalorder %s2623_s2, %s2623_s2 }
  0x46   : > { %p2626_p9 = pnand %p2624_p7, %p2612_p1  ;;  %p2633_p11 = por %p2632_p4, %p2631_p8 }
  0x48   : > { %p2627_p12 = pneg %p2626_p9 }
  0x4a   : > { %p2634_p10 = pnand %p2633_p11, %p2627_p12 }
  0x4c   : > { %2637 = shalt.err (!%p2634_p10)
}
  0x4d   : > { %2486 = dma.hbm_to_vmem [thread:$0]  (!%p2973_p13), %s3694_s6, 64, %s546_s29, [#allocation8]  }
  0x4e   : > { %s3695_s7 = sld [smem:[#allocation43_spill]] }
  0x54   : > { %s2638_s3 = scalar_lea.hbm %s3695_s7, 64 }
  0x55   : > { %p2639_p0 = scmp.ne.s32.totalorder %s3695_s7, %s2638_s3  ;;  %p2645_p10 = scmp.lt.u32.totalorder %s2638_s3, %s3695_s7 }
  0x57   : > { %p2641_p4 = pnand %p2639_p0, %p2612_p1 }
  0x59   : > { %p2642_p8 = pneg %p2641_p4 }
  0x5b   : > { %p2647_p11 = pnand %p2645_p10, %p2642_p8 }
  0x5d   : > { %2650 = shalt.err (!%p2647_p11)
}
  0x5e   : > { %s2789_s23 = smov [#allocation11]   ;;  %s3696_s8 = sld [smem:[#allocation44_spill]] }
  0x5f   : > { %2489 = dma.hbm_to_smem (!%p2973_p13), %s3695_s7, 64, %s2789_s23, [#allocation10]  }
  0x64   : > { %s2651_s28 = scalar_lea.hbm %s3696_s8, 16 }
  0x65   : > { %p2652_p2 = scmp.ne.s32.totalorder %s3696_s8, %s2651_s28  ;;  %p2658_p6 = scmp.lt.u32.totalorder %s2651_s28, %s3696_s8 }
  0x67   : > { %p2654_p3 = pnand %p2652_p2, %p2612_p1 }
  0x69   : > { %p2655_p5 = pneg %p2654_p3 }
  0x6b   : > { %p2660_p7 = pnand %p2658_p6, %p2655_p5 }
  0x6d   : > { %2663 = shalt.err (!%p2660_p7)
}
  0x6e   : > { %s2790_s2 = smov [#allocation12]   ;;  %p3697_p9 = scmp.ne.s32.totalorder %s3691_s21, 0 }
  0x6f   : > { %2492 = dma.hbm_to_smem (!%p2973_p13), %s3696_s8, 16, %s2790_s2, [#allocation13]  }
  0x70   : > { %613 = sbr.rel (%p3697_p9) target bundleno = 2589 (0xa1d), region = 96 }
  0x77   : > { %p3698_p12 = scmp.ne.s32.totalorder %s3692_s1, 0 }
  0x79   : > { %2745 = dma.done.wait (%p3698_p12), [#allocation8], 64  }
  0x7a   : > { %2747 = vsyncadd (%p3698_p12), [#allocation8], 4294967232 }
  0x7b   : > { %2749 = dma.done.wait (%p3698_p12), [#allocation10], 64  }
  0x7c   : > { %2751 = vsyncadd (%p3698_p12), [#allocation10], 4294967232 }
  0x7d   : > { %2753 = dma.done.wait (%p3698_p12), [#allocation13], 16  }
  0x7e   : > { %2755 = vsyncadd (%p3698_p12), [#allocation13], 4294967280 }
  0x7f   : > { %627 = sfence }
  0x80   : > { %p684_p13 = scmp.lt.s32.totalorder %s2778_s24, 1  ;;  %vm696_vm0 = vcmask 261120   ;;  %s3699_s25 = sld [smem:[#allocation36_spill]]  ;;  %v2791_v8 = vmov 0.0   ;;  %vm2792_vm1 = vmmov 0   ;;  %vm726_vm2 = vcmask 257024  }
  0x81   : > { %s3701_s26 = sld [smem:[#allocation40_spill]]  ;;  %2359 = vmatprep.subr.bf16.mxu0 %v2791_v8  ;;  %2363 = vmatprep.mubr.msk.bf16.mxu0 %vm2792_vm1, %v2791_v8  ;;  %s3702_s29 = sld [smem:[#allocation37_spill]]  ;;  %v917_v28 = vlaneseq  ;;  %v915_v39 = vld [vmem:[#allocation7] sm:$0xf]  ;;  %vm1264_vm3 = vcmask 1043456   ;;  %vm969_vm4 = vcmask 64512  }
  0x82   : > { %s685_s6 = scalar_select %p684_p13, %s2778_s24, 1  ;;  %2383 = vmatprep.subr.bf16.mxu1 %v2791_v8  ;;  %2385 = vmatprep.mubr.msk.bf16.mxu1 %vm2792_vm1, %v2791_v8  ;;  %vm982_vm5 = vcmask 60416   ;;  %vm1456_vm6 = vcmask 126016   ;;  %vm1604_vm7 = vcmask 191616   ;;  %vm1752_vm8 = vcmask 257216  }
  0x83   : > { %s3703_s21 = sld [smem:[#allocation38_spill]]  ;;  %s3704_s5 = sld [smem:[#allocation41_spill]]  ;;  %v918_v31 = vshrl.u32 %v917_v28, 7 }
  0x84   : > { %s2245_s27 = sshll.u32 %s685_s6, 3  ;;  %s3705_s2 = sld [smem:[#allocation39_spill]] }
  0x85   : > { %v919_v35 = vsub.s32 0, %v918_v31  ;;  %v986_v36 = vsub.s32 1, %v918_v31  ;;  %v1049_v44 = vsub.s32 2, %v918_v31  ;;  %v1112_v45 = vsub.s32 3, %v918_v31  ;;  %s2795_s0 = smov 120   ;;  %s2261_s28 = sld [smem:[#allocation11 + $0x1]] }
  0x86   : > { %s3052_s30 = scalar_lea.vmem %s3699_s25, %s2245_s27  ;;  %s2793_s27 = smov 112  }
  0x87   : > { %3700 = sst [smem:[#allocation32_spill]] %s3052_s30  ;;  %v693_v0 = vld [vmem:[%s3052_s30] sm:$0xff]  ;;  %v2567_v9 = vld [vmem:[%s3701_s26 + $0x8] sm:$0xff]   ;;  %v920_v42 = vrot.slane %v915_v39, %v919_v35  ;;  %v987_v43 = vrot.slane %v915_v39, %v986_v36  ;;  %v1050_v53 = vrot.slane %v915_v39, %v1049_v44  ;;  %v1113_v54 = vrot.slane %v915_v39, %v1112_v45  ;;  %s1174_s25 = sld [smem:[#allocation11]] }
  0x88   : > { %v697_v1 = vsel %vm696_vm0, %v693_v0, 0.0  ;;  %v2566_v7 = vld [vmem:[%s3701_s26] sm:$0xff]   ;;  %s3144_s23 = sld [smem:[#allocation11 + $0x2]]  ;;  %s3154_s26 = sld [smem:[#allocation12]] }
  0x89   : > { %698 = vadd.xlane.f32.xlu0 %v697_v1  ;;  %2360 = vmatpush3.bf16.msra.mxu0 %v2566_v7  ;;  %v2246_v14 = vld [vmem:[%s3702_s29] ss:$0 sm:$0xff]  ;;  %v2569_v21 = vld [vmem:[%s3704_s5 + $0x8] sm:$0xff]   ;;  %s3159_s18 = sld [smem:[#allocation11 + $0x81]] }
  0x8a   : > { %2361 = vmatprep.subr.bf16.mxu0 %v2791_v8  ;;  %v2247_v16 = vld [vmem:[%s3703_s21] ss:$0 sm:$0xff]  ;;  %s3706_s29 = smov %s3705_s2  ;;  %s2794_s21 = smov 104  }
  0x8b   : > { %v2568_v19 = vld [vmem:[%s3704_s5] sm:$0xff]   ;;  %v2571_v23 = vld [vmem:[%s3706_s29 + $0x8] sm:$0xff]   ;;  %s1194_s6 = sshrl.u32 %s2261_s28, 16  ;;  %s3146_s5 = sld [smem:[#allocation11 + $0x3]] }
  0x8c   : > { %v2570_v22 = vld [vmem:[%s3705_s2] sm:$0xff]   ;;  %s1195_s7 = sand.u32 1, %s1194_s6  ;;  %p1193_p0 = scmp.ne.f32.partialorder %s2261_s28, %s2261_s28 }
  0x8d   : > { %2362 = vmatpush3.bf16.msra.mxu0 %v2567_v9  ;;  %s1177_s1 = sshrl.u32 %s1174_s25, 16  ;;  %p1176_p1 = scmp.ne.f32.partialorder %s1174_s25, %s1174_s25 }
  0x8e   : > { %2367 = vmatprep.subr.bf16.mxu0 %v2791_v8  ;;  %s1178_s20 = sand.u32 1, %s1177_s1  ;;  %p1211_p4 = scmp.ne.f32.partialorder %s3144_s23, %s3144_s23 }
  0x8f   : > { %s1179_s3 = sadd.s32 32767, %s1178_s20  ;;  %p1246_p10 = scmp.ne.f32.partialorder %s3154_s26, %s3154_s26 }
  0x90   : > { %s1180_s2 = sadd.s32 %s1179_s3, %s1174_s25  ;;  %s3152_s3 = sld [smem:[#allocation11 + $0x80]] }
  0x91   : > { %s1230_s1 = sshrl.u32 %s3146_s5, 16  ;;  %p1229_p8 = scmp.ne.f32.partialorder %s3146_s5, %s3146_s5 }
  0x92   : > { %s1231_s25 = sand.u32 1, %s1230_s1  ;;  %s3193_s14 = sld [smem:[#allocation12 + $0x1]] }
  0x93   : > { %s1232_s29 = sadd.s32 32767, %s1231_s25  ;;  %p1330_p2 = scmp.ne.f32.partialorder %s3159_s18, %s3159_s18 }
  0x94   : > { %s3203_s15 = sld [smem:[#allocation11 + $0x181]] }
  0x96   : > { %s1314_s16 = sshrl.u32 %s3152_s3, 16  ;;  %p1313_p11 = scmp.ne.f32.partialorder %s3152_s3, %s3152_s3 }
  0x97   : > { %s1315_s1 = sand.u32 1, %s1314_s16 }
  0x98   : > { %s1316_s25 = sadd.s32 32767, %s1315_s1  ;;  %p1383_p6 = scmp.ne.f32.partialorder %s3193_s14, %s3193_s14 }
  0x99   : > { %s1317_s16 = sadd.s32 %s3152_s3, %s1316_s25 }
  0x9a   : > { %s1318_s1 = sand.u32 4294901760, %s1317_s16 }
  0x9b   : > { %s3755_s1 = smov (%p1313_p11, %s1318_s1), 2143289344 }
 0x116   : > { %v699_v2 = vpop.xlane.xlu0 %698 }
 0x117   : > { %v701_v3 = vmul.f32 0.03125, %v699_v2 }
 0x119   : > { %v702_v4 = vsub.f32 %v693_v0, %v701_v3 }
 0x11b   : > { %v703_v5 = vmul.f32 %v702_v4, %v702_v4 }
 0x11d   : > { %v704_v6 = vsel %vm696_vm0, %v703_v5, 0.0 }
 0x11e   : > { %705 = vadd.xlane.f32.xlu0 %v704_v6 }
 0x1ab   : > { %v706_v10 = vpop.xlane.xlu0 %705 }
 0x1ac   : > { %v707_v11 = vmul.f32 0.03125, %v706_v10 }
 0x1ae   : > { %v708_v12 = vadd.f32 1e-05, %v707_v11 }
 0x1b0   : > { %2587 = vrsqrt.f32 %v708_v12 }
 0x1ba   : > { %v2588_v13 = vpop.eup %2587 }
 0x1bb   : > { %v710_v15 = vmul.f32 %v2588_v13, %v702_v4 }
 0x1bd   : > { %v717_v17 = vmul.f32 %v2246_v14, %v710_v15 }
 0x1bf   : > { %v724_v18 = vadd.f32 %v2247_v16, %v717_v17 }
 0x1c1   : > { %v725_v20 = vpack.c.bf16 %v724_v18, %v724_v18 }
 0x1c3   : > { %727 = vst.msk [vmem:[#allocation2] sm:$0xf] %vm726_vm2, %v725_v20  ;;  %2364 = vmatmul.mubr.msk.bf16.vlgmr.msra.gmra.mrb[0].mxu0 %vm696_vm0, %v725_v20 }
 0x1c4   : > { %2368 = vmatpush3.bf16.msra.mxu0 %v2568_v19  ;;  %2371 = vmatprep.mubr.msk.bf16.mxu0 %vm2792_vm1, %v2791_v8 }
 0x1c5   : > { %2369 = vmatprep.subr.bf16.mxu0 %v2791_v8 }
 0x1c8   : > { %2370 = vmatpush3.bf16.msra.mxu0 %v2569_v21 }
 0x1c9   : > { %2375 = vmatprep.subr.bf16.mxu0 %v2791_v8 }
 0x1ca   : > { %v854_v24 = vld [vmem:[#allocation2] sm:$0xf] }
 0x1cb   : > { %2372 = vmatmul.mubr.msk.bf16.vlgmr.msra.gmra.mrb[4].mxu0 %vm696_vm0, %v725_v20 }
 0x1cc   : > { %2376 = vmatpush3.bf16.msra.mxu0 %v2570_v22  ;;  %2379 = vmatprep.mubr.msk.bf16.mxu0 %vm2792_vm1, %v2791_v8 }
 0x1cd   : > { %2377 = vmatprep.subr.bf16.mxu0 %v2791_v8 }
 0x1d0   : > { %2378 = vmatpush3.bf16.msra.mxu0 %v2571_v23 }
 0x1d1   : > { %2389 = vmatprep.subr.bf16.mxu0 %v2791_v8 }
 0x1d3   : > { %2380 = vmatmul.mubr.msk.bf16.vlgmr.msra.gmra.mrb[8].mxu0 %vm696_vm0, %v854_v24 }
 0x1d4   : > { %2391 = vmatprep.mubr.msk.bf16.mxu0 %vm2792_vm1, %v2791_v8 }
 0x296   : > { %v781_v25 = vpop.f32.mrb[0].mxu0 }
 0x297   : > { %v787_v26 = vpack.c.bf16 %v781_v25, %v781_v25  ;;  %v2365_v27 = vpop.f32.mrb[1].mxu0 }
 0x298   : > { %v784_v29 = vpop.f32.mrb[2].mxu0 }
 0x299   : > { %788 = vst.msk [vmem:[#allocation3] sm:$0xf] %vm726_vm2, %v787_v26  ;;  %v2366_v30 = vpop.f32.mrb[3].mxu0 }
 0x29e   : > { %v839_v32 = vpop.f32.mrb[4].mxu0 }
 0x29f   : > { %v845_v33 = vpack.c.bf16 %v839_v32, %v839_v32  ;;  %v2373_v34 = vpop.f32.mrb[5].mxu0 }
 0x2a0   : > { %v842_v37 = vpop.f32.mrb[6].mxu0  ;;  %v916_v38 = vld [vmem:[#allocation3] sm:$0xf] }
 0x2a1   : > { %846 = vst.msk [vmem:[#allocation4] sm:$0xf] %vm726_vm2, %v845_v33  ;;  %v2374_v40 = vpop.f32.mrb[7].mxu0  ;;  %v927_v41 = vsel %vm696_vm0, %v916_v38, 0 }
 0x2a2   : > { %2384 = vmatpush3.bf16.xpose.msra.mxu1 %v927_v41  ;;  %2390 = vmatpush3.bf16.xpose.msra.mxu0 %v927_v41 }
 0x2a3   : > { %2395 = vmatprep.subr.bf16.mxu1 %v2791_v8  ;;  %2401 = vmatprep.subr.bf16.mxu0 %v2791_v8 }
 0x2a6   : > { %v909_v46 = vpop.f32.mrb[8].mxu0 }
 0x2a7   : > { %v921_v47 = vmul.f32 %v920_v42, %v909_v46  ;;  %v988_v48 = vmul.f32 %v987_v43, %v909_v46  ;;  %v2381_v49 = vpop.f32.mrb[9].mxu0  ;;  %v1051_v56 = vmul.f32 %v1050_v53, %v909_v46  ;;  %v1114_v57 = vmul.f32 %v1113_v54, %v909_v46 }
 0x2a8   : > { %v912_v50 = vpop.f32.mrb[10].mxu0  ;;  %v1260_v58 = vld [vmem:[#allocation4] sm:$0xf] }
 0x2a9   : > { %v922_v51 = vpack.c.bf16 %v921_v47, %v921_v47  ;;  %v989_v52 = vpack.c.bf16 %v988_v48, %v988_v48  ;;  %v2382_v55 = vpop.f32.mrb[11].mxu0  ;;  %v1052_v59 = vpack.c.bf16 %v1051_v56, %v1051_v56  ;;  %v1115_v60 = vpack.c.bf16 %v1114_v57, %v1114_v57  ;;  %v2572_v39 = vld [vmem:[#allocation4] ss:$0 sps:$4 sm:$0xff]  }
 0x2aa   : > { %v1266_v61 = vsel %vm1264_vm3, %v1260_v58, 0  ;;  %v2573_v40 = vld [vmem:[#allocation4] ss:$0 sps:$4 sm:$0xff]  }
 0x2ab   : > { %2386 = vmatmul.mubr.msk.bf16.vlgmr.msra.gmra.mrb[0].mxu1 %vm696_vm0, %v922_v51  ;;  %2392 = vmatmul.mubr.msk.bf16.vlgmr.msra.gmra.mrb[12].mxu0 %vm696_vm0, %v989_v52 }
 0x2ac   : > { %2396 = vmatpush3.bf16.xpose.msra.mxu1 %v927_v41  ;;  %2402 = vmatpush3.bf16.xpose.msra.mxu0 %v927_v41  ;;  %v2574_v41 = vld [vmem:[#allocation4] ss:$0 sps:$4 sm:$0xff]  }
 0x2ad   : > { %2397 = vmatprep.mubr.msk.bf16.mxu1 %vm2792_vm1, %v2791_v8  ;;  %2403 = vmatprep.mubr.msk.bf16.mxu0 %vm2792_vm1, %v2791_v8 }
 0x2ae   : > { %2407 = vmatprep.subr.bf16.mxu1 %v2791_v8  ;;  %2413 = vmatprep.subr.bf16.mxu0 %v2791_v8 }
 0x2b3   : > { %2398 = vmatmul.mubr.msk.bf16.vlgmr.msra.gmra.mrb[4].mxu1 %vm696_vm0, %v1052_v59  ;;  %2404 = vmatmul.mubr.msk.bf16.vlgmr.msra.gmra.mrb[16].mxu0 %vm696_vm0, %v1115_v60 }
 0x2b4   : > { %2408 = vmatpush3.bf16.msra.mxu1 %v1266_v61  ;;  %2409 = vmatprep.mubr.msk.bf16.mxu1 %vm2792_vm1, %v2791_v8 }
 0x2b5   : > { %2415 = vmatprep.mubr.msk.bf16.mxu0 %vm2792_vm1, %v2791_v8  ;;  %2419 = vmatprep.subr.bf16.mxu1 %v2791_v8 }
 0x37e   : > { %v963_v62 = vpop.f32.mrb[0].mxu1  ;;  %v1027_v63 = vpop.f32.mrb[12].mxu0 }
 0x37f   : > { %v2387_v0 = vpop.f32.mrb[1].mxu1  ;;  %v2393_v1 = vpop.f32.mrb[13].mxu0  ;;  %v970_v2 = vsel %vm969_vm4, %v963_v62, -inf  ;;  %v1033_v7 = vsel %vm969_vm4, %v1027_v63, -inf }
 0x380   : > { %971 = vmax.xlane.f32.xlu1 %v970_v2  ;;  %v966_v3 = vpop.f32.mrb[2].mxu1  ;;  %v1030_v4 = vpop.f32.mrb[14].mxu0 }
 0x381   : > { %v2388_v5 = vpop.f32.mrb[3].mxu1  ;;  %v2394_v6 = vpop.f32.mrb[15].mxu0 }
 0x384   : > { %1034 = vmax.xlane.f32.xlu1 %v1033_v7 }
 0x386   : > { %v1090_v9 = vpop.f32.mrb[4].mxu1  ;;  %v1153_v10 = vpop.f32.mrb[16].mxu0 }
 0x387   : > { %v2399_v11 = vpop.f32.mrb[5].mxu1  ;;  %v2405_v12 = vpop.f32.mrb[17].mxu0  ;;  %v1096_v13 = vsel %vm969_vm4, %v1090_v9, -inf  ;;  %v1159_v14 = vsel %vm969_vm4, %v1153_v10, -inf }
 0x388   : > { %1097 = vmax.xlane.f32.xlu0 %v1096_v13  ;;  %v1093_v15 = vpop.f32.mrb[6].mxu1  ;;  %1160 = vmax.xlane.f32.xlu1 %v1159_v14  ;;  %v1156_v16 = vpop.f32.mrb[18].mxu0 }
 0x389   : > { %v2400_v17 = vpop.f32.mrb[7].mxu1  ;;  %v2406_v18 = vpop.f32.mrb[19].mxu0 }
 0x40d   : > { %v972_v19 = vpop.xlane.xlu1 %971 }
 0x40e   : > { %v973_v20 = vsub.f32 %v963_v62, %v972_v19 }
 0x410   : > { %v974_v21 = vmul.f32 1.442695, %v973_v20 }
 0x411   : > { %v1035_v22 = vpop.xlane.xlu1 %1034 }
 0x412   : > { %2589 = vpow2.f32 %v974_v21  ;;  %v1036_v23 = vsub.f32 %v1027_v63, %v1035_v22 }
 0x414   : > { %v1037_v24 = vmul.f32 1.442695, %v1036_v23 }
 0x415   : > { %v1098_v25 = vpop.xlane.xlu0 %1097  ;;  %v1161_v26 = vpop.xlane.xlu1 %1160 }
 0x416   : > { %2591 = vpow2.f32 %v1037_v24  ;;  %v1099_v27 = vsub.f32 %v1090_v9, %v1098_v25  ;;  %v1162_v28 = vsub.f32 %v1153_v10, %v1161_v26 }
 0x418   : > { %v1100_v29 = vmul.f32 1.442695, %v1099_v27  ;;  %v1163_v30 = vmul.f32 1.442695, %v1162_v28 }
 0x41a   : > { %2593 = vpow2.f32 %v1100_v29 }
 0x41b   : > { %2595 = vpow2.f32 %v1163_v30 }
 0x41c   : > { %v3128_v31 = vpop.eup %2589 }
 0x41d   : > { %v976_v32 = vsel %vm969_vm4, %v3128_v31, 0.0 }
 0x41e   : > { %977 = vadd.xlane.f32.xlu0 %v976_v32 }
 0x420   : > { %v3132_v33 = vpop.eup %2591 }
 0x421   : > { %v1039_v34 = vsel %vm969_vm4, %v3132_v33, 0.0 }
 0x422   : > { %1040 = vadd.xlane.f32.xlu1 %v1039_v34 }
 0x424   : > { %v3136_v35 = vpop.eup %2593 }
 0x425   : > { %v3138_v36 = vpop.eup %2595  ;;  %v1102_v37 = vsel %vm969_vm4, %v3136_v35, 0.0 }
 0x426   : > { %1103 = vadd.xlane.f32.xlu0 %v1102_v37  ;;  %v1165_v38 = vsel %vm969_vm4, %v3138_v36, 0.0 }
 0x427   : > { %1166 = vadd.xlane.f32.xlu1 %v1165_v38 }
 0x438   : > { %1549 = vrot.lane.b32.xlu1 %v2572_v39, %s2793_s27  ;;  %s1181_s27 = sand.u32 4294901760, %s1180_s2 }
 0x439   : > { %s3745_s27 = smov (%p1176_p1, %s1181_s27), 2143289344 }
 0x43a   : > { %s1184_s4 = sshrl.u32 %s3745_s27, 16  ;;  %s3197_s27 = sld [smem:[#allocation11 + $0x180]] }
 0x43c   : > { %1697 = vrot.lane.b32.xlu1 %v2573_v40, %s2794_s21  ;;  %1401 = vrot.lane.b32.xlu0 %v2574_v41, %s2795_s0  ;;  %s1196_s21 = sadd.s32 32767, %s1195_s7  ;;  %s1212_s0 = sshrl.u32 %s3144_s23, 16 }
 0x43d   : > { %s1197_s20 = sadd.s32 %s2261_s28, %s1196_s21  ;;  %s1213_s8 = sand.u32 1, %s1212_s0 }
 0x43e   : > { %s1198_s2 = sand.u32 4294901760, %s1197_s20  ;;  %s1214_s6 = sadd.s32 32767, %s1213_s8 }
 0x43f   : > { %s3747_s2 = smov (%p1193_p0, %s1198_s2), 2143289344  ;;  %s1215_s7 = sadd.s32 %s3144_s23, %s1214_s6 }
 0x440   : > { %s1233_s21 = sadd.s32 %s3146_s5, %s1232_s29  ;;  %s1247_s0 = sshrl.u32 %s3154_s26, 16 }
 0x441   : > { %s1216_s19 = sand.u32 4294901760, %s1215_s7  ;;  %s1234_s28 = sand.u32 4294901760, %s1233_s21 }
 0x442   : > { %s1248_s8 = sand.u32 1, %s1247_s0  ;;  %s3749_s19 = smov (%p1211_p4, %s1216_s19), 2143289344 }
 0x443   : > { %s3751_s28 = smov (%p1229_p8, %s1234_s28), 2143289344  ;;  %s1249_s20 = sadd.s32 32767, %s1248_s8 }
 0x444   : > { %s1331_s29 = sshrl.u32 %s3159_s18, 16  ;;  %s3173_s23 = sld [smem:[#allocation11 + $0x82]] }
 0x445   : > { %s1250_s6 = sadd.s32 %s1249_s20, %s3154_s26  ;;  %s1332_s7 = sand.u32 1, %s1331_s29 }
 0x446   : > { %s3176_s5 = sld [smem:[#allocation11 + $0x83]]  ;;  %s1251_s21 = sand.u32 4294901760, %s1250_s6 }
 0x447   : > { %s3181_s0 = sld [smem:[#allocation11 + $0x100]]  ;;  %s1333_s8 = sadd.s32 32767, %s1332_s7 }
 0x448   : > { %s3753_s21 = smov (%p1246_p10, %s1251_s21), 2143289344  ;;  %s1334_s24 = sadd.s32 %s3159_s18, %s1333_s8 }
 0x449   : > { %3707 = sst [smem:[#allocation33_spill]] %s3753_s21  ;;  %s1335_s3 = sand.u32 4294901760, %s1334_s24 }
 0x44a   : > { %s1349_s20 = sshrl.u32 %s3173_s23, 16  ;;  %s3199_s6 = sld [smem:[#allocation11 + $0x101]] }
 0x44b   : > { %s1350_s26 = sand.u32 1, %s1349_s20  ;;  %s1185_s7 = sshll.u32 %s1184_s4, 16 }
 0x44c   : > { %s1367_s29 = sshrl.u32 %s3176_s5, 16  ;;  %s1351_s16 = sadd.s32 32767, %s1350_s26 }
 0x44d   : > { %s1368_s25 = sand.u32 1, %s1367_s29  ;;  %s3757_s3 = smov (%p1330_p2, %s1335_s3), 2143289344 }
 0x44e   : > { %s1369_s8 = sadd.s32 32767, %s1368_s25  ;;  %s1352_s12 = sadd.s32 %s3173_s23, %s1351_s16 }
 0x44f   : > { %s1462_s18 = sshrl.u32 %s3181_s0, 16  ;;  %s3207_s20 = sor.u32 %s1185_s7, %s1184_s4 }
 0x450   : > { %3708 = sst [smem:[#allocation34_spill]] %s3207_s20  ;;  %s1384_s24 = sshrl.u32 %s3193_s14, 16 }
 0x451   : > { %p1348_p3 = scmp.ne.f32.partialorder %s3173_s23, %s3173_s23  ;;  %s1370_s29 = sadd.s32 %s3176_s5, %s1369_s8 }
 0x452   : > { %s1353_s11 = sand.u32 4294901760, %s1352_s12  ;;  %s1463_s26 = sand.u32 1, %s1462_s18 }
 0x453   : > { %p1366_p5 = scmp.ne.f32.partialorder %s3176_s5, %s3176_s5  ;;  %s1385_s25 = sand.u32 1, %s1384_s24 }
 0x454   : > { %s1201_s13 = sshrl.u32 %s3747_s2, 16  ;;  %s1371_s16 = sand.u32 4294901760, %s1370_s29 }
 0x455   : > { %s3759_s11 = smov (%p1348_p3, %s1353_s11), 2143289344  ;;  %s1386_s17 = sadd.s32 32767, %s1385_s25 }
 0x456   : > { %s1464_s4 = sadd.s32 32767, %s1463_s26  ;;  %s3761_s16 = smov (%p1366_p5, %s1371_s16), 2143289344 }
 0x457   : > { %s1219_s7 = sshrl.u32 %s3749_s19, 16  ;;  %s1479_s10 = sshrl.u32 %s3199_s6, 16 }
 0x458   : > { %s1387_s12 = sadd.s32 %s3193_s14, %s1386_s17  ;;  %s1465_s23 = sadd.s32 %s3181_s0, %s1464_s4 }
 0x459   : > { %s3226_s5 = sld [smem:[#allocation11 + $0x102]]  ;;  %s1480_s2 = sand.u32 1, %s1479_s10 }
 0x45a   : > { %s3228_s8 = sld [smem:[#allocation11 + $0x103]]  ;;  %s1388_s18 = sand.u32 4294901760, %s1387_s12 }
 0x45b   : > { %p1461_p7 = scmp.ne.f32.partialorder %s3181_s0, %s3181_s0  ;;  %s1202_s24 = sshll.u32 %s1201_s13, 16 }
 0x45c   : > { %s1466_s19 = sand.u32 4294901760, %s1465_s23  ;;  %s1220_s29 = sshll.u32 %s1219_s7, 16 }
 0x45d   : > { %s1481_s26 = sadd.s32 32767, %s1480_s2  ;;  %s3763_s18 = smov (%p1383_p6, %s1388_s18), 2143289344 }
 0x45e   : > { %s3765_s19 = smov (%p1461_p7, %s1466_s19), 2143289344  ;;  %s1237_s14 = sshrl.u32 %s3751_s28, 16 }
 0x45f   : > { %s1482_s17 = sadd.s32 %s3199_s6, %s1481_s26  ;;  %s1497_s25 = sshrl.u32 %s3226_s5, 16 }
 0x460   : > { %s3239_s10 = sld [smem:[#allocation12 + $0x2]]  ;;  %p1478_p9 = scmp.ne.f32.partialorder %s3199_s6, %s3199_s6 }
 0x461   : > { %s1515_s0 = sshrl.u32 %s3228_s8, 16  ;;  %s3244_s4 = sor.u32 %s1202_s24, %s1201_s13 }
 0x462   : > { %s1483_s12 = sand.u32 4294901760, %s1482_s17  ;;  %s3246_s23 = sor.u32 %s1220_s29, %s1219_s7  ;;  %v1204_v60 = vstv %s3244_s4 }
 0x463   : > { %s1498_s2 = sand.u32 1, %s1497_s25  ;;  %s1238_s30 = sshll.u32 %s1237_s14, 16  ;;  %v1222_v11 = vstv %s3246_s23 }
 0x464   : > { %s1516_s28 = sand.u32 1, %s1515_s0  ;;  %s3767_s12 = smov (%p1478_p9, %s1483_s12), 2143289344 }
 0x465   : > { %s3656_s26 = sshrl.u32 %s3753_s21, 16  ;;  %s1499_s22 = sadd.s32 32767, %s1498_s2 }
 0x466   : > { %s1321_s6 = sshrl.u32 %s3755_s1, 16  ;;  %s1517_s9 = sadd.s32 32767, %s1516_s28 }
 0x467   : > { %s3252_s20 = sor.u32 %s1238_s30, %s1237_s14  ;;  %s1532_s13 = sshrl.u32 %s3239_s10, 16 }
 0x468   : > { %s3257_s24 = sshll.u32 %s3656_s26, 16  ;;  %s1500_s7 = sadd.s32 %s3226_s5, %s1499_s22  ;;  %v1240_v12 = vstv %s3252_s20 }
 0x469   : > { %3709 = sst [smem:[#allocation35_spill]] %s3257_s24  ;;  %s1322_s29 = sshll.u32 %s1321_s6, 16 }
 0x46a   : > { %s1518_s17 = sadd.s32 %s3228_s8, %s1517_s9  ;;  %p1496_p12 = scmp.ne.f32.partialorder %s3226_s5, %s3226_s5 }
 0x46b   : > { %s1533_s25 = sand.u32 1, %s1532_s13  ;;  %s1501_s0 = sand.u32 4294901760, %s1500_s7 }
 0x46c   : > { %p1514_p13 = scmp.ne.f32.partialorder %s3228_s8, %s3228_s8  ;;  %s1338_s1 = sshrl.u32 %s3757_s3, 16 }
 0x46d   : > { %s1519_s30 = sand.u32 4294901760, %s1518_s17  ;;  %s1534_s14 = sadd.s32 32767, %s1533_s25 }
 0x46e   : > { %s1610_s2 = sshrl.u32 %s3197_s27, 16  ;;  %s3769_s0 = smov (%p1496_p12, %s1501_s0), 2143289344 }
 0x46f   : > { %s3771_s30 = smov (%p1514_p13, %s1519_s30), 2143289344  ;;  %s1339_s22 = sshll.u32 %s1338_s1, 16 }
 0x470   : > { %s1535_s28 = sadd.s32 %s3239_s10, %s1534_s14  ;;  %s1611_s9 = sand.u32 1, %s1610_s2 }
 0x471   : > { %s3272_s26 = sld [smem:[#allocation11 + $0x182]]  ;;  %p1531_p1 = scmp.ne.f32.partialorder %s3239_s10, %s3239_s10 }
 0x472   : > { %s1627_s5 = sshrl.u32 %s3203_s15, 16  ;;  %s3277_s8 = sor.u32 %s1322_s29, %s1321_s6 }
 0x473   : > { %s1536_s3 = sand.u32 4294901760, %s1535_s28  ;;  %s1356_s13 = sshrl.u32 %s3759_s11, 16  ;;  %v1324_v2 = vstv %s3277_s8 }
 0x474   : > { %s1612_s7 = sadd.s32 32767, %s1611_s9  ;;  %s3280_s17 = sor.u32 %s1339_s22, %s1338_s1 }
 0x475   : > { %s1628_s25 = sand.u32 1, %s1627_s5  ;;  %s3773_s3 = smov (%p1531_p1, %s1536_s3), 2143289344  ;;  %v1341_v61 = vstv %s3280_s17 }
 0x476   : > { %s1357_s14 = sshll.u32 %s1356_s13, 16  ;;  %s1613_s2 = sadd.s32 %s3197_s27, %s1612_s7 }
 0x477   : > { %s1629_s24 = sadd.s32 32767, %s1628_s25  ;;  %s3285_s21 = sld [smem:[#allocation11 + $0x183]] }
 0x478   : > { %p1609_p0 = scmp.ne.f32.partialorder %s3197_s27, %s3197_s27  ;;  %s1645_s10 = sshrl.u32 %s3272_s26, 16 }
 0x479   : > { %s3290_s11 = sor.u32 %s1357_s14, %s1356_s13  ;;  %s1614_s6 = sand.u32 4294901760, %s1613_s2 }
 0x47a   : > { %s1374_s29 = sshrl.u32 %s3761_s16, 16  ;;  %s1630_s1 = sadd.s32 %s3203_s15, %s1629_s24  ;;  %v1359_v13 = vstv %s3290_s11 }
 0x47b   : > { %p1626_p4 = scmp.ne.f32.partialorder %s3203_s15, %s3203_s15  ;;  %s1646_s22 = sand.u32 1, %s1645_s10 }
 0x47c   : > { %s3775_s6 = smov (%p1609_p0, %s1614_s6), 2143289344  ;;  %s1375_s28 = sshll.u32 %s1374_s29, 16 }
 0x47d   : > { %s1631_s27 = sand.u32 4294901760, %s1630_s1  ;;  %s1647_s9 = sadd.s32 32767, %s1646_s22 }
 0x47e   : > { %s3298_s5 = sld [smem:[#allocation12 + $0x3]]  ;;  %s1469_s13 = sshrl.u32 %s3765_s19, 16 }
 0x47f   : > { %s1663_s7 = sshrl.u32 %s3285_s21, 16  ;;  %s3777_s27 = smov (%p1626_p4, %s1631_s27), 2143289344 }
 0x480   : > { %s3304_s15 = sor.u32 %s1375_s28, %s1374_s29  ;;  %s1648_s16 = sadd.s32 %s3272_s26, %s1647_s9 }
 0x481   : > { %s1470_s24 = sshll.u32 %s1469_s13, 16  ;;  %s1664_s25 = sand.u32 1, %s1663_s7  ;;  %v1377_v24 = vstv %s3304_s15 }
 0x482   : > { %s1486_s14 = sshrl.u32 %s3767_s12, 16  ;;  %p1644_p8 = scmp.ne.f32.partialorder %s3272_s26, %s3272_s26 }
 0x483   : > { %s1391_s19 = sshrl.u32 %s3763_s18, 16  ;;  %s1649_s2 = sand.u32 4294901760, %s1648_s16 }
 0x484   : > { %s3313_s10 = sor.u32 %s1470_s24, %s1469_s13  ;;  %s1665_s29 = sadd.s32 32767, %s1664_s25 }
 0x485   : > { %s1487_s12 = sshll.u32 %s1486_s14, 16  ;;  %s1680_s1 = sshrl.u32 %s3298_s5, 16  ;;  %v1472_v14 = vstv %s3313_s10 }
 0x486   : > { %s3779_s2 = smov (%p1644_p8, %s1649_s2), 2143289344  ;;  %s1504_s22 = sshrl.u32 %s3769_s0, 16 }
 0x487   : > { %s1666_s28 = sadd.s32 %s3285_s21, %s1665_s29  ;;  %s3326_s9 = sor.u32 %s1487_s12, %s1486_s14 }
 0x488   : > { %s1681_s13 = sand.u32 1, %s1680_s1  ;;  %s1634_s7 = sshrl.u32 %s3777_s27, 16  ;;  %v1489_v7 = vstv %s3326_s9 }
 0x489   : > { %p1662_p10 = scmp.ne.f32.partialorder %s3285_s21, %s3285_s21  ;;  %s3333_s26 = sshll.u32 %s1504_s22, 16 }
 0x48a   : > { %s1667_s16 = sand.u32 4294901760, %s1666_s28  ;;  %s1617_s24 = sshrl.u32 %s3775_s6, 16 }
 0x48b   : > { %s1682_s25 = sadd.s32 32767, %s1681_s13  ;;  %s1635_s21 = sshll.u32 %s1634_s7, 16 }
 0x48c   : > { %s1652_s27 = sshrl.u32 %s3779_s2, 16  ;;  %s3710_s14 = sld [smem:[#allocation34_spill]] }
 0x48d   : > { %s3781_s16 = smov (%p1662_p10, %s1667_s16), 2143289344  ;;  %s1522_s29 = sshrl.u32 %s3771_s30, 16 }
 0x48e   : > { %s3344_s12 = sadd.s32 %s3298_s5, %s1682_s25  ;;  %s1618_s6 = sshll.u32 %s1617_s24, 16 }
 0x48f   : > { %s3347_s1 = sor.u32 %s1635_s21, %s1634_s7  ;;  %s1653_s28 = sshll.u32 %s1652_s27, 16 }
 0x490   : > { %p1679_p11 = scmp.ne.f32.partialorder %s3298_s5, %s3298_s5  ;;  %s1670_s13 = sshrl.u32 %s3781_s16, 16  ;;  %v1637_v10 = vstv %s3347_s1 }
 0x491   : > { %s1684_s25 = sand.u32 4294901760, %s3344_s12  ;;  %s3363_s4 = sor.u32 %s3333_s26, %s1504_s22 }
 0x492   : > { %v1187_v63 = vstv %s3710_s14  ;;  %s3365_s17 = sor.u32 %s1618_s6, %s1617_s24  ;;  %s3369_s7 = sshll.u32 %s1391_s19, 16  ;;  %v1507_v18 = vstv %s3363_s4 }
 0x493   : > { %s3375_s0 = sor.u32 %s1653_s28, %s1652_s27  ;;  %s1523_s8 = sshll.u32 %s1522_s29, 16  ;;  %v1620_v20 = vstv %s3365_s17 }
 0x494   : > { %s3385_s22 = sshll.u32 %s1670_s13, 16  ;;  %s3711_s9 = sld [smem:[#allocation33_spill]]  ;;  %v1655_v28 = vstv %s3375_s0 }
 0x495   : > { %s3712_s26 = sld [smem:[#allocation35_spill]]  ;;  %s3783_s25 = smov (%p1679_p11, %s1684_s25), 2143289344 }
 0x496   : > { %s1393_s11 = sor.u32 %s3369_s7, %s1391_s19  ;;  %s3406_s5 = sor.u32 %s1523_s8, %s1522_s29 }
 0x497   : > { %s1539_s15 = sshrl.u32 %s3773_s3, 16  ;;  %s1672_s2 = sor.u32 %s3385_s22, %s1670_s13 }
 0x498   : > { %s1687_s10 = sshrl.u32 %s3783_s25, 16  ;;  %s1540_s18 = sshll.u32 %s1539_s15, 16 }
 0x499   : > { %s1688_s30 = sshll.u32 %s1687_s10, 16  ;;  %s1541_s19 = sor.u32 %s1540_s18, %s1539_s15 }
 0x49a   : > { %s3713_s20 = sshrl.u32 %s3711_s9, 16  ;;  %s1689_s16 = sor.u32 %s1688_s30, %s1687_s10 }
 0x49b   : > { %s3399_s23 = sor.u32 %s3712_s26, %s3713_s20  ;;  %s3714_s21 = sld [smem:[#allocation45_spill]] }
 0x49c   : > { %s2796_s29 = smov 8   ;;  %s2797_s12 = smov 16  }
 0x49d   : > { %s2798_s6 = smov 24   ;;  %s3715_s1 = sld [smem:[#allocation23_spill]] }
 0x49e   : > { %s3716_s28 = sld [smem:[#allocation32_spill]]  ;;  %s3717_s4 = sld [smem:[#allocation46_spill]] }
 0x49f   : > { %s3718_s8 = sld [smem:[#allocation53_spill]]  ;;  %s3721_s18 = sld [smem:[#allocation47_spill]] }
 0x4a0   : > { %s3723_s27 = sld [smem:[#allocation51_spill]]  ;;  %s3724_s15 = sld [smem:[#allocation50_spill]] }
 0x4a1   : > { %s3726_s10 = sld [smem:[#allocation29_spill]] }
 0x4a3   : > { %s3451_s17 = sand.u32 1, %s3715_s1  }
 0x4a4   : > { %s2243_s22 = sshll.u32 %s3451_s17, 3  ;;  %s2060_s14 = scalar_lea.sflag [#allocation9], %s3451_s17 }
 0x4a5   : > { %s3464_s9 = scalar_lea.vmem [#allocation14], %s2243_s22 }
 0x4a6   : > { %s2079_s24 = sshll.u32 %s3464_s9, 4  ;;  %s2080_s24 = int_to_ptr.vmem [resolvable:$true] %s2079_s24 }
 0x4a7   : > { %p3728_p3 = scmp.ne.s32.totalorder %s3726_s10, 0 }
 0x4ab   : > { %v978_v42 = vpop.xlane.xlu0 %977 }
 0x4ac   : > { %2597 = vrcp.f32 %v978_v42 }
 0x4af   : > { %v1041_v43 = vpop.xlane.xlu1 %1040 }
 0x4b0   : > { %2599 = vrcp.f32 %v1041_v43 }
 0x4b3   : > { %v1104_v44 = vpop.xlane.xlu0 %1103 }
 0x4b4   : > { %2601 = vrcp.f32 %v1104_v44  ;;  %v1167_v45 = vpop.xlane.xlu1 %1166  ;;  %v1257_v44 = vstv %s3399_s23  ;;  %s3719_s23 = sld [smem:[#allocation49_spill]] }
 0x4b5   : > { %2603 = vrcp.f32 %v1167_v45  ;;  %v1394_v45 = vstv %s1393_s11 }
 0x4b6   : > { %v2598_v46 = vpop.eup %2597 }
 0x4b7   : > { %v980_v47 = vmul.f32 %v2598_v46, %v3128_v31  ;;  %v1402_v48 = vpop.permute.xlu0 %1401 }
 0x4b8   : > { %v1407_v49 = vsel %vm1264_vm3, %v1402_v48, 0  ;;  %v1550_v21 = vpop.permute.xlu1 %1549 }
 0x4b9   : > { %v981_v50 = vpack.c.bf16 %v980_v47, %v980_v47  ;;  %2414 = vmatpush3.bf16.msra.mxu0 %v1407_v49 }
 0x4ba   : > { %v2600_v51 = vpop.eup %2599  ;;  %2425 = vmatprep.subr.bf16.mxu0 %v2791_v8  ;;  %s3720_s11 = smov %s3719_s23 }
 0x4bb   : > { %983 = vst.msk [vmem:[#allocation5] sm:$0xf] %vm982_vm5, %v981_v50  ;;  %v1043_v52 = vmul.f32 %v2600_v51, %v3132_v33 }
 0x4bc   : > { %v1698_v50 = vpop.permute.xlu1 %1697 }
 0x4bd   : > { %v1044_v53 = vpack.c.bf16 %v1043_v52, %v1043_v52  ;;  %v1525_v52 = vstv %s3406_s5 }
 0x4be   : > { %v2602_v54 = vpop.eup %2601 }
 0x4bf   : > { %v2604_v55 = vpop.eup %2603  ;;  %1046 = vst.msk [vmem:[#allocation5 + $0x4] sm:$0xf] %vm982_vm5, %v1044_v53  ;;  %v1106_v56 = vmul.f32 %v2602_v54, %v3136_v35  ;;  %v1673_v54 = vstv %s1672_s2  ;;  %s3725_s2 = sld [smem:[#allocation25_spill]] }
 0x4c0   : > { %v1169_v57 = vmul.f32 %v2604_v55, %v3138_v36 }
 0x4c1   : > { %v1107_v58 = vpack.c.bf16 %v1106_v56, %v1106_v56 }
 0x4c2   : > { %v1170_v59 = vpack.c.bf16 %v1169_v57, %v1169_v57  ;;  %v1173_v62 = vld [vmem:[#allocation5] sm:$0xf] }
 0x4c3   : > { %1109 = vst.msk [vmem:[#allocation5 + $0x8] sm:$0xf] %vm982_vm5, %v1107_v58  ;;  %v1310_v1 = vld [vmem:[#allocation5] sm:$0xf]  ;;  %v1189_v15 = vmul.bf16 %v1187_v63, %v1173_v62 }
 0x4c4   : > { %1172 = vst.msk [vmem:[#allocation5 + $0xc] sm:$0xf] %vm982_vm5, %v1170_v59  ;;  %v1326_v16 = vmul.bf16 %v1324_v2, %v1310_v1  ;;  %v1458_v17 = vld [vmem:[#allocation5] sm:$0xf]  ;;  %v1555_v59 = vsel %vm1264_vm3, %v1550_v21, 0  ;;  %v1542_v1 = vstv %s1541_s19  ;;  %v1690_v2 = vstv %s1689_s16  ;;  %s3722_s16 = sld [smem:[#allocation48_spill]] }
 0x4c5   : > { %v1606_v19 = vld [vmem:[#allocation5] sm:$0xf]  ;;  %v1474_v36 = vmul.bf16 %v1472_v14, %v1458_v17 }
 0x4c6   : > { %v1190_v0 = vld [vmem:[#allocation5 + $0x4] sm:$0xf]  ;;  %v1622_v38 = vmul.bf16 %v1620_v20, %v1606_v19 }
 0x4c7   : > { %v1327_v3 = vld [vmem:[#allocation5 + $0x4] sm:$0xf]  ;;  %v1206_v4 = vmul.bf16 %v1204_v60, %v1190_v0  ;;  %v1703_v60 = vsel %vm1264_vm3, %v1698_v50, 0 }
 0x4c8   : > { %v1343_v5 = vmul.bf16 %v1341_v61, %v1327_v3  ;;  %v1475_v6 = vld [vmem:[#allocation5 + $0x4] sm:$0xf] }
 0x4c9   : > { %v1623_v9 = vld [vmem:[#allocation5 + $0x4] sm:$0xf]  ;;  %v1491_v25 = vmul.bf16 %v1489_v7, %v1475_v6  ;;  %v1207_v29 = vadd.bf16 %v1206_v4, %v1189_v15 }
 0x4ca   : > { %v1208_v22 = vld [vmem:[#allocation5 + $0x8] sm:$0xf]  ;;  %v1639_v27 = vmul.bf16 %v1637_v10, %v1623_v9  ;;  %v1344_v32 = vadd.bf16 %v1343_v5, %v1326_v16  ;;  %v2575_v5 = vld [vmem:[%s3714_s21] sm:$0xff]  }
 0x4cb   : > { %v1345_v23 = vld [vmem:[#allocation5 + $0x8] sm:$0xf]  ;;  %v1224_v30 = vmul.bf16 %v1222_v11, %v1208_v22  ;;  %v1226_v31 = vld [vmem:[#allocation5 + $0xc] sm:$0xf]  ;;  %v1492_v48 = vadd.bf16 %v1491_v25, %v1474_v36 }
 0x4cc   : > { %v1493_v26 = vld [vmem:[#allocation5 + $0x8] sm:$0xf]  ;;  %v1361_v33 = vmul.bf16 %v1359_v13, %v1345_v23  ;;  %v1363_v34 = vld [vmem:[#allocation5 + $0xc] sm:$0xf]  ;;  %v1242_v35 = vmul.bf16 %v1240_v12, %v1226_v31  ;;  %v1640_v49 = vadd.bf16 %v1639_v27, %v1622_v38  ;;  %v2576_v13 = vld [vmem:[%s3714_s21 + $0x8] sm:$0xff]  }
 0x4cd   : > { %v1509_v37 = vmul.bf16 %v1507_v18, %v1493_v26  ;;  %v1641_v39 = vld [vmem:[#allocation5 + $0x8] sm:$0xf]  ;;  %v1225_v40 = vadd.bf16 %v1224_v30, %v1207_v29  ;;  %v1379_v42 = vmul.bf16 %v1377_v24, %v1363_v34  ;;  %v1511_v51 = vld [vmem:[#allocation5 + $0xc] sm:$0xf]  ;;  %v2293_v34 = vld [vmem:[%s3718_s8] ss:$0 sm:$0xff] }
 0x4ce   : > { %v1362_v41 = vadd.bf16 %v1361_v33, %v1344_v32  ;;  %v1657_v43 = vmul.bf16 %v1655_v28, %v1641_v39  ;;  %v1659_v53 = vld [vmem:[#allocation5 + $0xc] sm:$0xf]  ;;  %v1527_v61 = vmul.bf16 %v1525_v52, %v1511_v51  ;;  %v2289_v32 = vld [vmem:[%s3717_s4] ss:$0 sm:$0xff] }
 0x4cf   : > { %v1243_v46 = vadd.bf16 %v1242_v35, %v1225_v40  ;;  %v1510_v57 = vadd.bf16 %v1509_v37, %v1492_v48  ;;  %v1675_v62 = vmul.bf16 %v1673_v54, %v1659_v53  ;;  %v2609_v40 = vld [vmem:[%s3716_s28] sm:$0xff] }
 0x4d0   : > { %v1380_v47 = vadd.bf16 %v1379_v42, %v1362_v41  ;;  %v1658_v58 = vadd.bf16 %v1657_v43, %v1640_v49  ;;  %v2577_v48 = vld [vmem:[%s3719_s23] sm:$0xff]   ;;  %v2578_v49 = vld [vmem:[%s3720_s11 + $0x8] sm:$0xff]  }
 0x4d1   : > { %v1259_v55 = vadd.bf16 %v1257_v44, %v1243_v46  ;;  %v1528_v63 = vadd.bf16 %v1527_v61, %v1510_v57  ;;  %v2294_v54 = vld [vmem:[%s3721_s18] ss:$0 sm:$0xff]  ;;  %v2580_v61 = vld [vmem:[%s3723_s27 + $0x8] sm:$0xff]   ;;  %s2312_s18 = sshll.u32 %s3725_s2, 7 }
 0x4d2   : > { %v1396_v56 = vadd.bf16 %v1394_v45, %v1380_v47  ;;  %v1676_v0 = vadd.bf16 %v1675_v62, %v1658_v58  ;;  %v2581_v62 = vld [vmem:[%s3723_s27 + $0x10] sm:$0xff]  }
 0x4d3   : > { %2410 = vmatmul.mubr.msk.bf16.vlgmr.msra.gmra.mrb[8].mxu1 %vm969_vm4, %v1259_v55  ;;  %v1544_v3 = vadd.bf16 %v1542_v1, %v1528_v63  ;;  %v2582_v63 = vld [vmem:[%s3723_s27 + $0x18] sm:$0xff]   ;;  %v2584_v1 = vld [vmem:[%s3723_s27 + $0x28] sm:$0xff]  }
 0x4d4   : > { %2416 = vmatmul.mubr.msk.bf16.vlgmr.msra.gmra.mrb[20].mxu0 %vm969_vm4, %v1396_v56  ;;  %2420 = vmatpush3.bf16.msra.mxu1 %v1555_v59  ;;  %v1692_v4 = vadd.bf16 %v1690_v2, %v1676_v0  ;;  %v2295_v56 = vld [vmem:[%s3722_s16] ss:$0 sm:$0xff]  ;;  %v2585_v2 = vld [vmem:[%s3723_s27 + $0x30] sm:$0xff]   ;;  %s3727_s16 = sld [smem:[#allocation55_spill]] }
 0x4d5   : > { %2426 = vmatpush3.bf16.msra.mxu0 %v1703_v60  ;;  %2421 = vmatprep.mubr.msk.bf16.mxu1 %vm2792_vm1, %v2791_v8  ;;  %v2579_v60 = vld [vmem:[%s3723_s27] sm:$0xff]  }
 0x4d6   : > { %2427 = vmatprep.mubr.msk.bf16.mxu0 %vm2792_vm1, %v2791_v8  ;;  %2431 = vmatprep.subr.bf16.mxu1 %v2791_v8  ;;  %v2583_v0 = vld [vmem:[%s3723_s27 + $0x20] sm:$0xff]  }
 0x4d7   : > { %2439 = vmatprep.subr.bf16.mxu0 %v2791_v8 }
 0x4da   : > { %s3525_s3 = scalar_lea.hbm %s3727_s16, %s2312_s18 }
 0x4db   : > { %2422 = vmatmul.mubr.msk.bf16.vlgmr.msra.gmra.mrb[12].mxu1 %vm969_vm4, %v1544_v3  ;;  %v2586_v3 = vld [vmem:[%s3723_s27 + $0x38] sm:$0xff]  }
 0x4dc   : > { %2428 = vmatmul.mubr.msk.bf16.vlgmr.msra.gmra.mrb[24].mxu0 %vm969_vm4, %v1692_v4  ;;  %2435 = vmatprep.mubr.msk.bf16.mxu1 %vm2792_vm1, %v2791_v8  ;;  %v2296_v4 = vld [vmem:[%s3724_s15] ss:$0 sm:$0xff] }
 0x4dd   : > { %2443 = vmatprep.mubr.msk.bf16.mxu0 %vm2792_vm1, %v2791_v8  ;;  %2432 = vmatpush3.bf16.msra.mxu1 %v2575_v5 }
 0x4de   : > { %2433 = vmatprep.subr.bf16.mxu1 %v2791_v8  ;;  %2440 = vmatpush3.bf16.msra.mxu0 %v2577_v48 }
 0x4df   : > { %2441 = vmatprep.subr.bf16.mxu0 %v2791_v8 }
 0x4e1   : > { %2434 = vmatpush3.bf16.msra.mxu1 %v2576_v13 }
 0x4e2   : > { %2447 = vmatprep.subr.bf16.mxu1 %v2791_v8  ;;  %2442 = vmatpush3.bf16.msra.mxu0 %v2578_v49 }
 0x5a6   : > { %v1302_v6 = vpop.f32.mrb[8].mxu1 }
 0x5a7   : > { %v1443_v7 = vpop.f32.mrb[20].mxu0  ;;  %v1308_v9 = vpack.c.bf16 %v1302_v6, %v1302_v6  ;;  %v2411_v11 = vpop.f32.mrb[9].mxu1 }
 0x5a8   : > { %v2316_v10 = vpack.c.bf16 %v1443_v7, %v1443_v7  ;;  %v2417_v12 = vpop.f32.mrb[21].mxu0  ;;  %v1305_v14 = vpop.f32.mrb[10].mxu1 }
 0x5a9   : > { %v1446_v15 = vpop.f32.mrb[22].mxu0  ;;  %1309 = vst.msk [vmem:[#allocation6] sm:$0xf] %vm982_vm5, %v1308_v9  ;;  %v2412_v16 = vpop.f32.mrb[11].mxu1 }
 0x5aa   : > { %1453 = vrot.lane.b32.xlu1 %v2316_v10, %s2796_s29  ;;  %v2418_v17 = vpop.f32.mrb[23].mxu0  ;;  %s2664_s29 = scalar_lea.vmem %s2080_s24, 128 }
 0x5ab   : > { %p2665_p2 = scmp.ne.s32.totalorder %s2080_s24, %s2664_s29 }
 0x5ad   : > { %p2666_p5 = pnand %p2665_p2, %p3728_p3 }
 0x5ae   : > { %v1591_v18 = vpop.f32.mrb[12].mxu1 }
 0x5af   : > { %v1739_v19 = vpop.f32.mrb[24].mxu0  ;;  %v2317_v20 = vpack.c.bf16 %v1591_v18, %v1591_v18  ;;  %v2423_v22 = vpop.f32.mrb[13].mxu1  ;;  %p2667_p6 = pneg %p2666_p5 }
 0x5b0   : > { %v2318_v21 = vpack.c.bf16 %v1739_v19, %v1739_v19  ;;  %v2429_v23 = vpop.f32.mrb[25].mxu0  ;;  %v1594_v24 = vpop.f32.mrb[14].mxu1 }
 0x5b1   : > { %v1742_v25 = vpop.f32.mrb[26].mxu0  ;;  %1601 = vrot.lane.b32.xlu0 %v2317_v20, %s2797_s12  ;;  %v2424_v26 = vpop.f32.mrb[15].mxu1  ;;  %s2799_s12 = smov [#allocation14]  }
 0x5b2   : > { %1749 = vrot.lane.b32.xlu1 %v2318_v21, %s2798_s6  ;;  %v2430_v27 = vpop.f32.mrb[27].mxu0  ;;  %s2668_s6 = sshll.u32 %s2799_s12, 4  ;;  %s2669_s6 = int_to_ptr.vmem [resolvable:$false] %s2668_s6 }
 0x5b3   : > { %s2670_s1 = scalar_lea.vmem %s2669_s6, 256  ;;  %p2671_p7 = scmp.lt.s32.totalorder %s2080_s24, %s2669_s6 }
 0x5b4   : > { %p2672_p9 = scmp.lt.s32.totalorder %s2670_s1, %s2664_s29 }
 0x5b6   : > { %p2673_p12 = por %p2672_p9, %p2671_p7 }
 0x5b8   : > { %p2674_p13 = pnand %p2673_p12, %p2667_p6 }
 0x61c   : > { %v1454_v28 = vpop.permute.xlu1 %1453 }
 0x61d   : > { %1457 = vst.msk [vmem:[#allocation6] sm:$0xf] %vm1456_vm6, %v1454_v28 }
 0x623   : > { %v1602_v29 = vpop.permute.xlu0 %1601 }
 0x624   : > { %v1750_v30 = vpop.permute.xlu1 %1749  ;;  %1605 = vst.msk [vmem:[#allocation6] sm:$0xf] %vm1604_vm7, %v1602_v29 }
 0x625   : > { %1753 = vst.msk [vmem:[#allocation6] sm:$0xf] %vm1752_vm8, %v1750_v30 }
 0x62c   : > { %v1754_v31 = vld [vmem:[#allocation6] sm:$0xf] }
 0x62d   : > { %2436 = vmatmul.mubr.msk.bf16.vlgmr.msra.gmra.mrb[16].mxu1 %vm696_vm0, %v1754_v31 }
 0x62e   : > { %2463 = vmatprep.mubr.msk.bf16.mxu1 %vm2792_vm1, %v2791_v8  ;;  %2448 = vmatpush3.bf16.msra.mxu1 %v2579_v60 }
 0x62f   : > { %2449 = vmatprep.subr.bf16.mxu1 %v2791_v8 }
 0x632   : > { %2450 = vmatpush3.bf16.msra.mxu1 %v2580_v61 }
 0x633   : > { %2451 = vmatprep.subr.bf16.mxu1 %v2791_v8 }
 0x636   : > { %2452 = vmatpush3.bf16.msra.mxu1 %v2581_v62 }
 0x637   : > { %2453 = vmatprep.subr.bf16.mxu1 %v2791_v8 }
 0x63a   : > { %2454 = vmatpush3.bf16.msra.mxu1 %v2582_v63 }
 0x63b   : > { %2455 = vmatprep.subr.bf16.mxu1 %v2791_v8 }
 0x63e   : > { %2456 = vmatpush3.bf16.msra.mxu1 %v2583_v0 }
 0x63f   : > { %2457 = vmatprep.subr.bf16.mxu1 %v2791_v8 }
 0x642   : > { %2458 = vmatpush3.bf16.msra.mxu1 %v2584_v1 }
 0x643   : > { %2459 = vmatprep.subr.bf16.mxu1 %v2791_v8 }
 0x646   : > { %2460 = vmatpush3.bf16.msra.mxu1 %v2585_v2 }
 0x647   : > { %2461 = vmatprep.subr.bf16.mxu1 %v2791_v8 }
 0x64a   : > { %2462 = vmatpush3.bf16.msra.mxu1 %v2586_v3 }
 0x700   : > { %v1815_v33 = vpop.f32.mrb[16].mxu1 }
 0x701   : > { %v1816_v35 = vadd.f32 %v2289_v32, %v1815_v33  ;;  %v2437_v36 = vpop.f32.mrb[17].mxu1 }
 0x702   : > { %v1818_v37 = vpop.f32.mrb[18].mxu1 }
 0x703   : > { %v1828_v38 = vmul.f32 %v2293_v34, %v1816_v35  ;;  %v2438_v39 = vpop.f32.mrb[19].mxu1 }
 0x705   : > { %v3458_v41 = vadd.f32 %v2609_v40, %v1828_v38 }
 0x707   : > { %v1832_v42 = vsel %vm696_vm0, %v3458_v41, 0.0  ;;  %2057 = vst.msk [vmem:[%s3464_s9] sm:$0xff] %vm696_vm0, %v3458_v41 }
 0x708   : > { %1833 = vadd.xlane.f32.xlu0 %v1832_v42 }
 0x795   : > { %v1834_v43 = vpop.xlane.xlu0 %1833 }
 0x796   : > { %v1836_v44 = vmul.f32 0.03125, %v1834_v43 }
 0x798   : > { %v1837_v45 = vsub.f32 %v3458_v41, %v1836_v44 }
 0x79a   : > { %v1838_v46 = vmul.f32 %v1837_v45, %v1837_v45 }
 0x79c   : > { %v1839_v47 = vsel %vm696_vm0, %v1838_v46, 0.0 }
 0x79d   : > { %1840 = vadd.xlane.f32.xlu1 %v1839_v47 }
 0x82a   : > { %v1841_v50 = vpop.xlane.xlu1 %1840 }
 0x82b   : > { %v1842_v51 = vmul.f32 0.03125, %v1841_v50 }
 0x82d   : > { %v1843_v52 = vadd.f32 1e-05, %v1842_v51 }
 0x82f   : > { %2605 = vrsqrt.f32 %v1843_v52 }
 0x839   : > { %v2606_v53 = vpop.eup %2605 }
 0x83a   : > { %v1845_v55 = vmul.f32 %v2606_v53, %v1837_v45 }
 0x83c   : > { %v1852_v57 = vmul.f32 %v2294_v54, %v1845_v55 }
 0x83e   : > { %v1859_v58 = vadd.f32 %v2295_v56, %v1852_v57 }
 0x840   : > { %v1860_v59 = vpack.c.bf16 %v1859_v58, %v1859_v58 }
 0x842   : > { %2444 = vmatmul.mubr.msk.bf16.vlgmr.msra.gmra.mrb[28].mxu0 %vm696_vm0, %v1860_v59 }
 0x915   : > { %v1921_v5 = vpop.f32.mrb[28].mxu0 }
 0x916   : > { %v1922_v6 = vadd.f32 %v2296_v4, %v1921_v5  ;;  %v2445_v7 = vpop.f32.mrb[29].mxu0 }
 0x917   : > { %v1924_v9 = vpop.f32.mrb[30].mxu0 }
 0x918   : > { %v1927_v10 = vmul.f32 %v1922_v6, %v1922_v6  ;;  %v2446_v11 = vpop.f32.mrb[31].mxu0 }
 0x91a   : > { %v1928_v12 = vmul.f32 %v1927_v10, %v1922_v6 }
 0x91c   : > { %v1929_v13 = vmul.f32 0.044715, %v1928_v12 }
 0x91e   : > { %v1930_v14 = vadd.f32 %v1929_v13, %v1922_v6 }
 0x920   : > { %v1931_v8 = vmul.f32 0.7978846, %v1930_v14 }
 0x922   : > { %2607 = vtanh.f32 %v1931_v8 }
 0x92c   : > { %v2608_v15 = vpop.eup %2607 }
 0x92d   : > { %v1933_v16 = vadd.f32 1.0, %v2608_v15 }
 0x92f   : > { %v1934_v17 = vmul.f32 0.5, %v1933_v16 }
 0x931   : > { %v1935_v18 = vmul.f32 %v1934_v17, %v1922_v6 }
 0x933   : > { %v1936_v19 = vpack.c.bf16 %v1935_v18, %v1935_v18 }
 0x935   : > { %2464 = vmatmul.mubr.bf16.vlgmr.msra.gmra.mrb[20].mxu1 %v1936_v19 }
 0x936   : > { %2677 = shalt.err (!%p2674_p13)
}
 0x937   : > { %s2678_s9 = scalar_lea.hbm %s3525_s3, 128  ;;  %s2682_s25 = scalar_lea.hbm %s3727_s16, 256 }
 0x938   : > { %p2679_p1 = scmp.ne.s32.totalorder %s3525_s3, %s2678_s9  ;;  %p2683_p8 = scmp.lt.u32.totalorder %s3525_s3, %s3727_s16 }
 0x939   : > { %p2684_p10 = scmp.lt.u32.totalorder %s2682_s25, %s2678_s9  ;;  %p2686_p2 = scmp.lt.u32.totalorder %s2678_s9, %s3525_s3 }
 0x93a   : > { %p2680_p0 = pnand %p2679_p1, %p3728_p3 }
 0x93b   : > { %p2685_p11 = por %p2684_p10, %p2683_p8 }
 0x93c   : > { %p2681_p4 = pneg %p2680_p0 }
 0x93d   : > { %p2687_p5 = por %p2686_p2, %p2685_p11 }
 0x93f   : > { %p2688_p6 = pnand %p2687_p5, %p2681_p4 }
 0x941   : > { %2691 = shalt.err (!%p2688_p6)
}
 0x942   : > { %2479 = dma.vmem_to_hbm [thread:$0]  (%p3728_p3), %s2080_s24, 128, %s3525_s3, %s2060_s14  }
 0x943   : > { %s3729_s26 = sld [smem:[#allocation52_spill]]  ;;  %s3730_s5 = sld [smem:[#allocation54_spill]] }
 0x944   : > { %s683_s15 = scalar_lea.vmem [#allocation15], %s2243_s22  ;;  %s3731_s24 = sld [smem:[#allocation56_spill]] }
 0x945   : > { %s2093_s30 = sshll.u32 %s683_s15, 4  ;;  %s2065_s12 = scalar_lea.sflag [#allocation16], %s3451_s17  ;;  %s3562_s30 = int_to_ptr.vmem [resolvable:$true] %s2093_s30 }
 0x946   : > { %s2692_s22 = scalar_lea.vmem %s3562_s30, 128  ;;  %s2800_s6 = smov [#allocation15]  }
 0x947   : > { %p2693_p7 = scmp.ne.s32.totalorder %s3562_s30, %s2692_s22  ;;  %s2696_s2 = sshll.u32 %s2800_s6, 4  ;;  %s2697_s2 = int_to_ptr.vmem [resolvable:$false] %s2696_s2 }
 0x948   : > { %s2698_s1 = scalar_lea.vmem %s2697_s2, 256  ;;  %p2699_p13 = scmp.lt.s32.totalorder %s3562_s30, %s2697_s2 }
 0x949   : > { %v2300_v20 = vld [vmem:[%s3729_s26] ss:$0 sm:$0xff]  ;;  %p2694_p9 = pnand %p2693_p7, %p3728_p3  ;;  %p2700_p1 = scmp.lt.s32.totalorder %s2698_s1, %s2692_s22 }
 0x94a   : > { %v2309_v22 = vld [vmem:[%s3730_s5] ss:$0 sm:$0xff]  ;;  %s3732_s14 = smov %s3731_s24  ;;  %s3560_s29 = scalar_lea.hbm %s3731_s24, %s2312_s18 }
 0x94b   : > { %p2695_p12 = pneg %p2694_p9  ;;  %p2701_p0 = por %p2700_p1, %p2699_p13 }
 0x94d   : > { %p2702_p4 = pnand %p2701_p0, %p2695_p12 }
 0xa08   : > { %v2042_v21 = vpop.f32.mrb[20].mxu1 }
 0xa09   : > { %v2043_v23 = vadd.f32 %v2300_v20, %v2042_v21  ;;  %v2465_v24 = vpop.f32.mrb[21].mxu1 }
 0xa0a   : > { %v2045_v25 = vpop.f32.mrb[22].mxu1 }
 0xa0b   : > { %v2055_v26 = vmul.f32 %v2309_v22, %v2043_v23  ;;  %v2466_v27 = vpop.f32.mrb[23].mxu1 }
 0xa0d   : > { %v2056_v28 = vadd.f32 %v2055_v26, %v3458_v41 }
 0xa0f   : > { %2058 = vst.msk [vmem:[%s683_s15] sm:$0xff] %vm696_vm0, %v2056_v28 }
 0xa10   : > { %2705 = shalt.err (!%p2702_p4)
}
 0xa11   : > { %s2706_s17 = scalar_lea.hbm %s3560_s29, 128  ;;  %s2710_s28 = scalar_lea.hbm %s3732_s14, 256 }
 0xa12   : > { %p2707_p8 = scmp.ne.s32.totalorder %s3560_s29, %s2706_s17  ;;  %p2711_p2 = scmp.lt.u32.totalorder %s3560_s29, %s3732_s14 }
 0xa13   : > { %p2712_p5 = scmp.lt.u32.totalorder %s2710_s28, %s2706_s17  ;;  %p2714_p7 = scmp.lt.u32.totalorder %s2706_s17, %s3560_s29 }
 0xa14   : > { %p2708_p10 = pnand %p2707_p8, %p3728_p3 }
 0xa15   : > { %p2713_p6 = por %p2712_p5, %p2711_p2 }
 0xa16   : > { %p2709_p11 = pneg %p2708_p10 }
 0xa17   : > { %p2715_p9 = por %p2714_p7, %p2713_p6 }
 0xa19   : > { %p2716_p12 = pnand %p2715_p9, %p2709_p11 }
 0xa1b   : > { %2719 = shalt.err (!%p2716_p12)
}
 0xa1c   : > { %2480 = dma.vmem_to_hbm [thread:$0]  (%p3728_p3), %s3562_s30, 128, %s3560_s29, %s2065_s12  }
 0xa1d PF: > { %s3733_s4 = sld [smem:[#allocation27_spill]]  ;;  %s3734_s7 = sld [smem:[#allocation22_spill]] }
 0xa1e   : > { %s3735_s0 = sld [smem:[#allocation30_spill]] }
 0xa23   : > { %p2506_p13 = scmp.ge.s32.totalorder %s3733_s4, 2  ;;  %s2105_s8 = sand.u32 1, %s3734_s7  }
 0xa24   : > { %p3736_p1 = scmp.ne.s32.totalorder %s3735_s0, 0  ;;  %s2106_s26 = scalar_lea.sflag [#allocation9], %s2105_s8 }
 0xa26   : > { %p2494_p0 = pnand %p2506_p13, %p3736_p1 }
 0xa28   : > { %2757 = dma.done.wait (!%p2494_p0), %s2106_s26, 128  }
 0xa29   : > { %2759 = vsyncadd (!%p2494_p0), %s2106_s26, 4294967168  ;;  %s2115_s20 = scalar_lea.sflag [#allocation16], %s2105_s8 }
 0xa2a   : > { %2761 = dma.done.wait (!%p2494_p0), %s2115_s20, 128  }
 0xa2b   : > { %2763 = vsyncadd (!%p2494_p0), %s2115_s20, 4294967168  ;;  %s40_s25 = sadd.s32 1, %s3733_s4   ;;  %s3737_s1 = sld [smem:[#allocation23_spill]] }
 0xa2c   : > { %p37_p4 = scmp.ge.s32.totalorder %s40_s25, 4   ;;  %s3738_s22 = sld [smem:[#allocation24_spill]] }
 0xa2d   : > { %s3739_s23 = sld [smem:[#allocation31_spill]]  ;;  %s3740_s24 = sld [smem:[#allocation26_spill]] }
 0xa2e   : > { %s3741_s2 = sld [smem:[#allocation28_spill]]  ;;  %39 = sbr.rel (!%p37_p4) target bundleno = 31 (0x1f), region = 171 }
 0xa35   :  { %2120 = vsyncpa [#allocation8], 1 }
 0xa36   :  { %2122 = vsyncpa [#allocation8 + $0x1], 1 }
 0xa37   :  { %2123 = vsyncpa [#allocation9], 1 }
 0xa38   :  { %2125 = vsyncpa [#allocation9 + $0x1], 1 }
 0xa39   :  { %2126 = vsyncpa [#allocation16], 1 }
 0xa3a   :  { %2128 = vsyncpa [#allocation16 + $0x1], 1 }
 0xa3b   :  { %2129 = vsyncpa [#allocation10], 1 }
 0xa3c   :  { %2131 = vsyncpa [#allocation10 + $0x1], 1 }
 0xa3d   :  { %2132 = vsyncpa [#allocation13], 1 }

</bundles_post_ra>
